<compile_context>
chip_gen: v7x
topology: tpu7x:2x2x1
jax: 0.10.0
libtpu: 0.0.40
codegen_flags: <defaults>
</compile_context>

<pallas_src>
import jax
import jax.numpy as jnp
from jax.experimental import pallas as pl
from jax.experimental.pallas import tpu as pltpu

# ----------------------------- configuration --------------------------------
B = 2            # batch
C_IN = 4         # image channels
IMG = 16         # spatial H = W
C_FEAT = 8       # stand-in CNN feature channels
HIDDEN = 32      # hidden_size
VOCAB = 50       # vocab_size
VOCAB_PAD = 128  # lane-dense padded vocab
SEQ = 8          # question length (max_len)
ANS_LEN = 5      # answer_max_len
SOS_ID = 1
EOS_ID = 2
BN_EPS = 1e-5
BIG_NEG = -1e30

F32 = jnp.float32
VMEM = pl.BlockSpec(memory_space=pltpu.MemorySpace.VMEM)
SMEM = pl.BlockSpec(memory_space=pltpu.MemorySpace.SMEM)


# ------------------------------- fused kernel --------------------------------
def vqa_fused_kernel(tokens_ref,                          # SMEM (B, SEQ) int32
                     patches_ref, wconv_ref, bconv_ref,   # EncoderCNN
                     pool_ref, wfc_ref, bfc_ref,
                     emb_enc_ref,                         # (VOCAB_PAD, H)
                     enc_wx_ref, enc_wh_ref, enc_b_ref,   # encoder LSTM
                     x0_ref,                              # (B, H) <sos> embedding
                     dec_wx_ref, dec_wh_ref, dec_b_ref,   # decoder LSTM
                     wout_ref, bout_ref, emb_dec_ref,     # decoder head / embedding
                     logp_ref, sym_ref, h_out_ref, c_out_ref):
    # ---- EncoderCNN: conv-as-matmul -> ReLU -> pool (matmul) -> fc (+BN folded)
    conv = jnp.maximum(
        jnp.dot(patches_ref[...], wconv_ref[...],
                preferred_element_type=F32) + bconv_ref[...], 0.0)        # (B*H*W, Cf)
    pooled = jnp.dot(pool_ref[...], conv, preferred_element_type=F32)     # (B, Cf)
    feature = (jnp.dot(pooled, wfc_ref[...], preferred_element_type=F32)
               + bfc_ref[...])                                            # (B, HIDDEN)

    # Weights / biases loaded once; everything below is a fully unrolled
    # dataflow (h, c, x are values in vregs, never written back to HBM).
    enc_wx, enc_wh, enc_b = enc_wx_ref[...], enc_wh_ref[...], enc_b_ref[...]
    dec_wx, dec_wh, dec_b = dec_wx_ref[...], dec_wh_ref[...], dec_b_ref[...]
    emb_enc = emb_enc_ref[...]
    emb_dec = emb_dec_ref[...]
    w_out = wout_ref[...]
    b_out = bout_ref[...]

    def lstm_step(x, h, c, wx, wh, b):
        # Fused gates: dot(x,Wx) + dot(h,Wh) + b -> (B, 4H=128), gate order
        # i,f,g,o along lanes.  Sigmoid on the full vreg, static 32-lane slices.
        gates = (jnp.dot(x, wx, preferred_element_type=F32)
                 + jnp.dot(h, wh, preferred_element_type=F32) + b)        # (B, 4H)
        sig = jax.nn.sigmoid(gates)
        i_g = sig[:, 0 * HIDDEN:1 * HIDDEN]
        f_g = sig[:, 1 * HIDDEN:2 * HIDDEN]
        o_g = sig[:, 3 * HIDDEN:4 * HIDDEN]
        g_g = jnp.tanh(gates[:, 2 * HIDDEN:3 * HIDDEN])
        c_new = f_g * c + i_g * g_g
        h_new = o_g * jnp.tanh(c_new)
        return h_new, c_new

    # ---- EncoderRNN: in-kernel question embedding + SEQ LSTM steps.
    # Build all SEQ*B one-hot rows from SMEM token scalars and gather every
    # question embedding with ONE matmul, off the serial per-step chain.
    row_iota = jax.lax.broadcasted_iota(jnp.int32, (SEQ * B, VOCAB_PAD), 0)
    lane_iota = jax.lax.broadcasted_iota(jnp.int32, (SEQ * B, VOCAB_PAD), 1)
    onehot_all = jnp.zeros((SEQ * B, VOCAB_PAD), F32)
    for t in range(SEQ):
        for b in range(B):
            tok = tokens_ref[b, t]
            onehot_all = jnp.where(
                (row_iota == t * B + b) & (lane_iota == tok), 1.0, onehot_all)
    x_all = jnp.dot(onehot_all, emb_enc, preferred_element_type=F32)      # (SEQ*B, H)

    # Reference VQAModel: h0 = feature expanded; for LSTM, h0 = (h0, h0),
    # i.e. BOTH h0 and c0 are the image feature.
    h = feature
    c = feature
    # TODO(synk): pack_padded_sequence variable-length masking not implemented;
    # all questions run for the full SEQ steps (encoder_outputs unused since
    # use_attention=False).
    for t in range(SEQ):
        x = x_all[B * t:B * t + B, :]                                     # (B, H)
        h, c = lstm_step(x, h, c, enc_wx, enc_wh, enc_b)

    # ---- DecoderRNN greedy decode (teacher_forcing_ratio=0): LSTM step ->
    # padded-vocab logits -> log_softmax -> argmax (iota/min) -> next-token
    # embedding via one-hot matmul against the VMEM-resident embedding table.
    lane_b = jax.lax.broadcasted_iota(jnp.int32, (B, VOCAB_PAD), 1)
    sym_lane = jax.lax.broadcasted_iota(jnp.int32, (B, ANS_LEN), 1)
    sym = jnp.zeros((B, ANS_LEN), jnp.int32)
    x = x0_ref[...]                                                       # <sos>
    logps = []
    for t in range(ANS_LEN):
        h, c = lstm_step(x, h, c, dec_wx, dec_wh, dec_b)
        logits = (jnp.dot(h, w_out, preferred_element_type=F32)
                  + b_out)                                                # (B, VOCAB_PAD)
        m = jnp.max(logits, axis=-1, keepdims=True)
        e = jnp.exp(logits - m)
        logps.append(logits - m - jnp.log(jnp.sum(e, axis=-1, keepdims=True)))
        # greedy symbol = first lane attaining the max (pads hold BIG_NEG bias)
        cand = jnp.where(logits == m, lane_b, VOCAB_PAD)
        best = jnp.min(cand, axis=-1, keepdims=True)                      # (B, 1)
        sym = jnp.where(sym_lane == t, best, sym)
        onehot = (lane_b == best).astype(F32)                             # (B, VOCAB_PAD)
        x = jnp.dot(onehot, emb_dec, preferred_element_type=F32)          # (B, H)

    # Dense epilogue stores (no per-step masked partial stores).
    logp_ref[...] = jnp.stack(logps, axis=0)                              # (ANS_LEN, B, VOCAB_PAD)
    sym_ref[...] = sym
    h_out_ref[...] = h
    c_out_ref[...] = c


# ------------------------------ parameters ------------------------------------
def init_params(key):
    ks = jax.random.split(key, 12)
    s = 0.1
    return {
        # EncoderCNN stand-in: conv3x3 -> relu -> GAP -> fc -> bn
        # TODO(synk): the real EncoderCNN wraps a pretrained ResNet152; replaced
        # here with a small synthetic conv backbone of matching output size.
        "w_conv": s * jax.random.normal(ks[0], (C_IN * 9, C_FEAT), F32),
        "b_conv": s * jax.random.normal(ks[1], (1, C_FEAT), F32),
        "w_fc": s * jax.random.normal(ks[2], (C_FEAT, HIDDEN), F32),
        "b_fc": s * jax.random.normal(ks[3], (1, HIDDEN), F32),
        "bn_gamma": jnp.ones((1, HIDDEN), F32),
        "bn_beta": jnp.zeros((1, HIDDEN), F32),
        "bn_mean": jnp.zeros((1, HIDDEN), F32),   # running stats (fresh init)
        "bn_var": jnp.ones((1, HIDDEN), F32),
        # EncoderRNN: embedding + LSTM(HIDDEN, HIDDEN); gate columns i,f,g,o
        "emb_enc": s * jax.random.normal(ks[4], (VOCAB, HIDDEN), F32),
        "enc_wih": s * jax.random.normal(ks[5], (HIDDEN, 4 * HIDDEN), F32),
        "enc_whh": s * jax.random.normal(ks[6], (HIDDEN, 4 * HIDDEN), F32),
        "enc_b": jnp.zeros((1, 4 * HIDDEN), F32),
        # DecoderRNN: embedding + LSTM(HIDDEN, HIDDEN) + Linear(HIDDEN, VOCAB)
        "emb_dec": s * jax.random.normal(ks[7], (VOCAB, HIDDEN), F32),
        "dec_wih": s * jax.random.normal(ks[8], (HIDDEN, 4 * HIDDEN), F32),
        "dec_whh": s * jax.random.normal(ks[9], (HIDDEN, 4 * HIDDEN), F32),
        "dec_b": jnp.zeros((1, 4 * HIDDEN), F32),
        "w_out": s * jax.random.normal(ks[10], (HIDDEN, VOCAB), F32),
        "b_out": s * jax.random.normal(ks[11], (1, VOCAB), F32),
    }


def pack_params(p):
    # Fold eval-mode BatchNorm1d (with its running stats) into the fc weights.
    scale = p["bn_gamma"] * jax.lax.rsqrt(p["bn_var"] + BN_EPS)           # (1, H)
    w_fc = p["w_fc"] * scale
    b_fc = (p["b_fc"] - p["bn_mean"]) * scale + p["bn_beta"]
    # Lane-dense vocab padding: zero weight columns/rows, BIG_NEG bias so padded
    # lanes never win max/argmax and vanish in exp.
    w_out = jnp.zeros((HIDDEN, VOCAB_PAD), F32).at[:, :VOCAB].set(p["w_out"])
    b_out = jnp.full((1, VOCAB_PAD), BIG_NEG, F32).at[:, :VOCAB].set(p["b_out"])
    emb_enc_pad = jnp.zeros((VOCAB_PAD, HIDDEN), F32).at[:VOCAB, :].set(p["emb_enc"])
    emb_dec_pad = jnp.zeros((VOCAB_PAD, HIDDEN), F32).at[:VOCAB, :].set(p["emb_dec"])
    # Block-diagonal average-pool matrix (B, B*H*W).
    pool_mat = jnp.repeat(jnp.eye(B, dtype=F32), IMG * IMG, axis=1) / float(IMG * IMG)
    # <sos> embedding baked into the packed params (static token id).
    x0_sos = jnp.broadcast_to(p["emb_dec"][SOS_ID], (B, HIDDEN))
    return {
        "w_conv": p["w_conv"], "b_conv": p["b_conv"], "pool_mat": pool_mat,
        "w_fc": w_fc, "b_fc": b_fc,
        "emb_enc_pad": emb_enc_pad,
        "enc_wx": p["enc_wih"], "enc_wh": p["enc_whh"], "enc_b": p["enc_b"],
        "x0_sos": x0_sos,
        "dec_wx": p["dec_wih"], "dec_wh": p["dec_whh"], "dec_b": p["dec_b"],
        "w_out_pad": w_out, "b_out_pad": b_out, "emb_dec_pad": emb_dec_pad,
    }


# ------------------------------ forward pass -----------------------------------
def _im2col(image_nchw):
    b, cin, h, w = image_nchw.shape
    x = jnp.transpose(image_nchw, (0, 2, 3, 1))                 # NHWC
    xp = jnp.pad(x, ((0, 0), (1, 1), (1, 1), (0, 0)))
    patches = [xp[:, dy:dy + h, dx:dx + w, :] for dy in range(3) for dx in range(3)]
    patches = jnp.concatenate(patches, axis=-1)                 # (B,H,W,Cin*9)
    return patches.reshape(b * h * w, cin * 9)


@jax.jit
def vqa_forward(image, input_tokens, pp):
    patches = _im2col(image)                                    # (B*H*W, Cin*9)
    logp_pad, symbols, h_dec, c_dec = pl.pallas_call(
        vqa_fused_kernel,
        out_shape=(
            jax.ShapeDtypeStruct((ANS_LEN, B, VOCAB_PAD), F32),
            jax.ShapeDtypeStruct((B, ANS_LEN), jnp.int32),
            jax.ShapeDtypeStruct((B, HIDDEN), F32),
            jax.ShapeDtypeStruct((B, HIDDEN), F32),
        ),
        in_specs=[SMEM] + [VMEM] * 17,
        out_specs=(VMEM, VMEM, VMEM, VMEM),
    )(input_tokens, patches,
      pp["w_conv"], pp["b_conv"], pp["pool_mat"], pp["w_fc"], pp["b_fc"],
      pp["emb_enc_pad"], pp["enc_wx"], pp["enc_wh"], pp["enc_b"],
      pp["x0_sos"], pp["dec_wx"], pp["dec_wh"], pp["dec_b"],
      pp["w_out_pad"], pp["b_out_pad"], pp["emb_dec_pad"])
    outputs = logp_pad[:, :, :VOCAB]                            # (ANS_LEN, B, VOCAB)
    return outputs, (h_dec, c_dec), symbols


# --------------------------------- main ----------------------------------------
if __name__ == "__main__":
    key = jax.random.PRNGKey(0)
    k_img, k_tok, k_par = jax.random.split(key, 3)

    image = jax.random.normal(k_img, (B, C_IN, IMG, IMG), F32)          # NCHW
    input_tokens = jax.random.randint(k_tok, (B, SEQ), 0, VOCAB, jnp.int32)
    params = init_params(k_par)
    packed = pack_params(params)

    outputs, (h_dec, c_dec), symbols = vqa_forward(image, input_tokens, packed)
    jax.block_until_ready((outputs, h_dec, c_dec, symbols))

    assert outputs.shape == (ANS_LEN, B, VOCAB)
    assert symbols.shape == (B, ANS_LEN) and symbols.dtype == jnp.int32
    assert h_dec.shape == (B, HIDDEN) and c_dec.shape == (B, HIDDEN)
    assert bool(jnp.all(jnp.isfinite(outputs)))
    # log_softmax sanity: probabilities over the real vocab sum to ~1.
    assert bool(jnp.all(jnp.abs(jnp.sum(jnp.exp(outputs), axis=-1) - 1.0) < 1e-3))
    # in-kernel greedy symbols agree with argmax over the returned log-probs.
    assert bool(jnp.all(symbols == jnp.argmax(outputs, axis=-1).astype(jnp.int32).T))
    print("KERNEL_OK")
</pallas_src>

<mosaic_0001>
module attributes {stable_mosaic.version = 11 : i64} {
  func.func @vqa_fused_kernel(%arg0: memref<2x8xi32, #tpu.memory_space<smem>>, %arg1: memref<512x36xf32, #tpu.memory_space<vmem>>, %arg2: memref<36x8xf32, #tpu.memory_space<vmem>>, %arg3: memref<1x8xf32, #tpu.memory_space<vmem>>, %arg4: memref<2x512xf32, #tpu.memory_space<vmem>>, %arg5: memref<8x32xf32, #tpu.memory_space<vmem>>, %arg6: memref<1x32xf32, #tpu.memory_space<vmem>>, %arg7: memref<128x32xf32, #tpu.memory_space<vmem>>, %arg8: memref<32x128xf32, #tpu.memory_space<vmem>>, %arg9: memref<32x128xf32, #tpu.memory_space<vmem>>, %arg10: memref<1x128xf32, #tpu.memory_space<vmem>>, %arg11: memref<2x32xf32, #tpu.memory_space<vmem>>, %arg12: memref<32x128xf32, #tpu.memory_space<vmem>>, %arg13: memref<32x128xf32, #tpu.memory_space<vmem>>, %arg14: memref<1x128xf32, #tpu.memory_space<vmem>>, %arg15: memref<32x128xf32, #tpu.memory_space<vmem>>, %arg16: memref<1x128xf32, #tpu.memory_space<vmem>>, %arg17: memref<128x32xf32, #tpu.memory_space<vmem>>, %arg18: memref<5x2x128xf32, #tpu.memory_space<vmem>>, %arg19: memref<2x5xi32, #tpu.memory_space<vmem>>, %arg20: memref<2x32xf32, #tpu.memory_space<vmem>>, %arg21: memref<2x32xf32, #tpu.memory_space<vmem>>) attributes {dimension_semantics = [], scalar_prefetch = 0 : i64, scratch_operands = 0 : i64, tpu.core_type = #tpu.core_type<tc>} {
    %c0 = arith.constant 0 : index
    %c0_0 = arith.constant 0 : index
    %0 = vector.load %arg1[%c0, %c0_0] : memref<512x36xf32, #tpu.memory_space<vmem>>, vector<512x36xf32>
    %c0_1 = arith.constant 0 : index
    %c0_2 = arith.constant 0 : index
    %1 = vector.load %arg2[%c0_1, %c0_2] : memref<36x8xf32, #tpu.memory_space<vmem>>, vector<36x8xf32>
    %cst = arith.constant dense<0.000000e+00> : vector<512x8xf32>
    %2 = tpu.matmul %0, %1, %cst {dimension_numbers = #tpu.dot_dimension_numbers<[1], [0], [0], [1], [0, 0, 1, 1], [], []>} : vector<512x36xf32>, vector<36x8xf32>, vector<512x8xf32> -> vector<512x8xf32>
    %c0_3 = arith.constant 0 : index
    %c0_4 = arith.constant 0 : index
    %3 = vector.load %arg3[%c0_3, %c0_4] : memref<1x8xf32, #tpu.memory_space<vmem>>, vector<1x8xf32>
    %4 = vector.broadcast %3 : vector<1x8xf32> to vector<512x8xf32>
    %5 = arith.addf %2, %4 : vector<512x8xf32>
    %cst_5 = arith.constant 0.000000e+00 : f32
    %6 = vector.broadcast %cst_5 : f32 to vector<512x8xf32>
    %7 = arith.maximumf %5, %6 : vector<512x8xf32>
    %c0_6 = arith.constant 0 : index
    %c0_7 = arith.constant 0 : index
    %8 = vector.load %arg4[%c0_6, %c0_7] : memref<2x512xf32, #tpu.memory_space<vmem>>, vector<2x512xf32>
    %cst_8 = arith.constant dense<0.000000e+00> : vector<2x8xf32>
    %9 = tpu.matmul %8, %7, %cst_8 {dimension_numbers = #tpu.dot_dimension_numbers<[1], [0], [0], [1], [0, 0, 1, 1], [], []>} : vector<2x512xf32>, vector<512x8xf32>, vector<2x8xf32> -> vector<2x8xf32>
    %c0_9 = arith.constant 0 : index
    %c0_10 = arith.constant 0 : index
    %10 = vector.load %arg5[%c0_9, %c0_10] : memref<8x32xf32, #tpu.memory_space<vmem>>, vector<8x32xf32>
    %cst_11 = arith.constant dense<0.000000e+00> : vector<2x32xf32>
    %11 = tpu.matmul %9, %10, %cst_11 {dimension_numbers = #tpu.dot_dimension_numbers<[1], [0], [0], [1], [0, 0, 1, 1], [], []>} : vector<2x8xf32>, vector<8x32xf32>, vector<2x32xf32> -> vector<2x32xf32>
    %c0_12 = arith.constant 0 : index
    %c0_13 = arith.constant 0 : index
    %12 = vector.load %arg6[%c0_12, %c0_13] : memref<1x32xf32, #tpu.memory_space<vmem>>, vector<1x32xf32>
    %13 = vector.broadcast %12 : vector<1x32xf32> to vector<2x32xf32>
    %14 = arith.addf %11, %13 : vector<2x32xf32>
    %c0_14 = arith.constant 0 : index
    %c0_15 = arith.constant 0 : index
    %15 = vector.load %arg8[%c0_14, %c0_15] : memref<32x128xf32, #tpu.memory_space<vmem>>, vector<32x128xf32>
    %c0_16 = arith.constant 0 : index
    %c0_17 = arith.constant 0 : index
    %16 = vector.load %arg9[%c0_16, %c0_17] : memref<32x128xf32, #tpu.memory_space<vmem>>, vector<32x128xf32>
    %c0_18 = arith.constant 0 : index
    %c0_19 = arith.constant 0 : index
    %17 = vector.load %arg10[%c0_18, %c0_19] : memref<1x128xf32, #tpu.memory_space<vmem>>, vector<1x128xf32>
    %c0_20 = arith.constant 0 : index
    %c0_21 = arith.constant 0 : index
    %18 = vector.load %arg12[%c0_20, %c0_21] : memref<32x128xf32, #tpu.memory_space<vmem>>, vector<32x128xf32>
    %c0_22 = arith.constant 0 : index
    %c0_23 = arith.constant 0 : index
    %19 = vector.load %arg13[%c0_22, %c0_23] : memref<32x128xf32, #tpu.memory_space<vmem>>, vector<32x128xf32>
    %c0_24 = arith.constant 0 : index
    %c0_25 = arith.constant 0 : index
    %20 = vector.load %arg14[%c0_24, %c0_25] : memref<1x128xf32, #tpu.memory_space<vmem>>, vector<1x128xf32>
    %c0_26 = arith.constant 0 : index
    %c0_27 = arith.constant 0 : index
    %21 = vector.load %arg7[%c0_26, %c0_27] : memref<128x32xf32, #tpu.memory_space<vmem>>, vector<128x32xf32>
    %c0_28 = arith.constant 0 : index
    %c0_29 = arith.constant 0 : index
    %22 = vector.load %arg17[%c0_28, %c0_29] : memref<128x32xf32, #tpu.memory_space<vmem>>, vector<128x32xf32>
    %c0_30 = arith.constant 0 : index
    %c0_31 = arith.constant 0 : index
    %23 = vector.load %arg15[%c0_30, %c0_31] : memref<32x128xf32, #tpu.memory_space<vmem>>, vector<32x128xf32>
    %c0_32 = arith.constant 0 : index
    %c0_33 = arith.constant 0 : index
    %24 = vector.load %arg16[%c0_32, %c0_33] : memref<1x128xf32, #tpu.memory_space<vmem>>, vector<1x128xf32>
    %25 = tpu.iota {dimensions = array<i32: 0>} : vector<16x128xi32>
    %26 = tpu.iota {dimensions = array<i32: 1>} : vector<16x128xi32>
    %cst_34 = arith.constant 0.000000e+00 : f32
    %27 = vector.broadcast %cst_34 : f32 to vector<16x128xf32>
    %c0_35 = arith.constant 0 : index
    %c0_36 = arith.constant 0 : index
    %28 = memref.load %arg0[%c0_35, %c0_36] : memref<2x8xi32, #tpu.memory_space<smem>>
    %c0_i32 = arith.constant 0 : i32
    %29 = vector.broadcast %c0_i32 : i32 to vector<16x128xi32>
    %30 = arith.cmpi eq, %25, %29 : vector<16x128xi32>
    %31 = vector.broadcast %28 : i32 to vector<16x128xi32>
    %32 = arith.cmpi eq, %26, %31 : vector<16x128xi32>
    %33 = arith.andi %30, %32 : vector<16x128xi1>
    %cst_37 = arith.constant 1.000000e+00 : f32
    %34 = vector.broadcast %cst_37 : f32 to vector<16x128xf32>
    %35 = arith.select %33, %34, %27 : vector<16x128xi1>, vector<16x128xf32>
    %c1 = arith.constant 1 : index
    %c0_38 = arith.constant 0 : index
    %36 = memref.load %arg0[%c1, %c0_38] : memref<2x8xi32, #tpu.memory_space<smem>>
    %c1_i32 = arith.constant 1 : i32
    %37 = vector.broadcast %c1_i32 : i32 to vector<16x128xi32>
    %38 = arith.cmpi eq, %25, %37 : vector<16x128xi32>
    %39 = vector.broadcast %36 : i32 to vector<16x128xi32>
    %40 = arith.cmpi eq, %26, %39 : vector<16x128xi32>
    %41 = arith.andi %38, %40 : vector<16x128xi1>
    %cst_39 = arith.constant 1.000000e+00 : f32
    %42 = vector.broadcast %cst_39 : f32 to vector<16x128xf32>
    %43 = arith.select %41, %42, %35 : vector<16x128xi1>, vector<16x128xf32>
    %c0_40 = arith.constant 0 : index
    %c1_41 = arith.constant 1 : index
    %44 = memref.load %arg0[%c0_40, %c1_41] : memref<2x8xi32, #tpu.memory_space<smem>>
    %c2_i32 = arith.constant 2 : i32
    %45 = vector.broadcast %c2_i32 : i32 to vector<16x128xi32>
    %46 = arith.cmpi eq, %25, %45 : vector<16x128xi32>
    %47 = vector.broadcast %44 : i32 to vector<16x128xi32>
    %48 = arith.cmpi eq, %26, %47 : vector<16x128xi32>
    %49 = arith.andi %46, %48 : vector<16x128xi1>
    %cst_42 = arith.constant 1.000000e+00 : f32
    %50 = vector.broadcast %cst_42 : f32 to vector<16x128xf32>
    %51 = arith.select %49, %50, %43 : vector<16x128xi1>, vector<16x128xf32>
    %c1_43 = arith.constant 1 : index
    %c1_44 = arith.constant 1 : index
    %52 = memref.load %arg0[%c1_43, %c1_44] : memref<2x8xi32, #tpu.memory_space<smem>>
    %c3_i32 = arith.constant 3 : i32
    %53 = vector.broadcast %c3_i32 : i32 to vector<16x128xi32>
    %54 = arith.cmpi eq, %25, %53 : vector<16x128xi32>
    %55 = vector.broadcast %52 : i32 to vector<16x128xi32>
    %56 = arith.cmpi eq, %26, %55 : vector<16x128xi32>
    %57 = arith.andi %54, %56 : vector<16x128xi1>
    %cst_45 = arith.constant 1.000000e+00 : f32
    %58 = vector.broadcast %cst_45 : f32 to vector<16x128xf32>
    %59 = arith.select %57, %58, %51 : vector<16x128xi1>, vector<16x128xf32>
    %c0_46 = arith.constant 0 : index
    %c2 = arith.constant 2 : index
    %60 = memref.load %arg0[%c0_46, %c2] : memref<2x8xi32, #tpu.memory_space<smem>>
    %c4_i32 = arith.constant 4 : i32
    %61 = vector.broadcast %c4_i32 : i32 to vector<16x128xi32>
    %62 = arith.cmpi eq, %25, %61 : vector<16x128xi32>
    %63 = vector.broadcast %60 : i32 to vector<16x128xi32>
    %64 = arith.cmpi eq, %26, %63 : vector<16x128xi32>
    %65 = arith.andi %62, %64 : vector<16x128xi1>
    %cst_47 = arith.constant 1.000000e+00 : f32
    %66 = vector.broadcast %cst_47 : f32 to vector<16x128xf32>
    %67 = arith.select %65, %66, %59 : vector<16x128xi1>, vector<16x128xf32>
    %c1_48 = arith.constant 1 : index
    %c2_49 = arith.constant 2 : index
    %68 = memref.load %arg0[%c1_48, %c2_49] : memref<2x8xi32, #tpu.memory_space<smem>>
    %c5_i32 = arith.constant 5 : i32
    %69 = vector.broadcast %c5_i32 : i32 to vector<16x128xi32>
    %70 = arith.cmpi eq, %25, %69 : vector<16x128xi32>
    %71 = vector.broadcast %68 : i32 to vector<16x128xi32>
    %72 = arith.cmpi eq, %26, %71 : vector<16x128xi32>
    %73 = arith.andi %70, %72 : vector<16x128xi1>
    %cst_50 = arith.constant 1.000000e+00 : f32
    %74 = vector.broadcast %cst_50 : f32 to vector<16x128xf32>
    %75 = arith.select %73, %74, %67 : vector<16x128xi1>, vector<16x128xf32>
    %c0_51 = arith.constant 0 : index
    %c3 = arith.constant 3 : index
    %76 = memref.load %arg0[%c0_51, %c3] : memref<2x8xi32, #tpu.memory_space<smem>>
    %c6_i32 = arith.constant 6 : i32
    %77 = vector.broadcast %c6_i32 : i32 to vector<16x128xi32>
    %78 = arith.cmpi eq, %25, %77 : vector<16x128xi32>
    %79 = vector.broadcast %76 : i32 to vector<16x128xi32>
    %80 = arith.cmpi eq, %26, %79 : vector<16x128xi32>
    %81 = arith.andi %78, %80 : vector<16x128xi1>
    %cst_52 = arith.constant 1.000000e+00 : f32
    %82 = vector.broadcast %cst_52 : f32 to vector<16x128xf32>
    %83 = arith.select %81, %82, %75 : vector<16x128xi1>, vector<16x128xf32>
    %c1_53 = arith.constant 1 : index
    %c3_54 = arith.constant 3 : index
    %84 = memref.load %arg0[%c1_53, %c3_54] : memref<2x8xi32, #tpu.memory_space<smem>>
    %c7_i32 = arith.constant 7 : i32
    %85 = vector.broadcast %c7_i32 : i32 to vector<16x128xi32>
    %86 = arith.cmpi eq, %25, %85 : vector<16x128xi32>
    %87 = vector.broadcast %84 : i32 to vector<16x128xi32>
    %88 = arith.cmpi eq, %26, %87 : vector<16x128xi32>
    %89 = arith.andi %86, %88 : vector<16x128xi1>
    %cst_55 = arith.constant 1.000000e+00 : f32
    %90 = vector.broadcast %cst_55 : f32 to vector<16x128xf32>
    %91 = arith.select %89, %90, %83 : vector<16x128xi1>, vector<16x128xf32>
    %c0_56 = arith.constant 0 : index
    %c4 = arith.constant 4 : index
    %92 = memref.load %arg0[%c0_56, %c4] : memref<2x8xi32, #tpu.memory_space<smem>>
    %c8_i32 = arith.constant 8 : i32
    %93 = vector.broadcast %c8_i32 : i32 to vector<16x128xi32>
    %94 = arith.cmpi eq, %25, %93 : vector<16x128xi32>
    %95 = vector.broadcast %92 : i32 to vector<16x128xi32>
    %96 = arith.cmpi eq, %26, %95 : vector<16x128xi32>
    %97 = arith.andi %94, %96 : vector<16x128xi1>
    %cst_57 = arith.constant 1.000000e+00 : f32
    %98 = vector.broadcast %cst_57 : f32 to vector<16x128xf32>
    %99 = arith.select %97, %98, %91 : vector<16x128xi1>, vector<16x128xf32>
    %c1_58 = arith.constant 1 : index
    %c4_59 = arith.constant 4 : index
    %100 = memref.load %arg0[%c1_58, %c4_59] : memref<2x8xi32, #tpu.memory_space<smem>>
    %c9_i32 = arith.constant 9 : i32
    %101 = vector.broadcast %c9_i32 : i32 to vector<16x128xi32>
    %102 = arith.cmpi eq, %25, %101 : vector<16x128xi32>
    %103 = vector.broadcast %100 : i32 to vector<16x128xi32>
    %104 = arith.cmpi eq, %26, %103 : vector<16x128xi32>
    %105 = arith.andi %102, %104 : vector<16x128xi1>
    %cst_60 = arith.constant 1.000000e+00 : f32
    %106 = vector.broadcast %cst_60 : f32 to vector<16x128xf32>
    %107 = arith.select %105, %106, %99 : vector<16x128xi1>, vector<16x128xf32>
    %c0_61 = arith.constant 0 : index
    %c5 = arith.constant 5 : index
    %108 = memref.load %arg0[%c0_61, %c5] : memref<2x8xi32, #tpu.memory_space<smem>>
    %c10_i32 = arith.constant 10 : i32
    %109 = vector.broadcast %c10_i32 : i32 to vector<16x128xi32>
    %110 = arith.cmpi eq, %25, %109 : vector<16x128xi32>
    %111 = vector.broadcast %108 : i32 to vector<16x128xi32>
    %112 = arith.cmpi eq, %26, %111 : vector<16x128xi32>
    %113 = arith.andi %110, %112 : vector<16x128xi1>
    %cst_62 = arith.constant 1.000000e+00 : f32
    %114 = vector.broadcast %cst_62 : f32 to vector<16x128xf32>
    %115 = arith.select %113, %114, %107 : vector<16x128xi1>, vector<16x128xf32>
    %c1_63 = arith.constant 1 : index
    %c5_64 = arith.constant 5 : index
    %116 = memref.load %arg0[%c1_63, %c5_64] : memref<2x8xi32, #tpu.memory_space<smem>>
    %c11_i32 = arith.constant 11 : i32
    %117 = vector.broadcast %c11_i32 : i32 to vector<16x128xi32>
    %118 = arith.cmpi eq, %25, %117 : vector<16x128xi32>
    %119 = vector.broadcast %116 : i32 to vector<16x128xi32>
    %120 = arith.cmpi eq, %26, %119 : vector<16x128xi32>
    %121 = arith.andi %118, %120 : vector<16x128xi1>
    %cst_65 = arith.constant 1.000000e+00 : f32
    %122 = vector.broadcast %cst_65 : f32 to vector<16x128xf32>
    %123 = arith.select %121, %122, %115 : vector<16x128xi1>, vector<16x128xf32>
    %c0_66 = arith.constant 0 : index
    %c6 = arith.constant 6 : index
    %124 = memref.load %arg0[%c0_66, %c6] : memref<2x8xi32, #tpu.memory_space<smem>>
    %c12_i32 = arith.constant 12 : i32
    %125 = vector.broadcast %c12_i32 : i32 to vector<16x128xi32>
    %126 = arith.cmpi eq, %25, %125 : vector<16x128xi32>
    %127 = vector.broadcast %124 : i32 to vector<16x128xi32>
    %128 = arith.cmpi eq, %26, %127 : vector<16x128xi32>
    %129 = arith.andi %126, %128 : vector<16x128xi1>
    %cst_67 = arith.constant 1.000000e+00 : f32
    %130 = vector.broadcast %cst_67 : f32 to vector<16x128xf32>
    %131 = arith.select %129, %130, %123 : vector<16x128xi1>, vector<16x128xf32>
    %c1_68 = arith.constant 1 : index
    %c6_69 = arith.constant 6 : index
    %132 = memref.load %arg0[%c1_68, %c6_69] : memref<2x8xi32, #tpu.memory_space<smem>>
    %c13_i32 = arith.constant 13 : i32
    %133 = vector.broadcast %c13_i32 : i32 to vector<16x128xi32>
    %134 = arith.cmpi eq, %25, %133 : vector<16x128xi32>
    %135 = vector.broadcast %132 : i32 to vector<16x128xi32>
    %136 = arith.cmpi eq, %26, %135 : vector<16x128xi32>
    %137 = arith.andi %134, %136 : vector<16x128xi1>
    %cst_70 = arith.constant 1.000000e+00 : f32
    %138 = vector.broadcast %cst_70 : f32 to vector<16x128xf32>
    %139 = arith.select %137, %138, %131 : vector<16x128xi1>, vector<16x128xf32>
    %c0_71 = arith.constant 0 : index
    %c7 = arith.constant 7 : index
    %140 = memref.load %arg0[%c0_71, %c7] : memref<2x8xi32, #tpu.memory_space<smem>>
    %c14_i32 = arith.constant 14 : i32
    %141 = vector.broadcast %c14_i32 : i32 to vector<16x128xi32>
    %142 = arith.cmpi eq, %25, %141 : vector<16x128xi32>
    %143 = vector.broadcast %140 : i32 to vector<16x128xi32>
    %144 = arith.cmpi eq, %26, %143 : vector<16x128xi32>
    %145 = arith.andi %142, %144 : vector<16x128xi1>
    %cst_72 = arith.constant 1.000000e+00 : f32
    %146 = vector.broadcast %cst_72 : f32 to vector<16x128xf32>
    %147 = arith.select %145, %146, %139 : vector<16x128xi1>, vector<16x128xf32>
    %c1_73 = arith.constant 1 : index
    %c7_74 = arith.constant 7 : index
    %148 = memref.load %arg0[%c1_73, %c7_74] : memref<2x8xi32, #tpu.memory_space<smem>>
    %c15_i32 = arith.constant 15 : i32
    %149 = vector.broadcast %c15_i32 : i32 to vector<16x128xi32>
    %150 = arith.cmpi eq, %25, %149 : vector<16x128xi32>
    %151 = vector.broadcast %148 : i32 to vector<16x128xi32>
    %152 = arith.cmpi eq, %26, %151 : vector<16x128xi32>
    %153 = arith.andi %150, %152 : vector<16x128xi1>
    %cst_75 = arith.constant 1.000000e+00 : f32
    %154 = vector.broadcast %cst_75 : f32 to vector<16x128xf32>
    %155 = arith.select %153, %154, %147 : vector<16x128xi1>, vector<16x128xf32>
    %cst_76 = arith.constant dense<0.000000e+00> : vector<16x32xf32>
    %156 = tpu.matmul %155, %21, %cst_76 {dimension_numbers = #tpu.dot_dimension_numbers<[1], [0], [0], [1], [0, 0, 1, 1], [], []>} : vector<16x128xf32>, vector<128x32xf32>, vector<16x32xf32> -> vector<16x32xf32>
    %157 = vector.extract_strided_slice %156 {offsets = [0, 0], sizes = [2, 32], strides = [1, 1]} : vector<16x32xf32> to vector<2x32xf32>
    %cst_77 = arith.constant dense<0.000000e+00> : vector<2x128xf32>
    %158 = tpu.matmul %157, %15, %cst_77 {dimension_numbers = #tpu.dot_dimension_numbers<[1], [0], [0], [1], [0, 0, 1, 1], [], []>} : vector<2x32xf32>, vector<32x128xf32>, vector<2x128xf32> -> vector<2x128xf32>
    %cst_78 = arith.constant dense<0.000000e+00> : vector<2x128xf32>
    %159 = tpu.matmul %14, %16, %cst_78 {dimension_numbers = #tpu.dot_dimension_numbers<[1], [0], [0], [1], [0, 0, 1, 1], [], []>} : vector<2x32xf32>, vector<32x128xf32>, vector<2x128xf32> -> vector<2x128xf32>
    %160 = arith.addf %158, %159 : vector<2x128xf32>
    %161 = vector.broadcast %17 : vector<1x128xf32> to vector<2x128xf32>
    %162 = arith.addf %160, %161 : vector<2x128xf32>
    %163 = arith.negf %162 : vector<2x128xf32>
    %164 = math.exp %163 : vector<2x128xf32>
    %cst_79 = arith.constant 1.000000e+00 : f32
    %165 = vector.broadcast %cst_79 : f32 to vector<2x128xf32>
    %166 = arith.addf %165, %164 : vector<2x128xf32>
    %167 = arith.divf %165, %166 : vector<2x128xf32>
    %168 = vector.extract_strided_slice %167 {offsets = [0, 0], sizes = [2, 32], strides = [1, 1]} : vector<2x128xf32> to vector<2x32xf32>
    %169 = vector.extract_strided_slice %167 {offsets = [0, 32], sizes = [2, 32], strides = [1, 1]} : vector<2x128xf32> to vector<2x32xf32>
    %170 = vector.extract_strided_slice %167 {offsets = [0, 96], sizes = [2, 32], strides = [1, 1]} : vector<2x128xf32> to vector<2x32xf32>
    %171 = vector.extract_strided_slice %162 {offsets = [0, 64], sizes = [2, 32], strides = [1, 1]} : vector<2x128xf32> to vector<2x32xf32>
    %172 = math.tanh %171 : vector<2x32xf32>
    %173 = arith.mulf %169, %14 : vector<2x32xf32>
    %174 = arith.mulf %168, %172 : vector<2x32xf32>
    %175 = arith.addf %173, %174 : vector<2x32xf32>
    %176 = math.tanh %175 : vector<2x32xf32>
    %177 = arith.mulf %170, %176 : vector<2x32xf32>
    %178 = vector.extract_strided_slice %156 {offsets = [2, 0], sizes = [2, 32], strides = [1, 1]} : vector<16x32xf32> to vector<2x32xf32>
    %cst_80 = arith.constant dense<0.000000e+00> : vector<2x128xf32>
    %179 = tpu.matmul %178, %15, %cst_80 {dimension_numbers = #tpu.dot_dimension_numbers<[1], [0], [0], [1], [0, 0, 1, 1], [], []>} : vector<2x32xf32>, vector<32x128xf32>, vector<2x128xf32> -> vector<2x128xf32>
    %cst_81 = arith.constant dense<0.000000e+00> : vector<2x128xf32>
    %180 = tpu.matmul %177, %16, %cst_81 {dimension_numbers = #tpu.dot_dimension_numbers<[1], [0], [0], [1], [0, 0, 1, 1], [], []>} : vector<2x32xf32>, vector<32x128xf32>, vector<2x128xf32> -> vector<2x128xf32>
    %181 = arith.addf %179, %180 : vector<2x128xf32>
    %182 = vector.broadcast %17 : vector<1x128xf32> to vector<2x128xf32>
    %183 = arith.addf %181, %182 : vector<2x128xf32>
    %184 = arith.negf %183 : vector<2x128xf32>
    %185 = math.exp %184 : vector<2x128xf32>
    %cst_82 = arith.constant 1.000000e+00 : f32
    %186 = vector.broadcast %cst_82 : f32 to vector<2x128xf32>
    %187 = arith.addf %186, %185 : vector<2x128xf32>
    %188 = arith.divf %186, %187 : vector<2x128xf32>
    %189 = vector.extract_strided_slice %188 {offsets = [0, 0], sizes = [2, 32], strides = [1, 1]} : vector<2x128xf32> to vector<2x32xf32>
    %190 = vector.extract_strided_slice %188 {offsets = [0, 32], sizes = [2, 32], strides = [1, 1]} : vector<2x128xf32> to vector<2x32xf32>
    %191 = vector.extract_strided_slice %188 {offsets = [0, 96], sizes = [2, 32], strides = [1, 1]} : vector<2x128xf32> to vector<2x32xf32>
    %192 = vector.extract_strided_slice %183 {offsets = [0, 64], sizes = [2, 32], strides = [1, 1]} : vector<2x128xf32> to vector<2x32xf32>
    %193 = math.tanh %192 : vector<2x32xf32>
    %194 = arith.mulf %190, %175 : vector<2x32xf32>
    %195 = arith.mulf %189, %193 : vector<2x32xf32>
    %196 = arith.addf %194, %195 : vector<2x32xf32>
    %197 = math.tanh %196 : vector<2x32xf32>
    %198 = arith.mulf %191, %197 : vector<2x32xf32>
    %199 = vector.extract_strided_slice %156 {offsets = [4, 0], sizes = [2, 32], strides = [1, 1]} : vector<16x32xf32> to vector<2x32xf32>
    %cst_83 = arith.constant dense<0.000000e+00> : vector<2x128xf32>
    %200 = tpu.matmul %199, %15, %cst_83 {dimension_numbers = #tpu.dot_dimension_numbers<[1], [0], [0], [1], [0, 0, 1, 1], [], []>} : vector<2x32xf32>, vector<32x128xf32>, vector<2x128xf32> -> vector<2x128xf32>
    %cst_84 = arith.constant dense<0.000000e+00> : vector<2x128xf32>
    %201 = tpu.matmul %198, %16, %cst_84 {dimension_numbers = #tpu.dot_dimension_numbers<[1], [0], [0], [1], [0, 0, 1, 1], [], []>} : vector<2x32xf32>, vector<32x128xf32>, vector<2x128xf32> -> vector<2x128xf32>
    %202 = arith.addf %200, %201 : vector<2x128xf32>
    %203 = vector.broadcast %17 : vector<1x128xf32> to vector<2x128xf32>
    %204 = arith.addf %202, %203 : vector<2x128xf32>
    %205 = arith.negf %204 : vector<2x128xf32>
    %206 = math.exp %205 : vector<2x128xf32>
    %cst_85 = arith.constant 1.000000e+00 : f32
    %207 = vector.broadcast %cst_85 : f32 to vector<2x128xf32>
    %208 = arith.addf %207, %206 : vector<2x128xf32>
    %209 = arith.divf %207, %208 : vector<2x128xf32>
    %210 = vector.extract_strided_slice %209 {offsets = [0, 0], sizes = [2, 32], strides = [1, 1]} : vector<2x128xf32> to vector<2x32xf32>
    %211 = vector.extract_strided_slice %209 {offsets = [0, 32], sizes = [2, 32], strides = [1, 1]} : vector<2x128xf32> to vector<2x32xf32>
    %212 = vector.extract_strided_slice %209 {offsets = [0, 96], sizes = [2, 32], strides = [1, 1]} : vector<2x128xf32> to vector<2x32xf32>
    %213 = vector.extract_strided_slice %204 {offsets = [0, 64], sizes = [2, 32], strides = [1, 1]} : vector<2x128xf32> to vector<2x32xf32>
    %214 = math.tanh %213 : vector<2x32xf32>
    %215 = arith.mulf %211, %196 : vector<2x32xf32>
    %216 = arith.mulf %210, %214 : vector<2x32xf32>
    %217 = arith.addf %215, %216 : vector<2x32xf32>
    %218 = math.tanh %217 : vector<2x32xf32>
    %219 = arith.mulf %212, %218 : vector<2x32xf32>
    %220 = vector.extract_strided_slice %156 {offsets = [6, 0], sizes = [2, 32], strides = [1, 1]} : vector<16x32xf32> to vector<2x32xf32>
    %cst_86 = arith.constant dense<0.000000e+00> : vector<2x128xf32>
    %221 = tpu.matmul %220, %15, %cst_86 {dimension_numbers = #tpu.dot_dimension_numbers<[1], [0], [0], [1], [0, 0, 1, 1], [], []>} : vector<2x32xf32>, vector<32x128xf32>, vector<2x128xf32> -> vector<2x128xf32>
    %cst_87 = arith.constant dense<0.000000e+00> : vector<2x128xf32>
    %222 = tpu.matmul %219, %16, %cst_87 {dimension_numbers = #tpu.dot_dimension_numbers<[1], [0], [0], [1], [0, 0, 1, 1], [], []>} : vector<2x32xf32>, vector<32x128xf32>, vector<2x128xf32> -> vector<2x128xf32>
    %223 = arith.addf %221, %222 : vector<2x128xf32>
    %224 = vector.broadcast %17 : vector<1x128xf32> to vector<2x128xf32>
    %225 = arith.addf %223, %224 : vector<2x128xf32>
    %226 = arith.negf %225 : vector<2x128xf32>
    %227 = math.exp %226 : vector<2x128xf32>
    %cst_88 = arith.constant 1.000000e+00 : f32
    %228 = vector.broadcast %cst_88 : f32 to vector<2x128xf32>
    %229 = arith.addf %228, %227 : vector<2x128xf32>
    %230 = arith.divf %228, %229 : vector<2x128xf32>
    %231 = vector.extract_strided_slice %230 {offsets = [0, 0], sizes = [2, 32], strides = [1, 1]} : vector<2x128xf32> to vector<2x32xf32>
    %232 = vector.extract_strided_slice %230 {offsets = [0, 32], sizes = [2, 32], strides = [1, 1]} : vector<2x128xf32> to vector<2x32xf32>
    %233 = vector.extract_strided_slice %230 {offsets = [0, 96], sizes = [2, 32], strides = [1, 1]} : vector<2x128xf32> to vector<2x32xf32>
    %234 = vector.extract_strided_slice %225 {offsets = [0, 64], sizes = [2, 32], strides = [1, 1]} : vector<2x128xf32> to vector<2x32xf32>
    %235 = math.tanh %234 : vector<2x32xf32>
    %236 = arith.mulf %232, %217 : vector<2x32xf32>
    %237 = arith.mulf %231, %235 : vector<2x32xf32>
    %238 = arith.addf %236, %237 : vector<2x32xf32>
    %239 = math.tanh %238 : vector<2x32xf32>
    %240 = arith.mulf %233, %239 : vector<2x32xf32>
    %241 = vector.extract_strided_slice %156 {offsets = [8, 0], sizes = [2, 32], strides = [1, 1]} : vector<16x32xf32> to vector<2x32xf32>
    %cst_89 = arith.constant dense<0.000000e+00> : vector<2x128xf32>
    %242 = tpu.matmul %241, %15, %cst_89 {dimension_numbers = #tpu.dot_dimension_numbers<[1], [0], [0], [1], [0, 0, 1, 1], [], []>} : vector<2x32xf32>, vector<32x128xf32>, vector<2x128xf32> -> vector<2x128xf32>
    %cst_90 = arith.constant dense<0.000000e+00> : vector<2x128xf32>
    %243 = tpu.matmul %240, %16, %cst_90 {dimension_numbers = #tpu.dot_dimension_numbers<[1], [0], [0], [1], [0, 0, 1, 1], [], []>} : vector<2x32xf32>, vector<32x128xf32>, vector<2x128xf32> -> vector<2x128xf32>
    %244 = arith.addf %242, %243 : vector<2x128xf32>
    %245 = vector.broadcast %17 : vector<1x128xf32> to vector<2x128xf32>
    %246 = arith.addf %244, %245 : vector<2x128xf32>
    %247 = arith.negf %246 : vector<2x128xf32>
    %248 = math.exp %247 : vector<2x128xf32>
    %cst_91 = arith.constant 1.000000e+00 : f32
    %249 = vector.broadcast %cst_91 : f32 to vector<2x128xf32>
    %250 = arith.addf %249, %248 : vector<2x128xf32>
    %251 = arith.divf %249, %250 : vector<2x128xf32>
    %252 = vector.extract_strided_slice %251 {offsets = [0, 0], sizes = [2, 32], strides = [1, 1]} : vector<2x128xf32> to vector<2x32xf32>
    %253 = vector.extract_strided_slice %251 {offsets = [0, 32], sizes = [2, 32], strides = [1, 1]} : vector<2x128xf32> to vector<2x32xf32>
    %254 = vector.extract_strided_slice %251 {offsets = [0, 96], sizes = [2, 32], strides = [1, 1]} : vector<2x128xf32> to vector<2x32xf32>
    %255 = vector.extract_strided_slice %246 {offsets = [0, 64], sizes = [2, 32], strides = [1, 1]} : vector<2x128xf32> to vector<2x32xf32>
    %256 = math.tanh %255 : vector<2x32xf32>
    %257 = arith.mulf %253, %238 : vector<2x32xf32>
    %258 = arith.mulf %252, %256 : vector<2x32xf32>
    %259 = arith.addf %257, %258 : vector<2x32xf32>
    %260 = math.tanh %259 : vector<2x32xf32>
    %261 = arith.mulf %254, %260 : vector<2x32xf32>
    %262 = vector.extract_strided_slice %156 {offsets = [10, 0], sizes = [2, 32], strides = [1, 1]} : vector<16x32xf32> to vector<2x32xf32>
    %cst_92 = arith.constant dense<0.000000e+00> : vector<2x128xf32>
    %263 = tpu.matmul %262, %15, %cst_92 {dimension_numbers = #tpu.dot_dimension_numbers<[1], [0], [0], [1], [0, 0, 1, 1], [], []>} : vector<2x32xf32>, vector<32x128xf32>, vector<2x128xf32> -> vector<2x128xf32>
    %cst_93 = arith.constant dense<0.000000e+00> : vector<2x128xf32>
    %264 = tpu.matmul %261, %16, %cst_93 {dimension_numbers = #tpu.dot_dimension_numbers<[1], [0], [0], [1], [0, 0, 1, 1], [], []>} : vector<2x32xf32>, vector<32x128xf32>, vector<2x128xf32> -> vector<2x128xf32>
    %265 = arith.addf %263, %264 : vector<2x128xf32>
    %266 = vector.broadcast %17 : vector<1x128xf32> to vector<2x128xf32>
    %267 = arith.addf %265, %266 : vector<2x128xf32>
    %268 = arith.negf %267 : vector<2x128xf32>
    %269 = math.exp %268 : vector<2x128xf32>
    %cst_94 = arith.constant 1.000000e+00 : f32
    %270 = vector.broadcast %cst_94 : f32 to vector<2x128xf32>
    %271 = arith.addf %270, %269 : vector<2x128xf32>
    %272 = arith.divf %270, %271 : vector<2x128xf32>
    %273 = vector.extract_strided_slice %272 {offsets = [0, 0], sizes = [2, 32], strides = [1, 1]} : vector<2x128xf32> to vector<2x32xf32>
    %274 = vector.extract_strided_slice %272 {offsets = [0, 32], sizes = [2, 32], strides = [1, 1]} : vector<2x128xf32> to vector<2x32xf32>
    %275 = vector.extract_strided_slice %272 {offsets = [0, 96], sizes = [2, 32], strides = [1, 1]} : vector<2x128xf32> to vector<2x32xf32>
    %276 = vector.extract_strided_slice %267 {offsets = [0, 64], sizes = [2, 32], strides = [1, 1]} : vector<2x128xf32> to vector<2x32xf32>
    %277 = math.tanh %276 : vector<2x32xf32>
    %278 = arith.mulf %274, %259 : vector<2x32xf32>
    %279 = arith.mulf %273, %277 : vector<2x32xf32>
    %280 = arith.addf %278, %279 : vector<2x32xf32>
    %281 = math.tanh %280 : vector<2x32xf32>
    %282 = arith.mulf %275, %281 : vector<2x32xf32>
    %283 = vector.extract_strided_slice %156 {offsets = [12, 0], sizes = [2, 32], strides = [1, 1]} : vector<16x32xf32> to vector<2x32xf32>
    %cst_95 = arith.constant dense<0.000000e+00> : vector<2x128xf32>
    %284 = tpu.matmul %283, %15, %cst_95 {dimension_numbers = #tpu.dot_dimension_numbers<[1], [0], [0], [1], [0, 0, 1, 1], [], []>} : vector<2x32xf32>, vector<32x128xf32>, vector<2x128xf32> -> vector<2x128xf32>
    %cst_96 = arith.constant dense<0.000000e+00> : vector<2x128xf32>
    %285 = tpu.matmul %282, %16, %cst_96 {dimension_numbers = #tpu.dot_dimension_numbers<[1], [0], [0], [1], [0, 0, 1, 1], [], []>} : vector<2x32xf32>, vector<32x128xf32>, vector<2x128xf32> -> vector<2x128xf32>
    %286 = arith.addf %284, %285 : vector<2x128xf32>
    %287 = vector.broadcast %17 : vector<1x128xf32> to vector<2x128xf32>
    %288 = arith.addf %286, %287 : vector<2x128xf32>
    %289 = arith.negf %288 : vector<2x128xf32>
    %290 = math.exp %289 : vector<2x128xf32>
    %cst_97 = arith.constant 1.000000e+00 : f32
    %291 = vector.broadcast %cst_97 : f32 to vector<2x128xf32>
    %292 = arith.addf %291, %290 : vector<2x128xf32>
    %293 = arith.divf %291, %292 : vector<2x128xf32>
    %294 = vector.extract_strided_slice %293 {offsets = [0, 0], sizes = [2, 32], strides = [1, 1]} : vector<2x128xf32> to vector<2x32xf32>
    %295 = vector.extract_strided_slice %293 {offsets = [0, 32], sizes = [2, 32], strides = [1, 1]} : vector<2x128xf32> to vector<2x32xf32>
    %296 = vector.extract_strided_slice %293 {offsets = [0, 96], sizes = [2, 32], strides = [1, 1]} : vector<2x128xf32> to vector<2x32xf32>
    %297 = vector.extract_strided_slice %288 {offsets = [0, 64], sizes = [2, 32], strides = [1, 1]} : vector<2x128xf32> to vector<2x32xf32>
    %298 = math.tanh %297 : vector<2x32xf32>
    %299 = arith.mulf %295, %280 : vector<2x32xf32>
    %300 = arith.mulf %294, %298 : vector<2x32xf32>
    %301 = arith.addf %299, %300 : vector<2x32xf32>
    %302 = math.tanh %301 : vector<2x32xf32>
    %303 = arith.mulf %296, %302 : vector<2x32xf32>
    %304 = vector.extract_strided_slice %156 {offsets = [14, 0], sizes = [2, 32], strides = [1, 1]} : vector<16x32xf32> to vector<2x32xf32>
    %cst_98 = arith.constant dense<0.000000e+00> : vector<2x128xf32>
    %305 = tpu.matmul %304, %15, %cst_98 {dimension_numbers = #tpu.dot_dimension_numbers<[1], [0], [0], [1], [0, 0, 1, 1], [], []>} : vector<2x32xf32>, vector<32x128xf32>, vector<2x128xf32> -> vector<2x128xf32>
    %cst_99 = arith.constant dense<0.000000e+00> : vector<2x128xf32>
    %306 = tpu.matmul %303, %16, %cst_99 {dimension_numbers = #tpu.dot_dimension_numbers<[1], [0], [0], [1], [0, 0, 1, 1], [], []>} : vector<2x32xf32>, vector<32x128xf32>, vector<2x128xf32> -> vector<2x128xf32>
    %307 = arith.addf %305, %306 : vector<2x128xf32>
    %308 = vector.broadcast %17 : vector<1x128xf32> to vector<2x128xf32>
    %309 = arith.addf %307, %308 : vector<2x128xf32>
    %310 = arith.negf %309 : vector<2x128xf32>
    %311 = math.exp %310 : vector<2x128xf32>
    %cst_100 = arith.constant 1.000000e+00 : f32
    %312 = vector.broadcast %cst_100 : f32 to vector<2x128xf32>
    %313 = arith.addf %312, %311 : vector<2x128xf32>
    %314 = arith.divf %312, %313 : vector<2x128xf32>
    %315 = vector.extract_strided_slice %314 {offsets = [0, 0], sizes = [2, 32], strides = [1, 1]} : vector<2x128xf32> to vector<2x32xf32>
    %316 = vector.extract_strided_slice %314 {offsets = [0, 32], sizes = [2, 32], strides = [1, 1]} : vector<2x128xf32> to vector<2x32xf32>
    %317 = vector.extract_strided_slice %314 {offsets = [0, 96], sizes = [2, 32], strides = [1, 1]} : vector<2x128xf32> to vector<2x32xf32>
    %318 = vector.extract_strided_slice %309 {offsets = [0, 64], sizes = [2, 32], strides = [1, 1]} : vector<2x128xf32> to vector<2x32xf32>
    %319 = math.tanh %318 : vector<2x32xf32>
    %320 = arith.mulf %316, %301 : vector<2x32xf32>
    %321 = arith.mulf %315, %319 : vector<2x32xf32>
    %322 = arith.addf %320, %321 : vector<2x32xf32>
    %323 = math.tanh %322 : vector<2x32xf32>
    %324 = arith.mulf %317, %323 : vector<2x32xf32>
    %325 = tpu.iota {dimensions = array<i32: 1>} : vector<2x128xi32>
    %326 = tpu.iota {dimensions = array<i32: 1>} : vector<2x5xi32>
    %c0_i32_101 = arith.constant 0 : i32
    %327 = vector.broadcast %c0_i32_101 : i32 to vector<2x5xi32>
    %c0_102 = arith.constant 0 : index
    %c0_103 = arith.constant 0 : index
    %328 = vector.load %arg11[%c0_102, %c0_103] : memref<2x32xf32, #tpu.memory_space<vmem>>, vector<2x32xf32>
    %cst_104 = arith.constant dense<0.000000e+00> : vector<2x128xf32>
    %329 = tpu.matmul %328, %18, %cst_104 {dimension_numbers = #tpu.dot_dimension_numbers<[1], [0], [0], [1], [0, 0, 1, 1], [], []>} : vector<2x32xf32>, vector<32x128xf32>, vector<2x128xf32> -> vector<2x128xf32>
    %cst_105 = arith.constant dense<0.000000e+00> : vector<2x128xf32>
    %330 = tpu.matmul %324, %19, %cst_105 {dimension_numbers = #tpu.dot_dimension_numbers<[1], [0], [0], [1], [0, 0, 1, 1], [], []>} : vector<2x32xf32>, vector<32x128xf32>, vector<2x128xf32> -> vector<2x128xf32>
    %331 = arith.addf %329, %330 : vector<2x128xf32>
    %332 = vector.broadcast %20 : vector<1x128xf32> to vector<2x128xf32>
    %333 = arith.addf %331, %332 : vector<2x128xf32>
    %334 = arith.negf %333 : vector<2x128xf32>
    %335 = math.exp %334 : vector<2x128xf32>
    %cst_106 = arith.constant 1.000000e+00 : f32
    %336 = vector.broadcast %cst_106 : f32 to vector<2x128xf32>
    %337 = arith.addf %336, %335 : vector<2x128xf32>
    %338 = arith.divf %336, %337 : vector<2x128xf32>
    %339 = vector.extract_strided_slice %338 {offsets = [0, 0], sizes = [2, 32], strides = [1, 1]} : vector<2x128xf32> to vector<2x32xf32>
    %340 = vector.extract_strided_slice %338 {offsets = [0, 32], sizes = [2, 32], strides = [1, 1]} : vector<2x128xf32> to vector<2x32xf32>
    %341 = vector.extract_strided_slice %338 {offsets = [0, 96], sizes = [2, 32], strides = [1, 1]} : vector<2x128xf32> to vector<2x32xf32>
    %342 = vector.extract_strided_slice %333 {offsets = [0, 64], sizes = [2, 32], strides = [1, 1]} : vector<2x128xf32> to vector<2x32xf32>
    %343 = math.tanh %342 : vector<2x32xf32>
    %344 = arith.mulf %340, %322 : vector<2x32xf32>
    %345 = arith.mulf %339, %343 : vector<2x32xf32>
    %346 = arith.addf %344, %345 : vector<2x32xf32>
    %347 = math.tanh %346 : vector<2x32xf32>
    %348 = arith.mulf %341, %347 : vector<2x32xf32>
    %cst_107 = arith.constant dense<0.000000e+00> : vector<2x128xf32>
    %349 = tpu.matmul %348, %23, %cst_107 {dimension_numbers = #tpu.dot_dimension_numbers<[1], [0], [0], [1], [0, 0, 1, 1], [], []>} : vector<2x32xf32>, vector<32x128xf32>, vector<2x128xf32> -> vector<2x128xf32>
    %350 = vector.broadcast %24 : vector<1x128xf32> to vector<2x128xf32>
    %351 = arith.addf %349, %350 : vector<2x128xf32>
    %cst_108 = arith.constant dense<0xFF800000> : vector<2xf32>
    %352 = vector.multi_reduction <maximumf>, %351, %cst_108 [1] : vector<2x128xf32> to vector<2xf32>
    %353 = vector.shape_cast %352 : vector<2xf32> to vector<2x1xf32>
    %354 = vector.broadcast %353 : vector<2x1xf32> to vector<2x128xf32>
    %355 = arith.subf %351, %354 : vector<2x128xf32>
    %356 = math.exp %355 : vector<2x128xf32>
    %357 = vector.broadcast %353 : vector<2x1xf32> to vector<2x128xf32>
    %358 = arith.subf %351, %357 : vector<2x128xf32>
    %cst_109 = arith.constant dense<0.000000e+00> : vector<2xf32>
    %359 = vector.multi_reduction <add>, %356, %cst_109 [1] : vector<2x128xf32> to vector<2xf32>
    %360 = vector.shape_cast %359 : vector<2xf32> to vector<2x1xf32>
    %361 = math.log %360 : vector<2x1xf32>
    %362 = vector.broadcast %361 : vector<2x1xf32> to vector<2x128xf32>
    %363 = arith.subf %358, %362 : vector<2x128xf32>
    %364 = vector.broadcast %353 : vector<2x1xf32> to vector<2x128xf32>
    %365 = arith.cmpf oeq, %351, %364 : vector<2x128xf32>
    %c128_i32 = arith.constant 128 : i32
    %366 = vector.broadcast %c128_i32 : i32 to vector<2x128xi32>
    %367 = arith.select %365, %325, %366 : vector<2x128xi1>, vector<2x128xi32>
    %cst_110 = arith.constant dense<2147483647> : vector<2xi32>
    %368 = vector.multi_reduction <minsi>, %367, %cst_110 [1] : vector<2x128xi32> to vector<2xi32>
    %369 = vector.shape_cast %368 : vector<2xi32> to vector<2x1xi32>
    %c0_i32_111 = arith.constant 0 : i32
    %370 = vector.broadcast %c0_i32_111 : i32 to vector<2x5xi32>
    %371 = arith.cmpi eq, %326, %370 : vector<2x5xi32>
    %372 = vector.shape_cast %369 : vector<2x1xi32> to vector<2x1xi32>
    %373 = vector.broadcast %372 : vector<2x1xi32> to vector<2x5xi32>
    %374 = arith.select %371, %373, %327 : vector<2x5xi1>, vector<2x5xi32>
    %375 = vector.broadcast %369 : vector<2x1xi32> to vector<2x128xi32>
    %376 = arith.cmpi eq, %325, %375 : vector<2x128xi32>
    %377 = arith.extui %376 : vector<2x128xi1> to vector<2x128xi32>
    %378 = arith.sitofp %377 : vector<2x128xi32> to vector<2x128xf32>
    %cst_112 = arith.constant dense<0.000000e+00> : vector<2x32xf32>
    %379 = tpu.matmul %378, %22, %cst_112 {dimension_numbers = #tpu.dot_dimension_numbers<[1], [0], [0], [1], [0, 0, 1, 1], [], []>} : vector<2x128xf32>, vector<128x32xf32>, vector<2x32xf32> -> vector<2x32xf32>
    %cst_113 = arith.constant dense<0.000000e+00> : vector<2x128xf32>
    %380 = tpu.matmul %379, %18, %cst_113 {dimension_numbers = #tpu.dot_dimension_numbers<[1], [0], [0], [1], [0, 0, 1, 1], [], []>} : vector<2x32xf32>, vector<32x128xf32>, vector<2x128xf32> -> vector<2x128xf32>
    %cst_114 = arith.constant dense<0.000000e+00> : vector<2x128xf32>
    %381 = tpu.matmul %348, %19, %cst_114 {dimension_numbers = #tpu.dot_dimension_numbers<[1], [0], [0], [1], [0, 0, 1, 1], [], []>} : vector<2x32xf32>, vector<32x128xf32>, vector<2x128xf32> -> vector<2x128xf32>
    %382 = arith.addf %380, %381 : vector<2x128xf32>
    %383 = vector.broadcast %20 : vector<1x128xf32> to vector<2x128xf32>
    %384 = arith.addf %382, %383 : vector<2x128xf32>
    %385 = arith.negf %384 : vector<2x128xf32>
    %386 = math.exp %385 : vector<2x128xf32>
    %cst_115 = arith.constant 1.000000e+00 : f32
    %387 = vector.broadcast %cst_115 : f32 to vector<2x128xf32>
    %388 = arith.addf %387, %386 : vector<2x128xf32>
    %389 = arith.divf %387, %388 : vector<2x128xf32>
    %390 = vector.extract_strided_slice %389 {offsets = [0, 0], sizes = [2, 32], strides = [1, 1]} : vector<2x128xf32> to vector<2x32xf32>
    %391 = vector.extract_strided_slice %389 {offsets = [0, 32], sizes = [2, 32], strides = [1, 1]} : vector<2x128xf32> to vector<2x32xf32>
    %392 = vector.extract_strided_slice %389 {offsets = [0, 96], sizes = [2, 32], strides = [1, 1]} : vector<2x128xf32> to vector<2x32xf32>
    %393 = vector.extract_strided_slice %384 {offsets = [0, 64], sizes = [2, 32], strides = [1, 1]} : vector<2x128xf32> to vector<2x32xf32>
    %394 = math.tanh %393 : vector<2x32xf32>
    %395 = arith.mulf %391, %346 : vector<2x32xf32>
    %396 = arith.mulf %390, %394 : vector<2x32xf32>
    %397 = arith.addf %395, %396 : vector<2x32xf32>
    %398 = math.tanh %397 : vector<2x32xf32>
    %399 = arith.mulf %392, %398 : vector<2x32xf32>
    %cst_116 = arith.constant dense<0.000000e+00> : vector<2x128xf32>
    %400 = tpu.matmul %399, %23, %cst_116 {dimension_numbers = #tpu.dot_dimension_numbers<[1], [0], [0], [1], [0, 0, 1, 1], [], []>} : vector<2x32xf32>, vector<32x128xf32>, vector<2x128xf32> -> vector<2x128xf32>
    %401 = vector.broadcast %24 : vector<1x128xf32> to vector<2x128xf32>
    %402 = arith.addf %400, %401 : vector<2x128xf32>
    %cst_117 = arith.constant dense<0xFF800000> : vector<2xf32>
    %403 = vector.multi_reduction <maximumf>, %402, %cst_117 [1] : vector<2x128xf32> to vector<2xf32>
    %404 = vector.shape_cast %403 : vector<2xf32> to vector<2x1xf32>
    %405 = vector.broadcast %404 : vector<2x1xf32> to vector<2x128xf32>
    %406 = arith.subf %402, %405 : vector<2x128xf32>
    %407 = math.exp %406 : vector<2x128xf32>
    %408 = vector.broadcast %404 : vector<2x1xf32> to vector<2x128xf32>
    %409 = arith.subf %402, %408 : vector<2x128xf32>
    %cst_118 = arith.constant dense<0.000000e+00> : vector<2xf32>
    %410 = vector.multi_reduction <add>, %407, %cst_118 [1] : vector<2x128xf32> to vector<2xf32>
    %411 = vector.shape_cast %410 : vector<2xf32> to vector<2x1xf32>
    %412 = math.log %411 : vector<2x1xf32>
    %413 = vector.broadcast %412 : vector<2x1xf32> to vector<2x128xf32>
    %414 = arith.subf %409, %413 : vector<2x128xf32>
    %415 = vector.broadcast %404 : vector<2x1xf32> to vector<2x128xf32>
    %416 = arith.cmpf oeq, %402, %415 : vector<2x128xf32>
    %c128_i32_119 = arith.constant 128 : i32
    %417 = vector.broadcast %c128_i32_119 : i32 to vector<2x128xi32>
    %418 = arith.select %416, %325, %417 : vector<2x128xi1>, vector<2x128xi32>
    %cst_120 = arith.constant dense<2147483647> : vector<2xi32>
    %419 = vector.multi_reduction <minsi>, %418, %cst_120 [1] : vector<2x128xi32> to vector<2xi32>
    %420 = vector.shape_cast %419 : vector<2xi32> to vector<2x1xi32>
    %c1_i32_121 = arith.constant 1 : i32
    %421 = vector.broadcast %c1_i32_121 : i32 to vector<2x5xi32>
    %422 = arith.cmpi eq, %326, %421 : vector<2x5xi32>
    %423 = vector.shape_cast %420 : vector<2x1xi32> to vector<2x1xi32>
    %424 = vector.broadcast %423 : vector<2x1xi32> to vector<2x5xi32>
    %425 = arith.select %422, %424, %374 : vector<2x5xi1>, vector<2x5xi32>
    %426 = vector.broadcast %420 : vector<2x1xi32> to vector<2x128xi32>
    %427 = arith.cmpi eq, %325, %426 : vector<2x128xi32>
    %428 = arith.extui %427 : vector<2x128xi1> to vector<2x128xi32>
    %429 = arith.sitofp %428 : vector<2x128xi32> to vector<2x128xf32>
    %cst_122 = arith.constant dense<0.000000e+00> : vector<2x32xf32>
    %430 = tpu.matmul %429, %22, %cst_122 {dimension_numbers = #tpu.dot_dimension_numbers<[1], [0], [0], [1], [0, 0, 1, 1], [], []>} : vector<2x128xf32>, vector<128x32xf32>, vector<2x32xf32> -> vector<2x32xf32>
    %cst_123 = arith.constant dense<0.000000e+00> : vector<2x128xf32>
    %431 = tpu.matmul %430, %18, %cst_123 {dimension_numbers = #tpu.dot_dimension_numbers<[1], [0], [0], [1], [0, 0, 1, 1], [], []>} : vector<2x32xf32>, vector<32x128xf32>, vector<2x128xf32> -> vector<2x128xf32>
    %cst_124 = arith.constant dense<0.000000e+00> : vector<2x128xf32>
    %432 = tpu.matmul %399, %19, %cst_124 {dimension_numbers = #tpu.dot_dimension_numbers<[1], [0], [0], [1], [0, 0, 1, 1], [], []>} : vector<2x32xf32>, vector<32x128xf32>, vector<2x128xf32> -> vector<2x128xf32>
    %433 = arith.addf %431, %432 : vector<2x128xf32>
    %434 = vector.broadcast %20 : vector<1x128xf32> to vector<2x128xf32>
    %435 = arith.addf %433, %434 : vector<2x128xf32>
    %436 = arith.negf %435 : vector<2x128xf32>
    %437 = math.exp %436 : vector<2x128xf32>
    %cst_125 = arith.constant 1.000000e+00 : f32
    %438 = vector.broadcast %cst_125 : f32 to vector<2x128xf32>
    %439 = arith.addf %438, %437 : vector<2x128xf32>
    %440 = arith.divf %438, %439 : vector<2x128xf32>
    %441 = vector.extract_strided_slice %440 {offsets = [0, 0], sizes = [2, 32], strides = [1, 1]} : vector<2x128xf32> to vector<2x32xf32>
    %442 = vector.extract_strided_slice %440 {offsets = [0, 32], sizes = [2, 32], strides = [1, 1]} : vector<2x128xf32> to vector<2x32xf32>
    %443 = vector.extract_strided_slice %440 {offsets = [0, 96], sizes = [2, 32], strides = [1, 1]} : vector<2x128xf32> to vector<2x32xf32>
    %444 = vector.extract_strided_slice %435 {offsets = [0, 64], sizes = [2, 32], strides = [1, 1]} : vector<2x128xf32> to vector<2x32xf32>
    %445 = math.tanh %444 : vector<2x32xf32>
    %446 = arith.mulf %442, %397 : vector<2x32xf32>
    %447 = arith.mulf %441, %445 : vector<2x32xf32>
    %448 = arith.addf %446, %447 : vector<2x32xf32>
    %449 = math.tanh %448 : vector<2x32xf32>
    %450 = arith.mulf %443, %449 : vector<2x32xf32>
    %cst_126 = arith.constant dense<0.000000e+00> : vector<2x128xf32>
    %451 = tpu.matmul %450, %23, %cst_126 {dimension_numbers = #tpu.dot_dimension_numbers<[1], [0], [0], [1], [0, 0, 1, 1], [], []>} : vector<2x32xf32>, vector<32x128xf32>, vector<2x128xf32> -> vector<2x128xf32>
    %452 = vector.broadcast %24 : vector<1x128xf32> to vector<2x128xf32>
    %453 = arith.addf %451, %452 : vector<2x128xf32>
    %cst_127 = arith.constant dense<0xFF800000> : vector<2xf32>
    %454 = vector.multi_reduction <maximumf>, %453, %cst_127 [1] : vector<2x128xf32> to vector<2xf32>
    %455 = vector.shape_cast %454 : vector<2xf32> to vector<2x1xf32>
    %456 = vector.broadcast %455 : vector<2x1xf32> to vector<2x128xf32>
    %457 = arith.subf %453, %456 : vector<2x128xf32>
    %458 = math.exp %457 : vector<2x128xf32>
    %459 = vector.broadcast %455 : vector<2x1xf32> to vector<2x128xf32>
    %460 = arith.subf %453, %459 : vector<2x128xf32>
    %cst_128 = arith.constant dense<0.000000e+00> : vector<2xf32>
    %461 = vector.multi_reduction <add>, %458, %cst_128 [1] : vector<2x128xf32> to vector<2xf32>
    %462 = vector.shape_cast %461 : vector<2xf32> to vector<2x1xf32>
    %463 = math.log %462 : vector<2x1xf32>
    %464 = vector.broadcast %463 : vector<2x1xf32> to vector<2x128xf32>
    %465 = arith.subf %460, %464 : vector<2x128xf32>
    %466 = vector.broadcast %455 : vector<2x1xf32> to vector<2x128xf32>
    %467 = arith.cmpf oeq, %453, %466 : vector<2x128xf32>
    %c128_i32_129 = arith.constant 128 : i32
    %468 = vector.broadcast %c128_i32_129 : i32 to vector<2x128xi32>
    %469 = arith.select %467, %325, %468 : vector<2x128xi1>, vector<2x128xi32>
    %cst_130 = arith.constant dense<2147483647> : vector<2xi32>
    %470 = vector.multi_reduction <minsi>, %469, %cst_130 [1] : vector<2x128xi32> to vector<2xi32>
    %471 = vector.shape_cast %470 : vector<2xi32> to vector<2x1xi32>
    %c2_i32_131 = arith.constant 2 : i32
    %472 = vector.broadcast %c2_i32_131 : i32 to vector<2x5xi32>
    %473 = arith.cmpi eq, %326, %472 : vector<2x5xi32>
    %474 = vector.shape_cast %471 : vector<2x1xi32> to vector<2x1xi32>
    %475 = vector.broadcast %474 : vector<2x1xi32> to vector<2x5xi32>
    %476 = arith.select %473, %475, %425 : vector<2x5xi1>, vector<2x5xi32>
    %477 = vector.broadcast %471 : vector<2x1xi32> to vector<2x128xi32>
    %478 = arith.cmpi eq, %325, %477 : vector<2x128xi32>
    %479 = arith.extui %478 : vector<2x128xi1> to vector<2x128xi32>
    %480 = arith.sitofp %479 : vector<2x128xi32> to vector<2x128xf32>
    %cst_132 = arith.constant dense<0.000000e+00> : vector<2x32xf32>
    %481 = tpu.matmul %480, %22, %cst_132 {dimension_numbers = #tpu.dot_dimension_numbers<[1], [0], [0], [1], [0, 0, 1, 1], [], []>} : vector<2x128xf32>, vector<128x32xf32>, vector<2x32xf32> -> vector<2x32xf32>
    %cst_133 = arith.constant dense<0.000000e+00> : vector<2x128xf32>
    %482 = tpu.matmul %481, %18, %cst_133 {dimension_numbers = #tpu.dot_dimension_numbers<[1], [0], [0], [1], [0, 0, 1, 1], [], []>} : vector<2x32xf32>, vector<32x128xf32>, vector<2x128xf32> -> vector<2x128xf32>
    %cst_134 = arith.constant dense<0.000000e+00> : vector<2x128xf32>
    %483 = tpu.matmul %450, %19, %cst_134 {dimension_numbers = #tpu.dot_dimension_numbers<[1], [0], [0], [1], [0, 0, 1, 1], [], []>} : vector<2x32xf32>, vector<32x128xf32>, vector<2x128xf32> -> vector<2x128xf32>
    %484 = arith.addf %482, %483 : vector<2x128xf32>
    %485 = vector.broadcast %20 : vector<1x128xf32> to vector<2x128xf32>
    %486 = arith.addf %484, %485 : vector<2x128xf32>
    %487 = arith.negf %486 : vector<2x128xf32>
    %488 = math.exp %487 : vector<2x128xf32>
    %cst_135 = arith.constant 1.000000e+00 : f32
    %489 = vector.broadcast %cst_135 : f32 to vector<2x128xf32>
    %490 = arith.addf %489, %488 : vector<2x128xf32>
    %491 = arith.divf %489, %490 : vector<2x128xf32>
    %492 = vector.extract_strided_slice %491 {offsets = [0, 0], sizes = [2, 32], strides = [1, 1]} : vector<2x128xf32> to vector<2x32xf32>
    %493 = vector.extract_strided_slice %491 {offsets = [0, 32], sizes = [2, 32], strides = [1, 1]} : vector<2x128xf32> to vector<2x32xf32>
    %494 = vector.extract_strided_slice %491 {offsets = [0, 96], sizes = [2, 32], strides = [1, 1]} : vector<2x128xf32> to vector<2x32xf32>
    %495 = vector.extract_strided_slice %486 {offsets = [0, 64], sizes = [2, 32], strides = [1, 1]} : vector<2x128xf32> to vector<2x32xf32>
    %496 = math.tanh %495 : vector<2x32xf32>
    %497 = arith.mulf %493, %448 : vector<2x32xf32>
    %498 = arith.mulf %492, %496 : vector<2x32xf32>
    %499 = arith.addf %497, %498 : vector<2x32xf32>
    %500 = math.tanh %499 : vector<2x32xf32>
    %501 = arith.mulf %494, %500 : vector<2x32xf32>
    %cst_136 = arith.constant dense<0.000000e+00> : vector<2x128xf32>
    %502 = tpu.matmul %501, %23, %cst_136 {dimension_numbers = #tpu.dot_dimension_numbers<[1], [0], [0], [1], [0, 0, 1, 1], [], []>} : vector<2x32xf32>, vector<32x128xf32>, vector<2x128xf32> -> vector<2x128xf32>
    %503 = vector.broadcast %24 : vector<1x128xf32> to vector<2x128xf32>
    %504 = arith.addf %502, %503 : vector<2x128xf32>
    %cst_137 = arith.constant dense<0xFF800000> : vector<2xf32>
    %505 = vector.multi_reduction <maximumf>, %504, %cst_137 [1] : vector<2x128xf32> to vector<2xf32>
    %506 = vector.shape_cast %505 : vector<2xf32> to vector<2x1xf32>
    %507 = vector.broadcast %506 : vector<2x1xf32> to vector<2x128xf32>
    %508 = arith.subf %504, %507 : vector<2x128xf32>
    %509 = math.exp %508 : vector<2x128xf32>
    %510 = vector.broadcast %506 : vector<2x1xf32> to vector<2x128xf32>
    %511 = arith.subf %504, %510 : vector<2x128xf32>
    %cst_138 = arith.constant dense<0.000000e+00> : vector<2xf32>
    %512 = vector.multi_reduction <add>, %509, %cst_138 [1] : vector<2x128xf32> to vector<2xf32>
    %513 = vector.shape_cast %512 : vector<2xf32> to vector<2x1xf32>
    %514 = math.log %513 : vector<2x1xf32>
    %515 = vector.broadcast %514 : vector<2x1xf32> to vector<2x128xf32>
    %516 = arith.subf %511, %515 : vector<2x128xf32>
    %517 = vector.broadcast %506 : vector<2x1xf32> to vector<2x128xf32>
    %518 = arith.cmpf oeq, %504, %517 : vector<2x128xf32>
    %c128_i32_139 = arith.constant 128 : i32
    %519 = vector.broadcast %c128_i32_139 : i32 to vector<2x128xi32>
    %520 = arith.select %518, %325, %519 : vector<2x128xi1>, vector<2x128xi32>
    %cst_140 = arith.constant dense<2147483647> : vector<2xi32>
    %521 = vector.multi_reduction <minsi>, %520, %cst_140 [1] : vector<2x128xi32> to vector<2xi32>
    %522 = vector.shape_cast %521 : vector<2xi32> to vector<2x1xi32>
    %c3_i32_141 = arith.constant 3 : i32
    %523 = vector.broadcast %c3_i32_141 : i32 to vector<2x5xi32>
    %524 = arith.cmpi eq, %326, %523 : vector<2x5xi32>
    %525 = vector.shape_cast %522 : vector<2x1xi32> to vector<2x1xi32>
    %526 = vector.broadcast %525 : vector<2x1xi32> to vector<2x5xi32>
    %527 = arith.select %524, %526, %476 : vector<2x5xi1>, vector<2x5xi32>
    %528 = vector.broadcast %522 : vector<2x1xi32> to vector<2x128xi32>
    %529 = arith.cmpi eq, %325, %528 : vector<2x128xi32>
    %530 = arith.extui %529 : vector<2x128xi1> to vector<2x128xi32>
    %531 = arith.sitofp %530 : vector<2x128xi32> to vector<2x128xf32>
    %cst_142 = arith.constant dense<0.000000e+00> : vector<2x32xf32>
    %532 = tpu.matmul %531, %22, %cst_142 {dimension_numbers = #tpu.dot_dimension_numbers<[1], [0], [0], [1], [0, 0, 1, 1], [], []>} : vector<2x128xf32>, vector<128x32xf32>, vector<2x32xf32> -> vector<2x32xf32>
    %cst_143 = arith.constant dense<0.000000e+00> : vector<2x128xf32>
    %533 = tpu.matmul %532, %18, %cst_143 {dimension_numbers = #tpu.dot_dimension_numbers<[1], [0], [0], [1], [0, 0, 1, 1], [], []>} : vector<2x32xf32>, vector<32x128xf32>, vector<2x128xf32> -> vector<2x128xf32>
    %cst_144 = arith.constant dense<0.000000e+00> : vector<2x128xf32>
    %534 = tpu.matmul %501, %19, %cst_144 {dimension_numbers = #tpu.dot_dimension_numbers<[1], [0], [0], [1], [0, 0, 1, 1], [], []>} : vector<2x32xf32>, vector<32x128xf32>, vector<2x128xf32> -> vector<2x128xf32>
    %535 = arith.addf %533, %534 : vector<2x128xf32>
    %536 = vector.broadcast %20 : vector<1x128xf32> to vector<2x128xf32>
    %537 = arith.addf %535, %536 : vector<2x128xf32>
    %538 = arith.negf %537 : vector<2x128xf32>
    %539 = math.exp %538 : vector<2x128xf32>
    %cst_145 = arith.constant 1.000000e+00 : f32
    %540 = vector.broadcast %cst_145 : f32 to vector<2x128xf32>
    %541 = arith.addf %540, %539 : vector<2x128xf32>
    %542 = arith.divf %540, %541 : vector<2x128xf32>
    %543 = vector.extract_strided_slice %542 {offsets = [0, 0], sizes = [2, 32], strides = [1, 1]} : vector<2x128xf32> to vector<2x32xf32>
    %544 = vector.extract_strided_slice %542 {offsets = [0, 32], sizes = [2, 32], strides = [1, 1]} : vector<2x128xf32> to vector<2x32xf32>
    %545 = vector.extract_strided_slice %542 {offsets = [0, 96], sizes = [2, 32], strides = [1, 1]} : vector<2x128xf32> to vector<2x32xf32>
    %546 = vector.extract_strided_slice %537 {offsets = [0, 64], sizes = [2, 32], strides = [1, 1]} : vector<2x128xf32> to vector<2x32xf32>
    %547 = math.tanh %546 : vector<2x32xf32>
    %548 = arith.mulf %544, %499 : vector<2x32xf32>
    %549 = arith.mulf %543, %547 : vector<2x32xf32>
    %550 = arith.addf %548, %549 : vector<2x32xf32>
    %551 = math.tanh %550 : vector<2x32xf32>
    %552 = arith.mulf %545, %551 : vector<2x32xf32>
    %cst_146 = arith.constant dense<0.000000e+00> : vector<2x128xf32>
    %553 = tpu.matmul %552, %23, %cst_146 {dimension_numbers = #tpu.dot_dimension_numbers<[1], [0], [0], [1], [0, 0, 1, 1], [], []>} : vector<2x32xf32>, vector<32x128xf32>, vector<2x128xf32> -> vector<2x128xf32>
    %554 = vector.broadcast %24 : vector<1x128xf32> to vector<2x128xf32>
    %555 = arith.addf %553, %554 : vector<2x128xf32>
    %cst_147 = arith.constant dense<0xFF800000> : vector<2xf32>
    %556 = vector.multi_reduction <maximumf>, %555, %cst_147 [1] : vector<2x128xf32> to vector<2xf32>
    %557 = vector.shape_cast %556 : vector<2xf32> to vector<2x1xf32>
    %558 = vector.broadcast %557 : vector<2x1xf32> to vector<2x128xf32>
    %559 = arith.subf %555, %558 : vector<2x128xf32>
    %560 = math.exp %559 : vector<2x128xf32>
    %561 = vector.broadcast %557 : vector<2x1xf32> to vector<2x128xf32>
    %562 = arith.subf %555, %561 : vector<2x128xf32>
    %cst_148 = arith.constant dense<0.000000e+00> : vector<2xf32>
    %563 = vector.multi_reduction <add>, %560, %cst_148 [1] : vector<2x128xf32> to vector<2xf32>
    %564 = vector.shape_cast %563 : vector<2xf32> to vector<2x1xf32>
    %565 = math.log %564 : vector<2x1xf32>
    %566 = vector.broadcast %565 : vector<2x1xf32> to vector<2x128xf32>
    %567 = arith.subf %562, %566 : vector<2x128xf32>
    %568 = vector.broadcast %557 : vector<2x1xf32> to vector<2x128xf32>
    %569 = arith.cmpf oeq, %555, %568 : vector<2x128xf32>
    %c128_i32_149 = arith.constant 128 : i32
    %570 = vector.broadcast %c128_i32_149 : i32 to vector<2x128xi32>
    %571 = arith.select %569, %325, %570 : vector<2x128xi1>, vector<2x128xi32>
    %cst_150 = arith.constant dense<2147483647> : vector<2xi32>
    %572 = vector.multi_reduction <minsi>, %571, %cst_150 [1] : vector<2x128xi32> to vector<2xi32>
    %573 = vector.shape_cast %572 : vector<2xi32> to vector<2x1xi32>
    %c4_i32_151 = arith.constant 4 : i32
    %574 = vector.broadcast %c4_i32_151 : i32 to vector<2x5xi32>
    %575 = arith.cmpi eq, %326, %574 : vector<2x5xi32>
    %576 = vector.shape_cast %573 : vector<2x1xi32> to vector<2x1xi32>
    %577 = vector.broadcast %576 : vector<2x1xi32> to vector<2x5xi32>
    %578 = arith.select %575, %577, %527 : vector<2x5xi1>, vector<2x5xi32>
    %579 = vector.shape_cast %363 : vector<2x128xf32> to vector<1x2x128xf32>
    %580 = vector.shape_cast %414 : vector<2x128xf32> to vector<1x2x128xf32>
    %581 = vector.shape_cast %465 : vector<2x128xf32> to vector<1x2x128xf32>
    %582 = vector.shape_cast %516 : vector<2x128xf32> to vector<1x2x128xf32>
    %583 = vector.shape_cast %567 : vector<2x128xf32> to vector<1x2x128xf32>
    %584 = tpu.concatenate %579, %580, %581, %582, %583 in 0 : vector<1x2x128xf32>, vector<1x2x128xf32>, vector<1x2x128xf32>, vector<1x2x128xf32>, vector<1x2x128xf32> -> vector<5x2x128xf32>
    %c0_152 = arith.constant 0 : index
    %c0_153 = arith.constant 0 : index
    %c0_154 = arith.constant 0 : index
    %585 = vector.load %arg18[%c0_152, %c0_153, %c0_154] : memref<5x2x128xf32, #tpu.memory_space<vmem>>, vector<5x2x128xf32>
    tpu.vector_store %arg18[%c0_152, %c0_153, %c0_154], %584 {strides = array<i32>} : memref<5x2x128xf32, #tpu.memory_space<vmem>>, vector<5x2x128xf32>,
    %c0_155 = arith.constant 0 : index
    %c0_156 = arith.constant 0 : index
    %586 = vector.load %arg19[%c0_155, %c0_156] : memref<2x5xi32, #tpu.memory_space<vmem>>, vector<2x5xi32>
    tpu.vector_store %arg19[%c0_155, %c0_156], %578 {strides = array<i32>} : memref<2x5xi32, #tpu.memory_space<vmem>>, vector<2x5xi32>,
    %c0_157 = arith.constant 0 : index
    %c0_158 = arith.constant 0 : index
    %587 = vector.load %arg20[%c0_157, %c0_158] : memref<2x32xf32, #tpu.memory_space<vmem>>, vector<2x32xf32>
    tpu.vector_store %arg20[%c0_157, %c0_158], %552 {strides = array<i32>} : memref<2x32xf32, #tpu.memory_space<vmem>>, vector<2x32xf32>,
    %c0_159 = arith.constant 0 : index
    %c0_160 = arith.constant 0 : index
    %588 = vector.load %arg21[%c0_159, %c0_160] : memref<2x32xf32, #tpu.memory_space<vmem>>, vector<2x32xf32>
    tpu.vector_store %arg21[%c0_159, %c0_160], %550 {strides = array<i32>} : memref<2x32xf32, #tpu.memory_space<vmem>>, vector<2x32xf32>,
    return
  }
}

</mosaic_0001>

<bundles_post_ra>
// kernel: vqa_forward.1
= control target key start
LH: loop header
LB: loop body
LE: loop exit
PB: predicated region body
PF: predicated region fallthrough
CT: control target
= control target key end

     0   :  { %s7625_s0 = inlined_call_operand.vmem [shape: s32[2,8], index: 0, kind: input, shape index: {}]   ;;  %s7626_s1 = inlined_call_operand.vmem [shape: f32[512,36], index: 1, kind: input, shape index: {}]   ;;  %s7627_s2 = inlined_call_operand.vmem [shape: f32[36,8], index: 2, kind: input, shape index: {}]   ;;  %s7628_s3 = inlined_call_operand.vmem [shape: f32[1,8], index: 3, kind: input, shape index: {}]   ;;  %s7629_s4 = inlined_call_operand.vmem [shape: f32[2,512], index: 4, kind: input, shape index: {}]   ;;  %s7630_s5 = inlined_call_operand.vmem [shape: f32[8,32], index: 5, kind: input, shape index: {}]   ;;  %s7631_s6 = inlined_call_operand.vmem [shape: f32[1,32], index: 6, kind: input, shape index: {}]   ;;  %s7632_s7 = inlined_call_operand.vmem [shape: f32[128,32], index: 7, kind: input, shape index: {}]   ;;  %s7633_s8 = inlined_call_operand.vmem [shape: f32[32,128], index: 8, kind: input, shape index: {}]   ;;  %s7634_s9 = inlined_call_operand.vmem [shape: f32[32,128], index: 9, kind: input, shape index: {}]   ;;  %s7635_s10 = inlined_call_operand.vmem [shape: f32[1,128], index: 10, kind: input, shape index: {}]   ;;  %s7636_s11 = inlined_call_operand.vmem [shape: f32[2,32], index: 11, kind: input, shape index: {}]   ;;  %s7637_s12 = inlined_call_operand.vmem [shape: f32[32,128], index: 12, kind: input, shape index: {}]   ;;  %s7638_s13 = inlined_call_operand.vmem [shape: f32[32,128], index: 13, kind: input, shape index: {}]   ;;  %s7639_s14 = inlined_call_operand.vmem [shape: f32[1,128], index: 14, kind: input, shape index: {}]   ;;  %s7640_s15 = inlined_call_operand.vmem [shape: f32[32,128], index: 15, kind: input, shape index: {}]   ;;  %s7641_s16 = inlined_call_operand.vmem [shape: f32[1,128], index: 16, kind: input, shape index: {}]   ;;  %s7642_s17 = inlined_call_operand.vmem [shape: f32[128,32], index: 17, kind: input, shape index: {}]   ;;  %s7643_s18 = inlined_call_operand.hbm [shape: f32[5,2,128], index: 18, kind: output, shape index: {0}]   ;;  %s7644_s19 = inlined_call_operand.hbm [shape: s32[2,5], index: 19, kind: output, shape index: {1}]   ;;  %s7645_s20 = inlined_call_operand.hbm [shape: f32[2,32], index: 20, kind: output, shape index: {2}]   ;;  %s7646_s21 = inlined_call_operand.hbm [shape: f32[2,32], index: 21, kind: output, shape index: {3}]  }
   0x1   :  { %7649 = sst [smem:[#allocation15_spill]] %s7625_s0 }
   0x2   :  { %7650 = sst [smem:[#allocation16_spill]] %s7626_s1 }
   0x3   :  { %7651 = sst [smem:[#allocation17_spill]] %s7627_s2 }
   0x4   :  { %7652 = sst [smem:[#allocation18_spill]] %s7628_s3 }
   0x5   :  { %7653 = sst [smem:[#allocation19_spill]] %s7629_s4 }
   0x6   :  { %7654 = sst [smem:[#allocation20_spill]] %s7630_s5 }
   0x7   :  { %27 = vsyncpa [#allocation4], 0 }
   0x8   :  { %28 = vsyncpa [#allocation3], 0 }
   0x9   :  { %29 = vsyncpa [#allocation7], 0 }
   0xa   :  { %30 = vsyncpa [#allocation10], 0  ;;  %s7655_s26 = sld [smem:[#allocation15_spill]] }
  0x10   :  { %s37_s27 = sshll.u32 %s7655_s26, 4  ;;  %s38_s27 = int_to_ptr.vmem [resolvable:$true] %s37_s27 }
  0x11   :  { %s6143_s3 = scalar_lea.vmem %s38_s27, 32  ;;  %p6148_p1 = scmp.lt.s32.totalorder %s38_s27, %s38_s27 }
  0x12   :  { %p6144_p0 = scmp.ne.s32.totalorder %s38_s27, %s6143_s3  ;;  %p6149_p2 = scmp.lt.s32.totalorder %s6143_s3, %s6143_s3 }
  0x14   :  { %p6150_p3 = por %p6149_p2, %p6148_p1 }
  0x16   :  { %p6151_p4 = pnand %p6150_p3, %p6144_p0 }
  0x18   :  { %6154 = shalt.err (!%p6151_p4)
}
  0x19   :  { %s6251_s28 = smov [#allocation2]  }
  0x1a   :  { %40 = dma.vmem_to_smem %s38_s27, 32, %s6251_s28, [#allocation4]  }
  0x1b   :  { %6243 = dma.done.wait [#allocation4], 32  }
  0x1c   :  { %6244 = vsyncadd [#allocation4], 4294967264 }
  0x1d   :  { %78 = sfence }
  0x1e   :  { %s7656_s4 = sld [smem:[#allocation17_spill]]  ;;  %vm155_vm0 = vcmask 293888   ;;  %s7657_s26 = sld [smem:[#allocation16_spill]]  ;;  %vm348_vm1 = vcmask 1043456   ;;  %vm6254_vm2 = vmmov 0  }
  0x1f   :  { %s7658_s0 = sld [smem:[#allocation19_spill]]  ;;  %s7659_s5 = sld [smem:[#allocation18_spill]] }
  0x20   :  { %s7660_s25 = sld [smem:[#allocation20_spill]]  ;;  %s4540_s30 = sld [smem:[#allocation2 + $0x1]] }
  0x21   :  { %s4542_s22 = sld [smem:[#allocation2 + $0x2]]  ;;  %s4544_s23 = sld [smem:[#allocation2 + $0x3]] }
  0x22   :  { %s4545_s1 = sld [smem:[#allocation2 + $0x83]]  ;;  %s4546_s24 = sld [smem:[#allocation2 + $0x4]] }
  0x23   :  { %s6828_s2 = sld [smem:[#allocation2 + $0x84]]  ;;  %s6836_s29 = sld [smem:[#allocation2 + $0x5]] }
  0x24   :  { %v143_v0 = vld [vmem:[%s7656_s4] sm:$0xff]  ;;  %v144_v1 = vld [vmem:[%s7656_s4 + $0x8] sm:$0xff]  ;;  %v145_v2 = vld [vmem:[%s7656_s4 + $0x10] sm:$0xff]  ;;  %s6256_s27 = smov 64   ;;  %s6257_s3 = smov 32  }
  0x25   :  { %v5618_v3 = vpack.c.bf16 %v144_v1, %v143_v0  ;;  %v146_v4 = vld [vmem:[%s7656_s4 + $0x18] sm:$0xff]  ;;  %v79_v5 = vld [vmem:[%s7657_s26] sm:$0xff]  ;;  %v80_v8 = vld [vmem:[%s7657_s26 + $0x8] sm:$0xff] }
  0x26   :  { %v5622_v6 = vpack.c.bf16 %v146_v4, %v145_v2  ;;  %5001 = vmatprep.mubr.msk.f32.mxu0 %vm155_vm0, %v79_v5  ;;  %v147_v7 = vld [vmem:[%s7656_s4 + $0x20] sm:$0xf]  ;;  %v81_v9 = vld [vmem:[%s7657_s26 + $0x10] sm:$0xff]  ;;  %v82_v10 = vld [vmem:[%s7657_s26 + $0x18] sm:$0xff]  ;;  %s4543_s4 = sld [smem:[#allocation2 + $0x82]] }
  0x27   :  { %5619 = vmatprep.subr.bf16.mxu0 %v5618_v3  ;;  %v83_v11 = vld [vmem:[%s7657_s26 + $0x20] sm:$0xff]  ;;  %v84_v12 = vld [vmem:[%s7657_s26 + $0x28] sm:$0xff]  ;;  %v85_v13 = vld [vmem:[%s7657_s26 + $0x30] sm:$0xff] }
  0x28   :  { %5621 = vmatpush3.bf16.msra.mxu0 %v5618_v3  ;;  %v86_v14 = vld [vmem:[%s7657_s26 + $0x38] sm:$0xff]  ;;  %v87_v15 = vld [vmem:[%s7657_s26 + $0x40] sm:$0xff]  ;;  %v88_v16 = vld [vmem:[%s7657_s26 + $0x48] sm:$0xff] }
  0x29   :  { %5623 = vmatprep.subr.bf16.mxu0 %v5622_v6  ;;  %v89_v17 = vld [vmem:[%s7657_s26 + $0x50] sm:$0xff]  ;;  %v90_v18 = vld [vmem:[%s7657_s26 + $0x58] sm:$0xff]  ;;  %v91_v19 = vld [vmem:[%s7657_s26 + $0x60] sm:$0xff] }
  0x2a   :  { %v92_v20 = vld [vmem:[%s7657_s26 + $0x68] sm:$0xff]  ;;  %v93_v21 = vld [vmem:[%s7657_s26 + $0x70] sm:$0xff]  ;;  %v94_v22 = vld [vmem:[%s7657_s26 + $0x78] sm:$0xff] }
  0x2b   :  { %v95_v23 = vld [vmem:[%s7657_s26 + $0x80] sm:$0xff]  ;;  %v96_v24 = vld [vmem:[%s7657_s26 + $0x88] sm:$0xff]  ;;  %v97_v25 = vld [vmem:[%s7657_s26 + $0x90] sm:$0xff] }
  0x2c   :  { %5625 = vmatpush3.bf16.msra.mxu0 %v5622_v6  ;;  %v98_v26 = vld [vmem:[%s7657_s26 + $0x98] sm:$0xff]  ;;  %v99_v27 = vld [vmem:[%s7657_s26 + $0xa0] sm:$0xff]  ;;  %v100_v28 = vld [vmem:[%s7657_s26 + $0xa8] sm:$0xff] }
  0x2d   :  { %4999 = vmatprep.subr.msk.mxu0 %vm348_vm1, %v147_v7  ;;  %v101_v29 = vld [vmem:[%s7657_s26 + $0xb0] sm:$0xff]  ;;  %v102_v30 = vld [vmem:[%s7657_s26 + $0xb8] sm:$0xff]  ;;  %v103_v31 = vld [vmem:[%s7657_s26 + $0xc0] sm:$0xff] }
  0x2e   :  { %v104_v32 = vld [vmem:[%s7657_s26 + $0xc8] sm:$0xff]  ;;  %v105_v33 = vld [vmem:[%s7657_s26 + $0xd0] sm:$0xff]  ;;  %v106_v34 = vld [vmem:[%s7657_s26 + $0xd8] sm:$0xff] }
  0x2f   :  { %v107_v35 = vld [vmem:[%s7657_s26 + $0xe0] sm:$0xff]  ;;  %v108_v36 = vld [vmem:[%s7657_s26 + $0xe8] sm:$0xff]  ;;  %v109_v37 = vld [vmem:[%s7657_s26 + $0xf0] sm:$0xff] }
  0x30   :  { %5000 = vmatpush3.msk.msra.mxu0 %vm348_vm1, %v147_v7  ;;  %v110_v38 = vld [vmem:[%s7657_s26 + $0xf8] sm:$0xff]  ;;  %v111_v39 = vld [vmem:[%s7657_s26 + $0x100] sm:$0xff]  ;;  %v112_v40 = vld [vmem:[%s7657_s26 + $0x108] sm:$0xff]  ;;  %v6252_v7 = vmov 1983009808  }
  0x31   :  { %5002 = vmatmul.mubr.msk.f32.vlgmr.msra.gmra.mrb[0].mxu0 %vm155_vm0, %v80_v8  ;;  %v113_v41 = vld [vmem:[%s7657_s26 + $0x110] sm:$0xff]  ;;  %v114_v42 = vld [vmem:[%s7657_s26 + $0x118] sm:$0xff]  ;;  %v115_v43 = vld [vmem:[%s7657_s26 + $0x120] sm:$0xff]  ;;  %v805_v8 = vunpack.c.l.s4 %v6252_v7 }
  0x32   :  { %5004 = vmatprep.mubr.msk.f32.mxu0 %vm155_vm0, %v81_v9  ;;  %v116_v44 = vld [vmem:[%s7657_s26 + $0x128] sm:$0xff]  ;;  %v117_v45 = vld [vmem:[%s7657_s26 + $0x130] sm:$0xff]  ;;  %v118_v46 = vld [vmem:[%s7657_s26 + $0x138] sm:$0xff]  ;;  %v807_v9 = vlaneseq }
  0x33   :  { %v119_v47 = vld [vmem:[%s7657_s26 + $0x140] sm:$0xff]  ;;  %v120_v48 = vld [vmem:[%s7657_s26 + $0x148] sm:$0xff]  ;;  %v121_v49 = vld [vmem:[%s7657_s26 + $0x150] sm:$0xff] }
  0x34   :  { %v122_v50 = vld [vmem:[%s7657_s26 + $0x158] sm:$0xff]  ;;  %v123_v51 = vld [vmem:[%s7657_s26 + $0x160] sm:$0xff]  ;;  %v124_v52 = vld [vmem:[%s7657_s26 + $0x168] sm:$0xff] }
  0x35   :  { %5005 = vmatmul.mubr.msk.f32.gmra.mrb[2].mxu0 %vm155_vm0, %v82_v10  ;;  %v125_v53 = vld [vmem:[%s7657_s26 + $0x170] sm:$0xff]  ;;  %v126_v54 = vld [vmem:[%s7657_s26 + $0x178] sm:$0xff]  ;;  %v127_v55 = vld [vmem:[%s7657_s26 + $0x180] sm:$0xff]  ;;  %v806_v10 = vunpack.c.0.s8 %v805_v8 }
  0x36   :  { %5007 = vmatprep.mubr.msk.f32.mxu0 %vm155_vm0, %v83_v11  ;;  %v128_v56 = vld [vmem:[%s7657_s26 + $0x188] sm:$0xff]  ;;  %v129_v57 = vld [vmem:[%s7657_s26 + $0x190] sm:$0xff]  ;;  %v130_v58 = vld [vmem:[%s7657_s26 + $0x198] sm:$0xff]  ;;  %v6650_v11 = vshrl.u32 %v807_v9, 7 }
  0x37   :  { %v131_v59 = vld [vmem:[%s7657_s26 + $0x1a0] sm:$0xff]  ;;  %v132_v60 = vld [vmem:[%s7657_s26 + $0x1a8] sm:$0xff]  ;;  %v133_v61 = vld [vmem:[%s7657_s26 + $0x1b0] sm:$0xff] }
  0x38   :  { %v134_v62 = vld [vmem:[%s7657_s26 + $0x1b8] sm:$0xff]  ;;  %v135_v63 = vld [vmem:[%s7657_s26 + $0x1c0] sm:$0xff]  ;;  %v136_v0 = vld [vmem:[%s7657_s26 + $0x1c8] sm:$0xff]  ;;  %vm1107_vm3 = vcmp.eq.s32.totalorder %v6650_v11, 0  ;;  %vm1116_vm6 = vcmp.eq.s32.totalorder %v6650_v11, 1  ;;  %vm1125_vm9 = vcmp.eq.s32.totalorder %v6650_v11, 2 }
  0x39   :  { %5008 = vmatmul.mubr.msk.f32.gmra.mrb[4].mxu0 %vm155_vm0, %v84_v12  ;;  %v137_v1 = vld [vmem:[%s7657_s26 + $0x1d0] sm:$0xff]  ;;  %v138_v2 = vld [vmem:[%s7657_s26 + $0x1d8] sm:$0xff]  ;;  %v139_v3 = vld [vmem:[%s7657_s26 + $0x1e0] sm:$0xff]  ;;  %v809_v12 = vsub.s32 %v806_v10, %v6650_v11  ;;  %vm1134_vm12 = vcmp.eq.s32.totalorder %v6650_v11, 3  ;;  %vm1143_vm15 = vcmp.eq.s32.totalorder %v6650_v11, 4 }
  0x3a   :  { %5010 = vmatprep.mubr.msk.f32.mxu0 %vm155_vm0, %v85_v13  ;;  %v140_v4 = vld [vmem:[%s7657_s26 + $0x1e8] sm:$0xff]  ;;  %v141_v5 = vld [vmem:[%s7657_s26 + $0x1f0] sm:$0xff]  ;;  %v142_v6 = vld [vmem:[%s7657_s26 + $0x1f8] sm:$0xff]  ;;  %s4539_s26 = sld [smem:[#allocation2 + $0x80]] }
  0x3b   :  { %v801_v13 = vld [vmem:[%s7658_s0] sm:$0xff]  ;;  %s1106_s0 = sld [smem:[#allocation2]] }
  0x3d   :  { %5011 = vmatmul.mubr.msk.f32.gmra.mrb[6].mxu0 %vm155_vm0, %v86_v14  ;;  %v6656_v14 = vrot.slane %v801_v13, %v809_v12 }
  0x3e   :  { %5013 = vmatprep.mubr.msk.f32.mxu0 %vm155_vm0, %v87_v15 }
  0x3f   :  { %v818_v15 = vcombine.high %v6656_v14, %v6656_v14 }
  0x41   :  { %5014 = vmatmul.mubr.msk.f32.gmra.mrb[8].mxu0 %vm155_vm0, %v88_v16  ;;  %888 = vmatprep.mubr.f32.mxu1 %v818_v15  ;;  %v6663_v16 = vld [vmem:[%s7659_s5] ss:$0 sm:$0xff]  ;;  %s4541_s5 = sld [smem:[#allocation2 + $0x81]] }
  0x42   :  { %5016 = vmatprep.mubr.msk.f32.mxu0 %vm155_vm0, %v89_v17  ;;  %v803_v17 = vcombine.high %v801_v13, %v801_v13 }
  0x45   :  { %5017 = vmatmul.mubr.msk.f32.gmra.mrb[10].mxu0 %vm155_vm0, %v90_v18 }
  0x46   :  { %5019 = vmatprep.mubr.msk.f32.mxu0 %vm155_vm0, %v91_v19 }
  0x49   :  { %5020 = vmatmul.mubr.msk.f32.gmra.mrb[12].mxu0 %vm155_vm0, %v92_v20 }
  0x4a   :  { %5022 = vmatprep.mubr.msk.f32.mxu0 %vm155_vm0, %v93_v21 }
  0x4d   :  { %5023 = vmatmul.mubr.msk.f32.gmra.mrb[14].mxu0 %vm155_vm0, %v94_v22 }
  0x4e   :  { %5025 = vmatprep.mubr.msk.f32.mxu0 %vm155_vm0, %v95_v23  ;;  %v6667_v23 = vrot.slane %v803_v17, %v809_v12 }
  0x51   :  { %5026 = vmatmul.mubr.msk.f32.gmra.mrb[16].mxu0 %vm155_vm0, %v96_v24 }
  0x52   :  { %5028 = vmatprep.mubr.msk.f32.mxu0 %vm155_vm0, %v97_v25 }
  0x55   :  { %5029 = vmatmul.mubr.msk.f32.gmra.mrb[18].mxu0 %vm155_vm0, %v98_v26 }
  0x56   :  { %5031 = vmatprep.mubr.msk.f32.mxu0 %vm155_vm0, %v99_v27 }
  0x59   :  { %5032 = vmatmul.mubr.msk.f32.gmra.mrb[20].mxu0 %vm155_vm0, %v100_v28 }
  0x5a   :  { %5034 = vmatprep.mubr.msk.f32.mxu0 %vm155_vm0, %v101_v29 }
  0x5d   :  { %5035 = vmatmul.mubr.msk.f32.gmra.mrb[22].mxu0 %vm155_vm0, %v102_v30 }
  0x5e   :  { %5037 = vmatprep.mubr.msk.f32.mxu0 %vm155_vm0, %v103_v31 }
  0x61   :  { %5038 = vmatmul.mubr.msk.f32.gmra.mrb[24].mxu0 %vm155_vm0, %v104_v32 }
  0x62   :  { %5040 = vmatprep.mubr.msk.f32.mxu0 %vm155_vm0, %v105_v33 }
  0x65   :  { %5041 = vmatmul.mubr.msk.f32.gmra.mrb[26].mxu0 %vm155_vm0, %v106_v34 }
  0x66   :  { %5043 = vmatprep.mubr.msk.f32.mxu0 %vm155_vm0, %v107_v35 }
  0x69   :  { %5044 = vmatmul.mubr.msk.f32.gmra.mrb[28].mxu0 %vm155_vm0, %v108_v36 }
  0x6a   :  { %5046 = vmatprep.mubr.msk.f32.mxu0 %vm155_vm0, %v109_v37 }
  0x6d   :  { %5047 = vmatmul.mubr.msk.f32.gmra.mrb[30].mxu0 %vm155_vm0, %v110_v38 }
  0x6e   :  { %5049 = vmatprep.mubr.msk.f32.mxu0 %vm155_vm0, %v111_v39 }
  0x71   :  { %5050 = vmatmul.mubr.msk.f32.gmra.mrb[32].mxu0 %vm155_vm0, %v112_v40 }
  0x72   :  { %5052 = vmatprep.mubr.msk.f32.mxu0 %vm155_vm0, %v113_v41 }
  0x75   :  { %5053 = vmatmul.mubr.msk.f32.gmra.mrb[34].mxu0 %vm155_vm0, %v114_v42 }
  0x76   :  { %5055 = vmatprep.mubr.msk.f32.mxu0 %vm155_vm0, %v115_v43 }
  0x79   :  { %5056 = vmatmul.mubr.msk.f32.gmra.mrb[36].mxu0 %vm155_vm0, %v116_v44 }
  0x7a   :  { %5058 = vmatprep.mubr.msk.f32.mxu0 %vm155_vm0, %v117_v45 }
  0x7d   :  { %5059 = vmatmul.mubr.msk.f32.gmra.mrb[38].mxu0 %vm155_vm0, %v118_v46 }
  0x7e   :  { %5061 = vmatprep.mubr.msk.f32.mxu0 %vm155_vm0, %v119_v47 }
  0x81   :  { %5062 = vmatmul.mubr.msk.f32.gmra.mrb[40].mxu0 %vm155_vm0, %v120_v48 }
  0x82   :  { %5064 = vmatprep.mubr.msk.f32.mxu0 %vm155_vm0, %v121_v49 }
  0x85   :  { %5065 = vmatmul.mubr.msk.f32.gmra.mrb[42].mxu0 %vm155_vm0, %v122_v50 }
  0x86   :  { %5067 = vmatprep.mubr.msk.f32.mxu0 %vm155_vm0, %v123_v51 }
  0x89   :  { %5068 = vmatmul.mubr.msk.f32.gmra.mrb[44].mxu0 %vm155_vm0, %v124_v52 }
  0x8a   :  { %5070 = vmatprep.mubr.msk.f32.mxu0 %vm155_vm0, %v125_v53 }
  0x8d   :  { %5071 = vmatmul.mubr.msk.f32.gmra.mrb[46].mxu0 %vm155_vm0, %v126_v54 }
  0x8e   :  { %5073 = vmatprep.mubr.msk.f32.mxu0 %vm155_vm0, %v127_v55 }
  0x91   :  { %5074 = vmatmul.mubr.msk.f32.gmra.mrb[48].mxu0 %vm155_vm0, %v128_v56 }
  0x92   :  { %5076 = vmatprep.mubr.msk.f32.mxu0 %vm155_vm0, %v129_v57 }
  0x95   :  { %5077 = vmatmul.mubr.msk.f32.gmra.mrb[50].mxu0 %vm155_vm0, %v130_v58 }
  0x96   :  { %5079 = vmatprep.mubr.msk.f32.mxu0 %vm155_vm0, %v131_v59 }
  0x99   :  { %5080 = vmatmul.mubr.msk.f32.gmra.mrb[52].mxu0 %vm155_vm0, %v132_v60 }
  0x9a   :  { %5082 = vmatprep.mubr.msk.f32.mxu0 %vm155_vm0, %v133_v61 }
  0x9d   :  { %5083 = vmatmul.mubr.msk.f32.gmra.mrb[54].mxu0 %vm155_vm0, %v134_v62 }
  0x9e   :  { %5085 = vmatprep.mubr.msk.f32.mxu0 %vm155_vm0, %v135_v63 }
  0xa1   :  { %5086 = vmatmul.mubr.msk.f32.gmra.mrb[56].mxu0 %vm155_vm0, %v136_v0 }
  0xa2   :  { %5088 = vmatprep.mubr.msk.f32.mxu0 %vm155_vm0, %v137_v1 }
  0xa5   :  { %5089 = vmatmul.mubr.msk.f32.gmra.mrb[58].mxu0 %vm155_vm0, %v138_v2 }
  0xa6   :  { %5091 = vmatprep.mubr.msk.f32.mxu0 %vm155_vm0, %v139_v3 }
  0xa9   :  { %5092 = vmatmul.mubr.msk.f32.gmra.mrb[60].mxu0 %vm155_vm0, %v140_v4 }
  0xaa   :  { %5094 = vmatprep.mubr.msk.f32.mxu0 %vm155_vm0, %v141_v5 }
  0xad   :  { %5095 = vmatmul.mubr.msk.f32.gmra.mrb[62].mxu0 %vm155_vm0, %v142_v6 }
 0x104   :  { %v5003_v18 = vpop.f32.mrb[0].mxu0 }
 0x105   :  { %v424_v19 = vadd.f32 %v5003_v18, %v6663_v16  ;;  %v418_v20 = vpop.f32.mrb[1].mxu0 }
 0x106   :  { %v419_v21 = vadd.f32 %v6663_v16, %v418_v20 }
 0x107   :  { %v738_v22 = vmax.f32 %v424_v19, 0.0 }
 0x108   :  { %v737_v24 = vmax.f32 %v419_v21, 0.0  ;;  %v5006_v25 = vpop.f32.mrb[2].mxu0 }
 0x109   :  { %v434_v26 = vadd.f32 %v5006_v25, %v6663_v16  ;;  %v428_v27 = vpop.f32.mrb[3].mxu0 }
 0x10a   :  { %v429_v28 = vadd.f32 %v6663_v16, %v428_v27  ;;  %v5628_v29 = vpack.c.bf16 %v738_v22, %v737_v24 }
 0x10b   :  { %v740_v30 = vmax.f32 %v434_v26, 0.0 }
 0x10c   :  { %v739_v31 = vmax.f32 %v429_v28, 0.0  ;;  %v5009_v32 = vpop.f32.mrb[4].mxu0 }
 0x10d   :  { %v444_v33 = vadd.f32 %v5009_v32, %v6663_v16  ;;  %v438_v34 = vpop.f32.mrb[5].mxu0 }
 0x10e   :  { %v6672_v35 = vpack.c.bf16 %v740_v30, %v739_v31  ;;  %v439_v36 = vadd.f32 %v6663_v16, %v438_v34 }
 0x10f   :  { %v742_v37 = vmax.f32 %v444_v33, 0.0 }
 0x110   :  { %v741_v38 = vmax.f32 %v439_v36, 0.0  ;;  %v5012_v39 = vpop.f32.mrb[6].mxu0 }
 0x111   :  { %v454_v40 = vadd.f32 %v5012_v39, %v6663_v16  ;;  %v448_v41 = vpop.f32.mrb[7].mxu0 }
 0x112   :  { %v6676_v42 = vpack.c.bf16 %v742_v37, %v741_v38  ;;  %v449_v43 = vadd.f32 %v6663_v16, %v448_v41 }
 0x113   :  { %v744_v44 = vmax.f32 %v454_v40, 0.0 }
 0x114   :  { %v743_v45 = vmax.f32 %v449_v43, 0.0  ;;  %v5015_v46 = vpop.f32.mrb[8].mxu0 }
 0x115   :  { %v464_v47 = vadd.f32 %v5015_v46, %v6663_v16  ;;  %v458_v48 = vpop.f32.mrb[9].mxu0 }
 0x116   :  { %v6680_v49 = vpack.c.bf16 %v744_v44, %v743_v45  ;;  %v459_v50 = vadd.f32 %v6663_v16, %v458_v48 }
 0x117   :  { %v746_v51 = vmax.f32 %v464_v47, 0.0 }
 0x118   :  { %v745_v52 = vmax.f32 %v459_v50, 0.0  ;;  %v5018_v53 = vpop.f32.mrb[10].mxu0 }
 0x119   :  { %v474_v54 = vadd.f32 %v5018_v53, %v6663_v16  ;;  %v468_v55 = vpop.f32.mrb[11].mxu0 }
 0x11a   :  { %v6684_v56 = vpack.c.bf16 %v746_v51, %v745_v52  ;;  %v469_v57 = vadd.f32 %v6663_v16, %v468_v55 }
 0x11b   :  { %v748_v58 = vmax.f32 %v474_v54, 0.0 }
 0x11c   :  { %v747_v59 = vmax.f32 %v469_v57, 0.0  ;;  %v5021_v60 = vpop.f32.mrb[12].mxu0 }
 0x11d   :  { %v484_v61 = vadd.f32 %v5021_v60, %v6663_v16  ;;  %v478_v62 = vpop.f32.mrb[13].mxu0 }
 0x11e   :  { %v6688_v63 = vpack.c.bf16 %v748_v58, %v747_v59  ;;  %v479_v0 = vadd.f32 %v6663_v16, %v478_v62 }
 0x11f   :  { %v750_v1 = vmax.f32 %v484_v61, 0.0 }
 0x120   :  { %v749_v2 = vmax.f32 %v479_v0, 0.0  ;;  %v5024_v3 = vpop.f32.mrb[14].mxu0 }
 0x121   :  { %v494_v4 = vadd.f32 %v5024_v3, %v6663_v16  ;;  %v488_v5 = vpop.f32.mrb[15].mxu0 }
 0x122   :  { %v6692_v6 = vpack.c.bf16 %v750_v1, %v749_v2  ;;  %v489_v7 = vadd.f32 %v6663_v16, %v488_v5 }
 0x123   :  { %v752_v8 = vmax.f32 %v494_v4, 0.0 }
 0x124   :  { %v751_v10 = vmax.f32 %v489_v7, 0.0  ;;  %v5027_v12 = vpop.f32.mrb[16].mxu0 }
 0x125   :  { %v504_v13 = vadd.f32 %v5027_v12, %v6663_v16  ;;  %v498_v15 = vpop.f32.mrb[17].mxu0 }
 0x126   :  { %v6696_v17 = vpack.c.bf16 %v752_v8, %v751_v10  ;;  %v499_v18 = vadd.f32 %v6663_v16, %v498_v15 }
 0x127   :  { %v754_v19 = vmax.f32 %v504_v13, 0.0 }
 0x128   :  { %v753_v20 = vmax.f32 %v499_v18, 0.0  ;;  %v5030_v21 = vpop.f32.mrb[18].mxu0 }
 0x129   :  { %v514_v22 = vadd.f32 %v5030_v21, %v6663_v16  ;;  %v508_v24 = vpop.f32.mrb[19].mxu0 }
 0x12a   :  { %v509_v25 = vadd.f32 %v6663_v16, %v508_v24  ;;  %v5626_v26 = vpack.c.bf16 %v754_v19, %v753_v20  ;;  %v819_v24 = vcombine.high %v6667_v23, %v6667_v23 }
 0x12b   :  { %v756_v27 = vmax.f32 %v514_v22, 0.0 }
 0x12c   :  { %v755_v28 = vmax.f32 %v509_v25, 0.0  ;;  %v5033_v30 = vpop.f32.mrb[20].mxu0  ;;  %5627 = vmatprep.subr.bf16.mxu1 %v5626_v26 }
 0x12d   :  { %v524_v31 = vadd.f32 %v5033_v30, %v6663_v16  ;;  %v518_v32 = vpop.f32.mrb[21].mxu0  ;;  %5629 = vmatpush3.bf16.msra.mxu1 %v5628_v29 }
 0x12e   :  { %v5630_v33 = vpack.c.bf16 %v756_v27, %v755_v28  ;;  %v519_v34 = vadd.f32 %v6663_v16, %v518_v32 }
 0x12f   :  { %v758_v36 = vmax.f32 %v524_v31, 0.0 }
 0x130   :  { %v757_v37 = vmax.f32 %v519_v34, 0.0  ;;  %v5036_v38 = vpop.f32.mrb[22].mxu0  ;;  %5631 = vmatprep.subr.bf16.mxu1 %v5630_v33 }
 0x131   :  { %v534_v39 = vadd.f32 %v5036_v38, %v6663_v16  ;;  %v528_v40 = vpop.f32.mrb[23].mxu0  ;;  %5633 = vmatpush3.bf16.msra.mxu1 %v6672_v35 }
 0x132   :  { %v5634_v41 = vpack.c.bf16 %v758_v36, %v757_v37  ;;  %v529_v43 = vadd.f32 %v6663_v16, %v528_v40 }
 0x133   :  { %v760_v44 = vmax.f32 %v534_v39, 0.0 }
 0x134   :  { %v759_v45 = vmax.f32 %v529_v43, 0.0  ;;  %v5039_v46 = vpop.f32.mrb[24].mxu0  ;;  %5635 = vmatprep.subr.bf16.mxu1 %v5634_v41 }
 0x135   :  { %v544_v29 = vadd.f32 %v5039_v46, %v6663_v16  ;;  %v538_v47 = vpop.f32.mrb[25].mxu0  ;;  %5637 = vmatpush3.bf16.msra.mxu1 %v6676_v42 }
 0x136   :  { %v5638_v48 = vpack.c.bf16 %v760_v44, %v759_v45  ;;  %v539_v50 = vadd.f32 %v6663_v16, %v538_v47 }
 0x137   :  { %v762_v51 = vmax.f32 %v544_v29, 0.0 }
 0x138   :  { %v761_v52 = vmax.f32 %v539_v50, 0.0  ;;  %v5042_v53 = vpop.f32.mrb[26].mxu0  ;;  %5639 = vmatprep.subr.bf16.mxu1 %v5638_v48 }
 0x139   :  { %v554_v35 = vadd.f32 %v5042_v53, %v6663_v16  ;;  %v548_v54 = vpop.f32.mrb[27].mxu0  ;;  %5641 = vmatpush3.bf16.msra.mxu1 %v6680_v49 }
 0x13a   :  { %v5642_v55 = vpack.c.bf16 %v762_v51, %v761_v52  ;;  %v549_v57 = vadd.f32 %v6663_v16, %v548_v54 }
 0x13b   :  { %v764_v58 = vmax.f32 %v554_v35, 0.0 }
 0x13c   :  { %v763_v59 = vmax.f32 %v549_v57, 0.0  ;;  %v5045_v60 = vpop.f32.mrb[28].mxu0  ;;  %5643 = vmatprep.subr.bf16.mxu1 %v5642_v55 }
 0x13d   :  { %v564_v42 = vadd.f32 %v5045_v60, %v6663_v16  ;;  %v558_v61 = vpop.f32.mrb[29].mxu0  ;;  %5645 = vmatpush3.bf16.msra.mxu1 %v6684_v56 }
 0x13e   :  { %v5646_v62 = vpack.c.bf16 %v764_v58, %v763_v59  ;;  %v559_v0 = vadd.f32 %v6663_v16, %v558_v61 }
 0x13f   :  { %v766_v1 = vmax.f32 %v564_v42, 0.0 }
 0x140   :  { %v765_v2 = vmax.f32 %v559_v0, 0.0  ;;  %v5048_v3 = vpop.f32.mrb[30].mxu0  ;;  %5647 = vmatprep.subr.bf16.mxu1 %v5646_v62 }
 0x141   :  { %v574_v49 = vadd.f32 %v5048_v3, %v6663_v16  ;;  %v568_v4 = vpop.f32.mrb[31].mxu0  ;;  %5649 = vmatpush3.bf16.msra.mxu1 %v6688_v63 }
 0x142   :  { %v5650_v5 = vpack.c.bf16 %v766_v1, %v765_v2  ;;  %v569_v7 = vadd.f32 %v6663_v16, %v568_v4 }
 0x143   :  { %v768_v8 = vmax.f32 %v574_v49, 0.0 }
 0x144   :  { %v767_v10 = vmax.f32 %v569_v7, 0.0  ;;  %v5051_v12 = vpop.f32.mrb[32].mxu0  ;;  %5651 = vmatprep.subr.bf16.mxu1 %v5650_v5 }
 0x145   :  { %v584_v56 = vadd.f32 %v5051_v12, %v6663_v16  ;;  %v578_v13 = vpop.f32.mrb[33].mxu0  ;;  %5653 = vmatpush3.bf16.msra.mxu1 %v6692_v6 }
 0x146   :  { %v5654_v15 = vpack.c.bf16 %v768_v8, %v767_v10  ;;  %v579_v18 = vadd.f32 %v6663_v16, %v578_v13 }
 0x147   :  { %v770_v19 = vmax.f32 %v584_v56, 0.0 }
 0x148   :  { %v769_v20 = vmax.f32 %v579_v18, 0.0  ;;  %v5054_v21 = vpop.f32.mrb[34].mxu0  ;;  %5655 = vmatprep.subr.bf16.mxu1 %v5654_v15 }
 0x149   :  { %v594_v63 = vadd.f32 %v5054_v21, %v6663_v16  ;;  %v588_v22 = vpop.f32.mrb[35].mxu0  ;;  %5657 = vmatpush3.bf16.msra.mxu1 %v6696_v17 }
 0x14a   :  { %v6725_v25 = vpack.c.bf16 %v770_v19, %v769_v20  ;;  %v589_v26 = vadd.f32 %v6663_v16, %v588_v22 }
 0x14b   :  { %v772_v6 = vmax.f32 %v594_v63, 0.0 }
 0x14c   :  { %v771_v27 = vmax.f32 %v589_v26, 0.0  ;;  %v5057_v28 = vpop.f32.mrb[36].mxu0  ;;  %889 = vmatmul.mubr.f32.vlgmr.msra.gmra.mrb[0].mxu1 %v6656_v14 }
 0x14d   :  { %v604_v30 = vadd.f32 %v5057_v28, %v6663_v16  ;;  %v598_v31 = vpop.f32.mrb[37].mxu0  ;;  %958 = vmatprep.mubr.f32.mxu1 %v819_v24 }
 0x14e   :  { %v6730_v32 = vpack.c.bf16 %v772_v6, %v771_v27  ;;  %v599_v17 = vadd.f32 %v6663_v16, %v598_v31 }
 0x14f   :  { %v774_v33 = vmax.f32 %v604_v30, 0.0 }
 0x150   :  { %v773_v34 = vmax.f32 %v599_v17, 0.0  ;;  %v5060_v36 = vpop.f32.mrb[38].mxu0 }
 0x151   :  { %v614_v37 = vadd.f32 %v5060_v36, %v6663_v16  ;;  %v608_v38 = vpop.f32.mrb[39].mxu0 }
 0x152   :  { %v6734_v39 = vpack.c.bf16 %v774_v33, %v773_v34  ;;  %v609_v40 = vadd.f32 %v6663_v16, %v608_v38 }
 0x153   :  { %v776_v41 = vmax.f32 %v614_v37, 0.0 }
 0x154   :  { %v775_v14 = vmax.f32 %v609_v40, 0.0  ;;  %v5063_v43 = vpop.f32.mrb[40].mxu0 }
 0x155   :  { %v624_v44 = vadd.f32 %v5063_v43, %v6663_v16  ;;  %v618_v45 = vpop.f32.mrb[41].mxu0 }
 0x156   :  { %v6738_v46 = vpack.c.bf16 %v776_v41, %v775_v14  ;;  %v619_v29 = vadd.f32 %v6663_v16, %v618_v45 }
 0x157   :  { %v778_v47 = vmax.f32 %v624_v44, 0.0 }
 0x158   :  { %v777_v48 = vmax.f32 %v619_v29, 0.0  ;;  %v5066_v50 = vpop.f32.mrb[42].mxu0 }
 0x159   :  { %v634_v51 = vadd.f32 %v5066_v50, %v6663_v16  ;;  %v628_v52 = vpop.f32.mrb[43].mxu0 }
 0x15a   :  { %v6742_v53 = vpack.c.bf16 %v778_v47, %v777_v48  ;;  %v629_v35 = vadd.f32 %v6663_v16, %v628_v52 }
 0x15b   :  { %v780_v54 = vmax.f32 %v634_v51, 0.0 }
 0x15c   :  { %v779_v55 = vmax.f32 %v629_v35, 0.0  ;;  %v5069_v57 = vpop.f32.mrb[44].mxu0 }
 0x15d   :  { %v644_v58 = vadd.f32 %v5069_v57, %v6663_v16  ;;  %v638_v59 = vpop.f32.mrb[45].mxu0 }
 0x15e   :  { %v6746_v60 = vpack.c.bf16 %v780_v54, %v779_v55  ;;  %v639_v42 = vadd.f32 %v6663_v16, %v638_v59 }
 0x15f   :  { %v782_v61 = vmax.f32 %v644_v58, 0.0 }
 0x160   :  { %v781_v62 = vmax.f32 %v639_v42, 0.0  ;;  %v5072_v0 = vpop.f32.mrb[46].mxu0 }
 0x161   :  { %v654_v1 = vadd.f32 %v5072_v0, %v6663_v16  ;;  %v648_v2 = vpop.f32.mrb[47].mxu0 }
 0x162   :  { %v6750_v3 = vpack.c.bf16 %v782_v61, %v781_v62  ;;  %v649_v49 = vadd.f32 %v6663_v16, %v648_v2 }
 0x163   :  { %v784_v4 = vmax.f32 %v654_v1, 0.0 }
 0x164   :  { %v783_v5 = vmax.f32 %v649_v49, 0.0  ;;  %v5075_v7 = vpop.f32.mrb[48].mxu0 }
 0x165   :  { %v664_v8 = vadd.f32 %v5075_v7, %v6663_v16  ;;  %v658_v10 = vpop.f32.mrb[49].mxu0 }
 0x166   :  { %v6754_v12 = vpack.c.bf16 %v784_v4, %v783_v5  ;;  %v659_v56 = vadd.f32 %v6663_v16, %v658_v10  ;;  %v1064_v5 = vld [vmem:[%s7632_s7] sm:$0xff] }
 0x167   :  { %v786_v13 = vmax.f32 %v664_v8, 0.0  ;;  %v1051_v8 = vld [vmem:[%s7634_s9 + $0x8] sm:$0xff] }
 0x168   :  { %v785_v15 = vmax.f32 %v659_v56, 0.0  ;;  %v5078_v18 = vpop.f32.mrb[50].mxu0 }
 0x169   :  { %v674_v19 = vadd.f32 %v5078_v18, %v6663_v16  ;;  %v668_v20 = vpop.f32.mrb[51].mxu0  ;;  %v6809_v18 = vand.u32 127, %v807_v9  ;;  %v1136_v9 = vstv %s4541_s5 }
 0x16a   :  { %v5658_v21 = vpack.c.bf16 %v786_v13, %v785_v15  ;;  %v669_v63 = vadd.f32 %v6663_v16, %v668_v20  ;;  %v1118_v20 = vstv %s4539_s26 }
 0x16b   :  { %v788_v22 = vmax.f32 %v674_v19, 0.0  ;;  %v1109_v19 = vstv %s1106_s0  ;;  %vm1119_vm7 = vcmp.eq.s32.totalorder %v6809_v18, %v1118_v20  ;;  %vm1137_vm13 = vcmp.eq.s32.totalorder %v6809_v18, %v1136_v9  ;;  %v1053_v20 = vld [vmem:[%s7634_s9 + $0x18] sm:$0xff]  ;;  %v1047_v9 = vld [vmem:[%s7633_s8 + $0x8] sm:$0xff] }
 0x16c   :  { %v787_v24 = vmax.f32 %v669_v63, 0.0  ;;  %v5081_v26 = vpop.f32.mrb[52].mxu0  ;;  %5659 = vmatprep.subr.bf16.mxu1 %v5658_v21  ;;  %vm1110_vm4 = vcmp.eq.s32.totalorder %v6809_v18, %v1109_v19  ;;  %v1127_v21 = vstv %s4540_s30  ;;  %vm1120_vm8 = vmand %vm1116_vm6, %vm1119_vm7  ;;  %vm1161_vm6 = vcmp.eq.s32.totalorder %v6650_v11, 6  ;;  %v1052_v19 = vld [vmem:[%s7634_s9 + $0x10] sm:$0xff] }
 0x16d   :  { %v684_v6 = vadd.f32 %v5081_v26, %v6663_v16  ;;  %v678_v27 = vpop.f32.mrb[53].mxu0  ;;  %5661 = vmatpush3.bf16.msra.mxu1 %v6725_v25  ;;  %vm1111_vm5 = vmand %vm1107_vm3, %vm1110_vm4  ;;  %vm1128_vm10 = vcmp.eq.s32.totalorder %v6809_v18, %v1127_v21  ;;  %vm1152_vm3 = vcmp.eq.s32.totalorder %v6650_v11, 5  ;;  %v6935_v21 = vpack.c.bf16 %v1053_v20, %v1052_v19 }
 0x16e   :  { %v5662_v28 = vpack.c.bf16 %v788_v22, %v787_v24  ;;  %v679_v30 = vadd.f32 %v6663_v16, %v678_v27  ;;  %vm1129_vm11 = vmand %vm1125_vm9, %vm1128_vm10  ;;  %v1145_v24 = vstv %s4542_s22  ;;  %vm1170_vm9 = vcmp.eq.s32.totalorder %v6650_v11, 7  ;;  %s6847_s22 = sld [smem:[#allocation2 + $0x85]] }
 0x16f   :  { %v790_v31 = vmax.f32 %v684_v6, 0.0  ;;  %vm1138_vm14 = vmand %vm1134_vm12, %vm1137_vm13  ;;  %vm1146_vm0 = vcmp.eq.s32.totalorder %v6809_v18, %v1145_v24  ;;  %v1154_v6 = vstv %s4543_s4  ;;  %vm972_vm12 = vcmask 64512  }
 0x170   :  { %v789_v17 = vmax.f32 %v679_v30, 0.0  ;;  %v5084_v33 = vpop.f32.mrb[54].mxu0  ;;  %5663 = vmatprep.subr.bf16.mxu1 %v5662_v28  ;;  %vm1147_vm1 = vmand %vm1143_vm15, %vm1146_vm0  ;;  %vm1155_vm4 = vcmp.eq.s32.totalorder %v6809_v18, %v1154_v6  ;;  %v1163_v28 = vstv %s4544_s23 }
 0x171   :  { %v694_v34 = vadd.f32 %v5084_v33, %v6663_v16  ;;  %v688_v36 = vpop.f32.mrb[55].mxu0  ;;  %5665 = vmatpush3.bf16.msra.mxu1 %v6730_v32  ;;  %vm1164_vm7 = vcmp.eq.s32.totalorder %v6809_v18, %v1163_v28  ;;  %v1048_v28 = vld [vmem:[%s7633_s8 + $0x10] sm:$0xff] }
 0x172   :  { %v5666_v37 = vpack.c.bf16 %v790_v31, %v789_v17  ;;  %v689_v38 = vadd.f32 %v6663_v16, %v688_v36  ;;  %v1172_v31 = vstv %s4545_s1  ;;  %v1066_v36 = vld [vmem:[%s7632_s7 + $0x10] sm:$0xff] }
 0x173   :  { %v792_v40 = vmax.f32 %v694_v34, 0.0  ;;  %vm1173_vm10 = vcmp.eq.s32.totalorder %v6809_v18, %v1172_v31 }
 0x174   :  { %v791_v41 = vmax.f32 %v689_v38, 0.0  ;;  %v5087_v14 = vpop.f32.mrb[56].mxu0  ;;  %5667 = vmatprep.subr.bf16.mxu1 %v5666_v37  ;;  %v1067_v37 = vld [vmem:[%s7632_s7 + $0x18] sm:$0xff] }
 0x175   :  { %v704_v25 = vadd.f32 %v5087_v14, %v6663_v16  ;;  %v698_v43 = vpop.f32.mrb[57].mxu0  ;;  %5669 = vmatpush3.bf16.msra.mxu1 %v6734_v39  ;;  %v5694_v14 = vpack.c.bf16 %v1067_v37, %v1066_v36  ;;  %v6979_v37 = vld [vmem:[%s7635_s10] ss:$0 sm:$0xff] }
 0x176   :  { %v5670_v44 = vpack.c.bf16 %v792_v40, %v791_v41  ;;  %v699_v45 = vadd.f32 %v6663_v16, %v698_v43  ;;  %v6839_v43 = vadd.s32 8, %v6650_v11  ;;  %v1190_v11 = vstv %s6828_s2  ;;  %s6864_s2 = sld [smem:[#allocation2 + $0x86]] }
 0x177   :  { %v794_v29 = vmax.f32 %v704_v25, 0.0 }
 0x178   :  { %v793_v47 = vmax.f32 %v699_v45, 0.0  ;;  %v5090_v48 = vpop.f32.mrb[58].mxu0  ;;  %5671 = vmatprep.subr.bf16.mxu1 %v5670_v44  ;;  %v1068_v44 = vld [vmem:[%s7632_s7 + $0x20] sm:$0xff]  ;;  %v1069_v45 = vld [vmem:[%s7632_s7 + $0x28] sm:$0xff]  ;;  %vm1180_vm13 = vcmp.eq.s32.totalorder %v6839_v43, 8  ;;  %vm1189_vm0 = vcmp.eq.s32.totalorder %v6839_v43, 9 }
 0x179   :  { %v714_v32 = vadd.f32 %v5090_v48, %v6663_v16  ;;  %v708_v50 = vpop.f32.mrb[59].mxu0  ;;  %5673 = vmatpush3.bf16.msra.mxu1 %v6738_v46  ;;  %v1070_v48 = vld [vmem:[%s7632_s7 + $0x30] sm:$0xff] }
 0x17a   :  { %v5674_v51 = vpack.c.bf16 %v794_v29, %v793_v47  ;;  %v709_v52 = vadd.f32 %v6663_v16, %v708_v50  ;;  %v1181_v29 = vstv %s4546_s24  ;;  %v5698_v47 = vpack.c.bf16 %v1069_v45, %v1068_v44 }
 0x17b   :  { %v796_v35 = vmax.f32 %v714_v32, 0.0  ;;  %v1071_v32 = vld [vmem:[%s7632_s7 + $0x38] sm:$0xff]  ;;  %v1199_v50 = vstv %s6836_s29  ;;  %s6880_s29 = sld [smem:[#allocation2 + $0x7]] }
 0x17c   :  { %v795_v54 = vmax.f32 %v709_v52, 0.0  ;;  %v5093_v55 = vpop.f32.mrb[60].mxu0  ;;  %5675 = vmatprep.subr.bf16.mxu1 %v5674_v51  ;;  %v5702_v51 = vpack.c.bf16 %v1071_v32, %v1070_v48  ;;  %v1072_v52 = vld [vmem:[%s7632_s7 + $0x40] sm:$0xff] }
 0x17d   :  { %v724_v39 = vadd.f32 %v5093_v55, %v6663_v16  ;;  %v718_v57 = vpop.f32.mrb[61].mxu0  ;;  %5677 = vmatpush3.bf16.msra.mxu1 %v6742_v53 }
 0x17e   :  { %v5678_v58 = vpack.c.bf16 %v796_v35, %v795_v54  ;;  %v719_v59 = vadd.f32 %v6663_v16, %v718_v57  ;;  %v1073_v35 = vld [vmem:[%s7632_s7 + $0x48] sm:$0xff] }
 0x17f   :  { %v798_v42 = vmax.f32 %v724_v39, 0.0  ;;  %v1208_v39 = vstv %s6847_s22  ;;  %v5706_v57 = vpack.c.bf16 %v1073_v35, %v1072_v52  ;;  %s6893_s22 = sld [smem:[#allocation2 + $0x87]] }
 0x180   :  { %v797_v61 = vmax.f32 %v719_v59, 0.0  ;;  %v5096_v62 = vpop.f32.mrb[62].mxu0  ;;  %5679 = vmatprep.subr.bf16.mxu1 %v5678_v58  ;;  %v1074_v58 = vld [vmem:[%s7632_s7 + $0x50] sm:$0xff]  ;;  %v1075_v59 = vld [vmem:[%s7632_s7 + $0x58] sm:$0xff] }
 0x181   :  { %v734_v46 = vadd.f32 %v5096_v62, %v6663_v16  ;;  %v728_v0 = vpop.f32.mrb[63].mxu0  ;;  %5681 = vmatpush3.bf16.msra.mxu1 %v6746_v60  ;;  %v1065_v60 = vld [vmem:[%s7632_s7 + $0x8] sm:$0xff]  ;;  %v5710_v62 = vpack.c.bf16 %v1075_v59, %v1074_v58 }
 0x182   :  { %v5682_v1 = vpack.c.bf16 %v798_v42, %v797_v61  ;;  %v729_v2 = vadd.f32 %v6663_v16, %v728_v0  ;;  %v6253_v16 = vmov 0.0   ;;  %v6790_v7 = vpack.c.bf16 %v1065_v60, %v1064_v5  ;;  %v1078_v60 = vld [vmem:[%s7632_s7 + $0x70] sm:$0xff] }
 0x183   :  { %v800_v49 = vmax.f32 %v734_v46, 0.0  ;;  %5189 = vmatprep.mubr.msk.f32.mxu0 %vm6254_vm2, %v6253_v16  ;;  %v1113_v63 = vsel %vm1111_vm5, 1.0, %v6253_v16  ;;  %vm1156_vm5 = vmand %vm1152_vm3, %vm1155_vm4  ;;  %vm1198_vm4 = vcmp.eq.s32.totalorder %v6839_v43, 10 }
 0x184   :  { %v799_v4 = vmax.f32 %v729_v2, 0.0  ;;  %5683 = vmatprep.subr.bf16.mxu1 %v5682_v1  ;;  %v1122_v22 = vsel %vm1120_vm8, 1.0, %v1113_v63  ;;  %vm1165_vm8 = vmand %vm1161_vm6, %vm1164_vm7  ;;  %vm1207_vm7 = vcmp.eq.s32.totalorder %v6839_v43, 11  ;;  %v1226_v1 = vstv %s6864_s2  ;;  %v1076_v2 = vld [vmem:[%s7632_s7 + $0x60] sm:$0xff]  ;;  %s6261_s2 = smov [#allocation9]  }
 0x185   :  { %5685 = vmatpush3.bf16.msra.mxu1 %v6750_v3  ;;  %v964_v3 = vld [vmem:[%s7660_s25] sm:$0xff]  ;;  %v1131_v26 = vsel %vm1129_vm11, 1.0, %v1122_v22  ;;  %vm1174_vm11 = vmand %vm1170_vm9, %vm1173_vm10  ;;  %s6859_s25 = sld [smem:[#allocation2 + $0x6]]  ;;  %vm1216_vm10 = vcmp.eq.s32.totalorder %v6839_v43, 12 }
 0x186   :  { %v5686_v53 = vpack.c.bf16 %v800_v49, %v799_v4  ;;  %v1140_v27 = vsel %vm1138_vm14, 1.0, %v1131_v26  ;;  %vm1182_vm14 = vcmp.eq.s32.totalorder %v6809_v18, %v1181_v29  ;;  %v1077_v49 = vld [vmem:[%s7632_s7 + $0x68] sm:$0xff]  ;;  %v1046_v63 = vld [vmem:[%s7633_s8] sm:$0xff] }
 0x187   :  { %v1149_v30 = vsel %vm1147_vm1, 1.0, %v1140_v27  ;;  %vm1184_vm15 = vmand %vm1180_vm13, %vm1182_vm14  ;;  %vm1191_vm1 = vcmp.eq.s32.totalorder %v6809_v18, %v1190_v11  ;;  %vm1225_vm13 = vcmp.eq.s32.totalorder %v6839_v43, 13  ;;  %vm1227_vm14 = vcmp.eq.s32.totalorder %v6809_v18, %v1226_v1  ;;  %v4537_v22 = vld [vmem:[%s7631_s6] ss:$0 sm:$0xff] }
 0x188   :  { %5687 = vmatprep.subr.bf16.mxu1 %v5686_v53  ;;  %v1158_v17 = vsel %vm1156_vm5, 1.0, %v1149_v30  ;;  %v1186_v54 = vsel %vm1184_vm15, 1.0, %v6253_v16  ;;  %vm6873_vm3 = vmand %vm1189_vm0, %vm1191_vm1  ;;  %vm1200_vm5 = vcmp.eq.s32.totalorder %v6809_v18, %v1199_v50  ;;  %v1235_v53 = vstv %s6880_s29  ;;  %v1049_v30 = vld [vmem:[%s7633_s8 + $0x18] sm:$0xff] }
 0x189   :  { %5689 = vmatpush3.bf16.msra.mxu1 %v6754_v12  ;;  %v6255_v12 = vmov 0.0|0.0   ;;  %v1167_v38 = vsel %vm1165_vm8, 1.0, %v1158_v17  ;;  %v1195_v42 = vsel %vm6873_vm3, 1.0, %v1186_v54  ;;  %vm1202_vm6 = vmand %vm1198_vm4, %vm1200_vm5  ;;  %vm1209_vm8 = vcmp.eq.s32.totalorder %v6809_v18, %v1208_v39 }
 0x18a   :  { %5097 = vmatprep.subr.mxu1 %v6253_v16  ;;  %5746 = vmatprep.subr.bf16.mxu0 %v6255_v12  ;;  %v1176_v25 = vsel %vm1174_vm11, 1.0, %v1167_v38  ;;  %v1204_v46 = vsel %vm1202_vm6, 1.0, %v1195_v42  ;;  %vm6895_vm9 = vmand %vm1207_vm7, %vm1209_vm8  ;;  %v5714_v5 = vpack.c.bf16 %v1077_v49, %v1076_v2  ;;  %vm1234_vm0 = vcmp.eq.s32.totalorder %v6839_v43, 14 }
 0x18b   :  { %v1217_v61 = vstv %s6859_s25  ;;  %v1213_v4 = vsel %vm6895_vm9, 1.0, %v1204_v46  ;;  %vm1229_vm15 = vmand %vm1225_vm13, %vm1227_vm14  ;;  %vm1236_vm1 = vcmp.eq.s32.totalorder %v6809_v18, %v1235_v53  ;;  %vm1243_vm4 = vcmp.eq.s32.totalorder %v6839_v43, 15 }
 0x18c   :  { %959 = vmatmul.mubr.f32.vlgmr.msra.gmra.mrb[2].mxu1 %v6667_v23  ;;  %v1050_v23 = vld [vmem:[%s7634_s9] sm:$0xff]  ;;  %vm1218_vm11 = vcmp.eq.s32.totalorder %v6809_v18, %v1217_v61  ;;  %vm1238_vm3 = vmand %vm1234_vm0, %vm1236_vm1  ;;  %vm1325_vm7 = vcmask 261120   ;;  %v6950_v26 = vpack.c.bf16 %v1047_v9, %v1046_v63  ;;  %v6960_v31 = vpack.c.bf16 %v1049_v30, %v1048_v28 }
 0x18d   :  { %5098 = vmatpush3.msra.mxu1 %v964_v3  ;;  %5099 = vmatprep.mubr.msk.f32.mxu1 %vm6254_vm2, %v6253_v16  ;;  %v6803_v10 = vpack.c.bf16 %v1051_v8, %v1050_v23  ;;  %v1079_v3 = vld [vmem:[%s7632_s7 + $0x78] sm:$0xff]  ;;  %v1244_v23 = vstv %s6893_s22  ;;  %vm2978_vm8 = vcmask 1041408   ;;  %vm3008_vm14 = vcmp.eq.s32.totalorder %v6809_v18, 0 }
 0x18e   :  { %5691 = vmatprep.subr.bf16.mxu1 %v6790_v7  ;;  %v5718_v8 = vpack.c.bf16 %v1079_v3, %v1078_v60  ;;  %vm1245_vm5 = vcmp.eq.s32.totalorder %v6809_v18, %v1244_v23 }
 0x18f   :  { %5748 = vmatpush3.bf16.msra.mxu0 %v6803_v10  ;;  %vm1247_vm6 = vmand %vm1243_vm4, %vm1245_vm5  ;;  %vm3702_vm4 = vcmp.eq.s32.totalorder %v6809_v18, 2 }
 0x190   :  { %5749 = vmatprep.subr.bf16.mxu0 %v6255_v12 }
 0x193   :  { %5751 = vmatpush3.bf16.msra.mxu0 %v6935_v21 }
 0x194   :  { %5758 = vmatprep.subr.bf16.mxu0 %v6255_v12 }
 0x21f   :  { %v4710_v56 = vpop.f32.mrb[0].mxu1 }
 0x220   :  { %v4711_v13 = vpop.f32.mrb[1].mxu1 }
 0x221   :  { %v4712_v15 = vadd.f32 %v4711_v13, %v4710_v56 }
 0x25f   :  { %v4745_v33 = vpop.f32.mrb[2].mxu1 }
 0x260   :  { %v4746_v34 = vpop.f32.mrb[3].mxu1 }
 0x261   :  { %v4747_v40 = vadd.f32 %v4746_v34, %v4745_v33 }
 0x263   :  { %v961_v41 = vadd.f32 %v4747_v40, %v4712_v15 }
 0x265   :  { %5100 = vmatmul.mubr.msk.f32.vlgmr.msra.gmra.mrb[4].mxu1 %vm972_vm12, %v961_v41  ;;  %vm1220_vm12 = vmand %vm1216_vm10, %vm1218_vm11 }
 0x266   :  { %5693 = vmatpush3.bf16.msra.mxu1 %v6790_v7  ;;  %5134 = vmatprep.mubr.f32.mxu1 %v1176_v25  ;;  %v1222_v7 = vsel %vm1220_vm12, 1.0, %v1213_v4 }
 0x267   :  { %5695 = vmatprep.subr.bf16.mxu1 %v5694_v14  ;;  %v1231_v56 = vsel %vm1229_vm15, 1.0, %v1222_v7  ;;  %vm3355_vm15 = vcmp.eq.s32.totalorder %v6809_v18, 1 }
 0x268   :  { %v1240_v13 = vsel %vm1238_vm3, 1.0, %v1231_v56 }
 0x269   :  { %v1249_v15 = vsel %vm1247_vm6, 1.0, %v1240_v13 }
 0x26a   :  { %5697 = vmatpush3.bf16.msra.mxu1 %v5694_v14 }
 0x26b   :  { %5699 = vmatprep.subr.bf16.mxu1 %v5698_v47 }
 0x26e   :  { %5701 = vmatpush3.bf16.msra.mxu1 %v5698_v47 }
 0x26f   :  { %5703 = vmatprep.subr.bf16.mxu1 %v5702_v51 }
 0x272   :  { %5705 = vmatpush3.bf16.msra.mxu1 %v5702_v51 }
 0x273   :  { %5707 = vmatprep.subr.bf16.mxu1 %v5706_v57 }
 0x276   :  { %5709 = vmatpush3.bf16.msra.mxu1 %v5706_v57 }
 0x277   :  { %5711 = vmatprep.subr.bf16.mxu1 %v5710_v62 }
 0x27a   :  { %5713 = vmatpush3.bf16.msra.mxu1 %v5710_v62 }
 0x27b   :  { %5715 = vmatprep.subr.bf16.mxu1 %v5714_v5 }
 0x27e   :  { %5717 = vmatpush3.bf16.msra.mxu1 %v5714_v5 }
 0x27f   :  { %5719 = vmatprep.subr.bf16.mxu1 %v5718_v8 }
 0x282   :  { %5721 = vmatpush3.bf16.msra.mxu1 %v5718_v8 }
 0x283   :  { %5722 = vmatprep.subr.bf16.mxu1 %v6255_v12 }
 0x285   :  { %5135 = vmatmul.mubr.f32.vlgmr.msra.gmra.mrb[6].mxu1 %v1249_v15 }
 0x286   :  { %5724 = vmatpush3.bf16.msra.mxu1 %v6803_v10  ;;  %5145 = vmatprep.mubr.msk.f32.mxu1 %vm6254_vm2, %v6253_v16 }
 0x287   :  { %5725 = vmatprep.subr.bf16.mxu1 %v6255_v12 }
 0x28a   :  { %5727 = vmatpush3.bf16.msra.mxu1 %v6935_v21 }
 0x28b   :  { %5728 = vmatprep.subr.bf16.mxu1 %v6255_v12 }
 0x338   :  { %v1042_v24 = vpop.f32.mrb[4].mxu1 }
 0x339   :  { %v1043_v6 = vadd.f32 %v4537_v22, %v1042_v24  ;;  %v5101_v27 = vpop.f32.mrb[5].mxu1 }
 0x33b   :  { %5146 = vmatmul.mubr.msk.f32.vlgmr.msra.gmra.mrb[8].mxu1 %vm1325_vm7, %v1043_v6 }
 0x33c   :  { %5730 = vmatpush3.bf16.msra.mxu1 %v6950_v26  ;;  %5156 = vmatprep.mubr.msk.f32.mxu1 %vm6254_vm2, %v6253_v16 }
 0x33d   :  { %5731 = vmatprep.subr.bf16.mxu1 %v6255_v12 }
 0x340   :  { %5733 = vmatpush3.bf16.msra.mxu1 %v6960_v31 }
 0x341   :  { %5734 = vmatprep.subr.bf16.mxu1 %v6255_v12 }
 0x358   :  { %v6967_v17 = vpop.f32.mrb[6].mxu1 }
 0x359   :  { %v1316_v33 = vpop.f32.mrb[7].mxu1  ;;  %v2273_v59 = vrot.slane %v6967_v17, 2  ;;  %v2446_v42 = vrot.slane %v6967_v17, 4  ;;  %v2619_v61 = vrot.slane %v6967_v17, 6 }
 0x35a   :  { %5157 = vmatmul.mubr.msk.f32.vlgmr.msra.gmra.mrb[10].mxu1 %vm1325_vm7, %v1316_v33  ;;  %v1581_v39 = vrot.slane %v1316_v33, 2  ;;  %v1754_v57 = vrot.slane %v1316_v33, 4  ;;  %v1927_v58 = vrot.slane %v1316_v33, 6 }
 0x35b   :  { %5736 = vmatpush3.bf16.msra.mxu1 %v6803_v10  ;;  %5167 = vmatprep.mubr.msk.f32.mxu1 %vm6254_vm2, %v6253_v16 }
 0x35c   :  { %5737 = vmatprep.subr.bf16.mxu1 %v6255_v12 }
 0x35f   :  { %5739 = vmatpush3.bf16.msra.mxu1 %v6935_v21 }
 0x360   :  { %5740 = vmatprep.subr.bf16.mxu1 %v6255_v12 }
 0x40e   :  { %v1395_v34 = vpop.f32.mrb[8].mxu1 }
 0x40f   :  { %v5147_v36 = vpop.f32.mrb[9].mxu1 }
 0x42d   :  { %v1468_v38 = vpop.f32.mrb[10].mxu1 }
 0x42e   :  { %v1469_v40 = vadd.f32 %v1468_v38, %v1395_v34  ;;  %v5158_v41 = vpop.f32.mrb[11].mxu1 }
 0x430   :  { %v1478_v14 = vadd.f32 %v6979_v37, %v1469_v40 }
 0x432   :  { %6019 = vtanh.f32 %v1478_v14  ;;  %v4557_v43 = vmul.f32 -1.442695, %v1478_v14 }
 0x434   :  { %6021 = vpow2.f32 %v4557_v43 }
 0x43c   :  { %v6020_v25 = vpop.eup %6019 }
 0x43d   :  { %1491 = vrot.lane.b32.xlu0 %v6020_v25, %s6256_s27 }
 0x43e   :  { %v6022_v44 = vpop.eup %6021 }
 0x43f   :  { %v1482_v45 = vadd.f32 1.0, %v6022_v44 }
 0x441   :  { %1486 = vrot.lane.b32.xlu0 %v1043_v6, %s6257_s3  ;;  %6023 = vrcp.f32 %v1482_v45 }
 0x44b   :  { %v6024_v29 = vpop.eup %6023 }
 0x4af   :  { %v1492_v47 = vpop.permute.xlu0 %1491 }
 0x4b0   :  { %v1494_v11 = vmul.f32 %v6024_v29, %v1492_v47 }
 0x4b2   :  { %1496 = vrot.lane.b32.xlu1 %v1494_v11, %s6257_s3 }
 0x4b3   :  { %v1487_v48 = vpop.permute.xlu0 %1486 }
 0x4b4   :  { %v1489_v32 = vmul.f32 %v6024_v29, %v1487_v48 }
 0x524   :  { %v1497_v50 = vpop.permute.xlu1 %1496 }
 0x525   :  { %v6985_v51 = vadd.f32 %v1497_v50, %v1489_v32 }
 0x527   :  { %6025 = vtanh.f32 %v6985_v51 }
 0x531   :  { %v6026_v52 = vpop.eup %6025 }
 0x532   :  { %1502 = vrot.lane.b32.xlu1 %v6026_v52, %s6256_s27 }
 0x5a4   :  { %v1503_v35 = vpop.permute.xlu1 %1502 }
 0x5a5   :  { %v1505_v54 = vmul.f32 %v6024_v29, %v1503_v35 }
 0x5a7   :  { %1507 = vrot.lane.b32.xlu0 %v1505_v54, %s6257_s3 }
 0x619   :  { %v1508_v55 = vpop.permute.xlu0 %1507 }
 0x61a   :  { %5168 = vmatmul.mubr.msk.f32.vlgmr.msra.gmra.mrb[12].mxu1 %vm1325_vm7, %v1508_v55 }
 0x61b   :  { %5742 = vmatpush3.bf16.msra.mxu1 %v6950_v26  ;;  %5178 = vmatprep.mubr.msk.f32.mxu1 %vm6254_vm2, %v6253_v16 }
 0x61c   :  { %5743 = vmatprep.subr.bf16.mxu1 %v6255_v12 }
 0x61f   :  { %5745 = vmatpush3.bf16.msra.mxu1 %v6960_v31 }
 0x620   :  { %5752 = vmatprep.subr.bf16.mxu1 %v6255_v12 }
 0x622   :  { %5179 = vmatmul.mubr.msk.f32.vlgmr.msra.gmra.mrb[14].mxu1 %vm1325_vm7, %v1581_v39 }
 0x623   :  { %5754 = vmatpush3.bf16.msra.mxu1 %v6950_v26  ;;  %5200 = vmatprep.mubr.msk.f32.mxu1 %vm6254_vm2, %v6253_v16 }
 0x624   :  { %5755 = vmatprep.subr.bf16.mxu1 %v6255_v12 }
 0x627   :  { %5757 = vmatpush3.bf16.msra.mxu1 %v6960_v31 }
 0x628   :  { %5764 = vmatprep.subr.bf16.mxu1 %v6255_v12 }
 0x62a   :  { %5201 = vmatmul.mubr.msk.f32.vlgmr.msra.gmra.mrb[16].mxu1 %vm1325_vm7, %v1754_v57 }
 0x62b   :  { %5766 = vmatpush3.bf16.msra.mxu1 %v6950_v26  ;;  %5222 = vmatprep.mubr.msk.f32.mxu1 %vm6254_vm2, %v6253_v16 }
 0x62c   :  { %5767 = vmatprep.subr.bf16.mxu1 %v6255_v12 }
 0x62f   :  { %5769 = vmatpush3.bf16.msra.mxu1 %v6960_v31 }
 0x630   :  { %5776 = vmatprep.subr.bf16.mxu1 %v6255_v12 }
 0x632   :  { %5223 = vmatmul.mubr.msk.f32.vlgmr.msra.gmra.mrb[18].mxu1 %vm1325_vm7, %v1927_v58 }
 0x633   :  { %5778 = vmatpush3.bf16.msra.mxu1 %v6950_v26  ;;  %5244 = vmatprep.mubr.msk.f32.mxu1 %vm6254_vm2, %v6253_v16 }
 0x634   :  { %5779 = vmatprep.subr.bf16.mxu1 %v6255_v12 }
 0x637   :  { %5781 = vmatpush3.bf16.msra.mxu1 %v6960_v31 }
 0x638   :  { %5788 = vmatprep.subr.bf16.mxu1 %v6255_v12 }
 0x63a   :  { %5245 = vmatmul.mubr.msk.f32.vlgmr.msra.gmra.mrb[20].mxu1 %vm1325_vm7, %v6967_v17 }
 0x63b   :  { %5790 = vmatpush3.bf16.msra.mxu1 %v6950_v26  ;;  %5266 = vmatprep.mubr.msk.f32.mxu1 %vm6254_vm2, %v6253_v16 }
 0x63c   :  { %5791 = vmatprep.subr.bf16.mxu1 %v6255_v12 }
 0x63f   :  { %5793 = vmatpush3.bf16.msra.mxu1 %v6960_v31 }
 0x640   :  { %5800 = vmatprep.subr.bf16.mxu1 %v6255_v12 }
 0x642   :  { %5267 = vmatmul.mubr.msk.f32.vlgmr.msra.gmra.mrb[22].mxu1 %vm1325_vm7, %v2273_v59 }
 0x643   :  { %5802 = vmatpush3.bf16.msra.mxu1 %v6950_v26  ;;  %5288 = vmatprep.mubr.msk.f32.mxu1 %vm6254_vm2, %v6253_v16 }
 0x644   :  { %5803 = vmatprep.subr.bf16.mxu1 %v6255_v12 }
 0x647   :  { %5805 = vmatpush3.bf16.msra.mxu1 %v6960_v31 }
 0x648   :  { %5812 = vmatprep.subr.bf16.mxu1 %v6255_v12 }
 0x64a   :  { %5289 = vmatmul.mubr.msk.f32.vlgmr.msra.gmra.mrb[24].mxu1 %vm1325_vm7, %v2446_v42 }
 0x64b   :  { %5814 = vmatpush3.bf16.msra.mxu1 %v6950_v26  ;;  %5310 = vmatprep.mubr.msk.f32.mxu1 %vm6254_vm2, %v6253_v16 }
 0x64c   :  { %5815 = vmatprep.subr.bf16.mxu1 %v6255_v12 }
 0x64f   :  { %5817 = vmatpush3.bf16.msra.mxu1 %v6960_v31 }
 0x650   :  { %5824 = vmatprep.subr.bf16.mxu1 %v6255_v12 }
 0x652   :  { %5311 = vmatmul.mubr.msk.f32.vlgmr.msra.gmra.mrb[26].mxu1 %vm1325_vm7, %v2619_v61 }
 0x653   :  { %5332 = vmatprep.mubr.msk.f32.mxu1 %vm6254_vm2, %v6253_v16 }
 0x6ed   :  { %v1577_v62 = vpop.f32.mrb[12].mxu1 }
 0x6ee   :  { %v5169_v46 = vpop.f32.mrb[13].mxu1 }
 0x6f5   :  { %v1650_v0 = vpop.f32.mrb[14].mxu1 }
 0x6f6   :  { %v1651_v1 = vadd.f32 %v1650_v0, %v1577_v62  ;;  %v5180_v2 = vpop.f32.mrb[15].mxu1 }
 0x6f8   :  { %v1654_v49 = vadd.f32 %v6979_v37, %v1651_v1 }
 0x6fa   :  { %6027 = vtanh.f32 %v1654_v49  ;;  %v4560_v63 = vmul.f32 -1.442695, %v1654_v49 }
 0x6fc   :  { %6029 = vpow2.f32 %v4560_v63 }
 0x6fd   :  { %v1823_v4 = vpop.f32.mrb[16].mxu1 }
 0x6fe   :  { %v5202_v53 = vpop.f32.mrb[17].mxu1 }
 0x704   :  { %v6028_v5 = vpop.eup %6027 }
 0x705   :  { %1664 = vrot.lane.b32.xlu1 %v6028_v5, %s6256_s27  ;;  %v7048_v60 = vpop.f32.mrb[18].mxu1 }
 0x706   :  { %v5224_v3 = vpop.f32.mrb[19].mxu1  ;;  %v6030_v9 = vpop.eup %6029 }
 0x707   :  { %v1658_v22 = vadd.f32 1.0, %v6030_v9 }
 0x709   :  { %6031 = vrcp.f32 %v1658_v22 }
 0x70d   :  { %v7050_v7 = vpop.f32.mrb[20].mxu1 }
 0x70e   :  { %v5246_v23 = vpop.f32.mrb[21].mxu1 }
 0x713   :  { %v6032_v24 = vpop.eup %6031 }
 0x714   :  { %v1662_v27 = vmul.f32 %v6032_v24, %v6985_v51 }
 0x715   :  { %v7052_v8 = vpop.f32.mrb[22].mxu1 }
 0x716   :  { %v5268_v56 = vpop.f32.mrb[23].mxu1 }
 0x71d   :  { %v7054_v13 = vpop.f32.mrb[24].mxu1 }
 0x71e   :  { %v5290_v15 = vpop.f32.mrb[25].mxu1 }
 0x725   :  { %v7056_v19 = vpop.f32.mrb[26].mxu1 }
 0x726   :  { %v5312_v20 = vpop.f32.mrb[27].mxu1 }
 0x777   :  { %v1665_v26 = vpop.permute.xlu1 %1664 }
 0x778   :  { %v1667_v6 = vmul.f32 %v6032_v24, %v1665_v26 }
 0x77a   :  { %1669 = vrot.lane.b32.xlu0 %v1667_v6, %s6257_s3 }
 0x7ec   :  { %v1670_v28 = vpop.permute.xlu0 %1669 }
 0x7ed   :  { %v1672_v30 = vadd.f32 %v1670_v28, %v1662_v27 }
 0x7ef   :  { %6033 = vtanh.f32 %v1672_v30 }
 0x7f9   :  { %v6034_v31 = vpop.eup %6033 }
 0x7fa   :  { %1675 = vrot.lane.b32.xlu1 %v6034_v31, %s6256_s27 }
 0x86c   :  { %v1676_v17 = vpop.permute.xlu1 %1675 }
 0x86d   :  { %v1678_v33 = vmul.f32 %v6032_v24, %v1676_v17 }
 0x86f   :  { %1680 = vrot.lane.b32.xlu0 %v1678_v33, %s6257_s3 }
 0x8e1   :  { %v1681_v34 = vpop.permute.xlu0 %1680 }
 0x8e2   :  { %5190 = vmatmul.mubr.msk.f32.vlgmr.msra.gmra.mrb[64].mxu0 %vm1325_vm7, %v1681_v34 }
 0x8e3   :  { %5760 = vmatpush3.bf16.msra.mxu0 %v6803_v10  ;;  %5211 = vmatprep.mubr.msk.f32.mxu0 %vm6254_vm2, %v6253_v16 }
 0x8e4   :  { %5761 = vmatprep.subr.bf16.mxu0 %v6255_v12 }
 0x8e7   :  { %5763 = vmatpush3.bf16.msra.mxu0 %v6935_v21 }
 0x8e8   :  { %5770 = vmatprep.subr.bf16.mxu0 %v6255_v12 }
 0x9b5   :  { %v1750_v36 = vpop.f32.mrb[64].mxu0 }
 0x9b6   :  { %v1824_v38 = vadd.f32 %v1823_v4, %v1750_v36  ;;  %v5191_v40 = vpop.f32.mrb[65].mxu0 }
 0x9b8   :  { %v1827_v41 = vadd.f32 %v6979_v37, %v1824_v38 }
 0x9ba   :  { %6035 = vtanh.f32 %v1827_v41  ;;  %v4563_v25 = vmul.f32 -1.442695, %v1827_v41 }
 0x9bc   :  { %6037 = vpow2.f32 %v4563_v25 }
 0x9c4   :  { %v6036_v14 = vpop.eup %6035 }
 0x9c5   :  { %1837 = vrot.lane.b32.xlu1 %v6036_v14, %s6256_s27 }
 0x9c6   :  { %v6038_v43 = vpop.eup %6037 }
 0x9c7   :  { %v1831_v44 = vadd.f32 1.0, %v6038_v43 }
 0x9c9   :  { %6039 = vrcp.f32 %v1831_v44 }
 0x9d3   :  { %v6040_v45 = vpop.eup %6039 }
 0x9d4   :  { %v1835_v11 = vmul.f32 %v6040_v45, %v1672_v30 }
 0xa37   :  { %v1838_v29 = vpop.permute.xlu1 %1837 }
 0xa38   :  { %v1840_v47 = vmul.f32 %v6040_v45, %v1838_v29 }
 0xa3a   :  { %1842 = vrot.lane.b32.xlu0 %v1840_v47, %s6257_s3 }
 0xaac   :  { %v1843_v48 = vpop.permute.xlu0 %1842 }
 0xaad   :  { %v1845_v32 = vadd.f32 %v1843_v48, %v1835_v11 }
 0xaaf   :  { %6041 = vtanh.f32 %v1845_v32 }
 0xab9   :  { %v6042_v50 = vpop.eup %6041 }
 0xaba   :  { %1848 = vrot.lane.b32.xlu1 %v6042_v50, %s6256_s27 }
 0xb2c   :  { %v1849_v51 = vpop.permute.xlu1 %1848 }
 0xb2d   :  { %v1851_v52 = vmul.f32 %v6040_v45, %v1849_v51 }
 0xb2f   :  { %1853 = vrot.lane.b32.xlu0 %v1851_v52, %s6257_s3 }
 0xba1   :  { %v1854_v35 = vpop.permute.xlu0 %1853 }
 0xba2   :  { %5212 = vmatmul.mubr.msk.f32.vlgmr.msra.gmra.mrb[66].mxu0 %vm1325_vm7, %v1854_v35 }
 0xba3   :  { %5772 = vmatpush3.bf16.msra.mxu0 %v6803_v10  ;;  %5233 = vmatprep.mubr.msk.f32.mxu0 %vm6254_vm2, %v6253_v16 }
 0xba4   :  { %5773 = vmatprep.subr.bf16.mxu0 %v6255_v12 }
 0xba7   :  { %5775 = vmatpush3.bf16.msra.mxu0 %v6935_v21 }
 0xba8   :  { %5782 = vmatprep.subr.bf16.mxu0 %v6255_v12 }
 0xc75   :  { %v1923_v54 = vpop.f32.mrb[66].mxu0 }
 0xc76   :  { %v1997_v55 = vadd.f32 %v7048_v60, %v1923_v54  ;;  %v5213_v39 = vpop.f32.mrb[67].mxu0 }
 0xc78   :  { %v2000_v57 = vadd.f32 %v6979_v37, %v1997_v55 }
 0xc7a   :  { %6043 = vtanh.f32 %v2000_v57  ;;  %v4566_v59 = vmul.f32 -1.442695, %v2000_v57 }
 0xc7c   :  { %6045 = vpow2.f32 %v4566_v59 }
 0xc84   :  { %v6044_v58 = vpop.eup %6043 }
 0xc85   :  { %2010 = vrot.lane.b32.xlu1 %v6044_v58, %s6256_s27 }
 0xc86   :  { %v6046_v42 = vpop.eup %6045 }
 0xc87   :  { %v2004_v61 = vadd.f32 1.0, %v6046_v42 }
 0xc89   :  { %6047 = vrcp.f32 %v2004_v61 }
 0xc93   :  { %v6048_v62 = vpop.eup %6047 }
 0xc94   :  { %v2008_v1 = vmul.f32 %v6048_v62, %v1845_v32 }
 0xcf7   :  { %v2011_v46 = vpop.permute.xlu1 %2010 }
 0xcf8   :  { %v2013_v0 = vmul.f32 %v6048_v62, %v2011_v46 }
 0xcfa   :  { %2015 = vrot.lane.b32.xlu0 %v2013_v0, %s6257_s3 }
 0xd6c   :  { %v2016_v2 = vpop.permute.xlu0 %2015 }
 0xd6d   :  { %v2018_v49 = vadd.f32 %v2016_v2, %v2008_v1 }
 0xd6f   :  { %6049 = vtanh.f32 %v2018_v49 }
 0xd79   :  { %v6050_v4 = vpop.eup %6049 }
 0xd7a   :  { %2021 = vrot.lane.b32.xlu1 %v6050_v4, %s6256_s27 }
 0xdec   :  { %v2022_v53 = vpop.permute.xlu1 %2021 }
 0xded   :  { %v2024_v5 = vmul.f32 %v6048_v62, %v2022_v53 }
 0xdef   :  { %2026 = vrot.lane.b32.xlu0 %v2024_v5, %s6257_s3 }
 0xe61   :  { %v2027_v60 = vpop.permute.xlu0 %2026 }
 0xe62   :  { %5234 = vmatmul.mubr.msk.f32.vlgmr.msra.gmra.mrb[68].mxu0 %vm1325_vm7, %v2027_v60 }
 0xe63   :  { %5784 = vmatpush3.bf16.msra.mxu0 %v6803_v10  ;;  %5255 = vmatprep.mubr.msk.f32.mxu0 %vm6254_vm2, %v6253_v16 }
 0xe64   :  { %5785 = vmatprep.subr.bf16.mxu0 %v6255_v12 }
 0xe67   :  { %5787 = vmatpush3.bf16.msra.mxu0 %v6935_v21 }
 0xe68   :  { %5794 = vmatprep.subr.bf16.mxu0 %v6255_v12 }
 0xf35   :  { %v2096_v3 = vpop.f32.mrb[68].mxu0 }
 0xf36   :  { %v2170_v23 = vadd.f32 %v7050_v7, %v2096_v3  ;;  %v5235_v56 = vpop.f32.mrb[69].mxu0 }
 0xf38   :  { %v2173_v15 = vadd.f32 %v6979_v37, %v2170_v23 }
 0xf3a   :  { %6051 = vtanh.f32 %v2173_v15  ;;  %v4569_v63 = vmul.f32 -1.442695, %v2173_v15 }
 0xf3c   :  { %6053 = vpow2.f32 %v4569_v63 }
 0xf44   :  { %v6052_v20 = vpop.eup %6051 }
 0xf45   :  { %2183 = vrot.lane.b32.xlu1 %v6052_v20, %s6256_s27 }
 0xf46   :  { %v6054_v9 = vpop.eup %6053 }
 0xf47   :  { %v2177_v22 = vadd.f32 1.0, %v6054_v9 }
 0xf49   :  { %6055 = vrcp.f32 %v2177_v22 }
 0xf53   :  { %v6056_v24 = vpop.eup %6055 }
 0xf54   :  { %v2181_v27 = vmul.f32 %v6056_v24, %v2018_v49 }
 0xfb7   :  { %v2184_v26 = vpop.permute.xlu1 %2183 }
 0xfb8   :  { %v2186_v6 = vmul.f32 %v6056_v24, %v2184_v26  ;;  %v1059_v26 = vld [vmem:[%s7638_s13] sm:$0xff] }
 0xfba   :  { %2188 = vrot.lane.b32.xlu0 %v2186_v6, %s6257_s3 }
0x102c   :  { %v2189_v28 = vpop.permute.xlu0 %2188 }
0x102d   :  { %v2191_v7 = vadd.f32 %v2189_v28, %v2181_v27  ;;  %v1060_v27 = vld [vmem:[%s7638_s13 + $0x8] sm:$0xff]  ;;  %v1057_v28 = vld [vmem:[%s7637_s12 + $0x10] sm:$0xff] }
0x102f   :  { %6057 = vtanh.f32 %v2191_v7 }
0x1039   :  { %v6058_v30 = vpop.eup %6057 }
0x103a   :  { %2194 = vrot.lane.b32.xlu1 %v6058_v30, %s6256_s27  ;;  %v7153_v30 = vpack.c.bf16 %v1060_v27, %v1059_v26  ;;  %v1085_v26 = vld [vmem:[%s7642_s17 + $0x28] sm:$0xff] }
0x10ac   :  { %v2195_v31 = vpop.permute.xlu1 %2194 }
0x10ad   :  { %v2197_v17 = vmul.f32 %v6056_v24, %v2195_v31  ;;  %v1056_v24 = vld [vmem:[%s7637_s12 + $0x8] sm:$0xff]  ;;  %v1061_v31 = vld [vmem:[%s7638_s13 + $0x10] sm:$0xff] }
0x10af   :  { %2199 = vrot.lane.b32.xlu0 %v2197_v17, %s6257_s3  ;;  %v1062_v17 = vld [vmem:[%s7638_s13 + $0x18] sm:$0xff] }
0x1121   :  { %v2200_v33 = vpop.permute.xlu0 %2199 }
0x1122   :  { %5256 = vmatmul.mubr.msk.f32.vlgmr.msra.gmra.mrb[70].mxu0 %vm1325_vm7, %v2200_v33 }
0x1123   :  { %5796 = vmatpush3.bf16.msra.mxu0 %v6803_v10  ;;  %5277 = vmatprep.mubr.msk.f32.mxu0 %vm6254_vm2, %v6253_v16 }
0x1124   :  { %5797 = vmatprep.subr.bf16.mxu0 %v6255_v12 }
0x1127   :  { %5799 = vmatpush3.bf16.msra.mxu0 %v6935_v21 }
0x1128   :  { %5806 = vmatprep.subr.bf16.mxu0 %v6255_v12 }
0x11f5   :  { %v2269_v34 = vpop.f32.mrb[70].mxu0 }
0x11f6   :  { %v2343_v36 = vadd.f32 %v7052_v8, %v2269_v34  ;;  %v5257_v38 = vpop.f32.mrb[71].mxu0  ;;  %v7166_v34 = vpack.c.bf16 %v1062_v17, %v1061_v31  ;;  %v1088_v17 = vld [vmem:[%s7642_s17 + $0x40] sm:$0xff] }
0x11f8   :  { %v2346_v40 = vadd.f32 %v6979_v37, %v2343_v36  ;;  %v2717_v36 = vld [vmem:[%s7636_s11] sm:$0x3] }
0x11fa   :  { %6059 = vtanh.f32 %v2346_v40  ;;  %v4572_v14 = vmul.f32 -1.442695, %v2346_v40 }
0x11fc   :  { %6061 = vpow2.f32 %v4572_v14 }
0x1204   :  { %v6060_v41 = vpop.eup %6059 }
0x1205   :  { %2356 = vrot.lane.b32.xlu1 %v6060_v41, %s6256_s27 }
0x1206   :  { %v6062_v25 = vpop.eup %6061 }
0x1207   :  { %v2350_v43 = vadd.f32 1.0, %v6062_v25 }
0x1209   :  { %6063 = vrcp.f32 %v2350_v43 }
0x1213   :  { %v6064_v44 = vpop.eup %6063 }
0x1214   :  { %v2354_v47 = vmul.f32 %v6064_v44, %v2191_v7  ;;  %v1058_v7 = vld [vmem:[%s7637_s12 + $0x18] sm:$0xff] }
0x1215   :  { %v7162_v33 = vpack.c.bf16 %v1058_v7, %v1057_v28  ;;  %v1086_v28 = vld [vmem:[%s7642_s17 + $0x30] sm:$0xff]  ;;  %v1087_v7 = vld [vmem:[%s7642_s17 + $0x38] sm:$0xff] }
0x1216   :  { %v7284_v31 = vpack.c.bf16 %v1087_v7, %v1086_v28 }
0x1277   :  { %v2357_v45 = vpop.permute.xlu1 %2356 }
0x1278   :  { %v2359_v29 = vmul.f32 %v6064_v44, %v2357_v45 }
0x127a   :  { %2361 = vrot.lane.b32.xlu0 %v2359_v29, %s6257_s3 }
0x12ec   :  { %v2362_v11 = vpop.permute.xlu0 %2361 }
0x12ed   :  { %v2364_v8 = vadd.f32 %v2362_v11, %v2354_v47 }
0x12ef   :  { %6065 = vtanh.f32 %v2364_v8 }
0x12f9   :  { %v6066_v48 = vpop.eup %6065 }
0x12fa   :  { %2367 = vrot.lane.b32.xlu1 %v6066_v48, %s6256_s27 }
0x136c   :  { %v2368_v32 = vpop.permute.xlu1 %2367 }
0x136d   :  { %v2370_v50 = vmul.f32 %v6064_v44, %v2368_v32  ;;  %v7187_v44 = vld [vmem:[%s7639_s14] ss:$0 sm:$0xff] }
0x136f   :  { %2372 = vrot.lane.b32.xlu0 %v2370_v50, %s6257_s3 }
0x13e1   :  { %v2373_v51 = vpop.permute.xlu0 %2372 }
0x13e2   :  { %5278 = vmatmul.mubr.msk.f32.vlgmr.msra.gmra.mrb[72].mxu0 %vm1325_vm7, %v2373_v51 }
0x13e3   :  { %5808 = vmatpush3.bf16.msra.mxu0 %v6803_v10  ;;  %5299 = vmatprep.mubr.msk.f32.mxu0 %vm6254_vm2, %v6253_v16 }
0x13e4   :  { %5809 = vmatprep.subr.bf16.mxu0 %v6255_v12 }
0x13e7   :  { %5811 = vmatpush3.bf16.msra.mxu0 %v6935_v21 }
0x13e8   :  { %5818 = vmatprep.subr.bf16.mxu0 %v6255_v12 }
0x14b5   :  { %v2442_v52 = vpop.f32.mrb[72].mxu0 }
0x14b6   :  { %v2516_v35 = vadd.f32 %v7054_v13, %v2442_v52  ;;  %v5279_v54 = vpop.f32.mrb[73].mxu0 }
0x14b8   :  { %v2519_v55 = vadd.f32 %v6979_v37, %v2516_v35 }
0x14ba   :  { %6067 = vtanh.f32 %v2519_v55  ;;  %v4575_v10 = vmul.f32 -1.442695, %v2519_v55 }
0x14bc   :  { %6069 = vpow2.f32 %v4575_v10  ;;  %v1096_v10 = vld [vmem:[%s7640_s15] sm:$0xff] }
0x14c4   :  { %v6068_v39 = vpop.eup %6067 }
0x14c5   :  { %2529 = vrot.lane.b32.xlu1 %v6068_v39, %s6256_s27 }
0x14c6   :  { %v6070_v57 = vpop.eup %6069 }
0x14c7   :  { %v2523_v58 = vadd.f32 1.0, %v6070_v57  ;;  %v1097_v57 = vld [vmem:[%s7640_s15 + $0x8] sm:$0xff] }
0x14c9   :  { %6071 = vrcp.f32 %v2523_v58  ;;  %v1098_v58 = vld [vmem:[%s7640_s15 + $0x10] sm:$0xff] }
0x14d3   :  { %v6072_v59 = vpop.eup %6071 }
0x14d4   :  { %v2527_v61 = vmul.f32 %v6072_v59, %v2364_v8 }
0x1537   :  { %v2530_v42 = vpop.permute.xlu1 %2529 }
0x1538   :  { %v2532_v21 = vmul.f32 %v6072_v59, %v2530_v42  ;;  %v1099_v42 = vld [vmem:[%s7640_s15 + $0x18] sm:$0xff] }
0x153a   :  { %2534 = vrot.lane.b32.xlu0 %v2532_v21, %s6257_s3  ;;  %v7210_v21 = vpack.c.bf16 %v1099_v42, %v1098_v58 }
0x15ac   :  { %v2535_v62 = vpop.permute.xlu0 %2534 }
0x15ad   :  { %v2537_v13 = vadd.f32 %v2535_v62, %v2527_v61 }
0x15af   :  { %6073 = vtanh.f32 %v2537_v13 }
0x15b9   :  { %v6074_v46 = vpop.eup %6073 }
0x15ba   :  { %2540 = vrot.lane.b32.xlu1 %v6074_v46, %s6256_s27 }
0x162c   :  { %v2541_v0 = vpop.permute.xlu1 %2540 }
0x162d   :  { %v2543_v1 = vmul.f32 %v6072_v59, %v2541_v0  ;;  %v7204_v59 = vpack.c.bf16 %v1097_v57, %v1096_v10  ;;  %v7234_v0 = vld [vmem:[%s7641_s16] ss:$0 sm:$0xff]  ;;  %v6258_v10 = vmov 1.0  }
0x162f   :  { %2545 = vrot.lane.b32.xlu0 %v2543_v1, %s6257_s3 }
0x16a1   :  { %v2546_v2 = vpop.permute.xlu0 %2545 }
0x16a2   :  { %5300 = vmatmul.mubr.msk.f32.vlgmr.msra.gmra.mrb[74].mxu0 %vm1325_vm7, %v2546_v2 }
0x16a3   :  { %5321 = vmatprep.mubr.msk.f32.mxu0 %vm6254_vm2, %v6253_v16  ;;  %5820 = vmatpush3.bf16.msra.mxu0 %v7153_v30 }
0x16a4   :  { %5821 = vmatprep.subr.bf16.mxu0 %v6255_v12 }
0x16a7   :  { %5823 = vmatpush3.bf16.msra.mxu0 %v7166_v34 }
0x16a8   :  { %5830 = vmatprep.subr.bf16.mxu0 %v6255_v12 }
0x1775   :  { %v2615_v49 = vpop.f32.mrb[74].mxu0 }
0x1776   :  { %v2689_v4 = vadd.f32 %v7056_v19, %v2615_v49  ;;  %v5301_v53 = vpop.f32.mrb[75].mxu0 }
0x1778   :  { %v2692_v5 = vadd.f32 %v6979_v37, %v2689_v4  ;;  %v1055_v37 = vld [vmem:[%s7637_s12] sm:$0xff]  ;;  %s4451_s12 = sshll.u32 %s6261_s2, 4  ;;  %s4452_s12 = int_to_ptr.vmem [resolvable:$true] %s4451_s12 }
0x1779   :  { %v7142_v6 = vpack.c.bf16 %v1056_v24, %v1055_v37  ;;  %v1084_v24 = vld [vmem:[%s7642_s17 + $0x20] sm:$0xff]  ;;  %s6155_s6 = scalar_lea.vmem %s4452_s12, 32  ;;  %p6160_p6 = scmp.lt.s32.totalorder %s4452_s12, %s4452_s12 }
0x177a   :  { %6075 = vtanh.f32 %v2692_v5  ;;  %v4578_v3 = vmul.f32 -1.442695, %v2692_v5  ;;  %v7274_v27 = vpack.c.bf16 %v1085_v26, %v1084_v24  ;;  %p6156_p5 = scmp.ne.s32.totalorder %s4452_s12, %s6155_s6  ;;  %p6161_p7 = scmp.lt.s32.totalorder %s6155_s6, %s6155_s6 }
0x177b   :  { %5826 = vmatpush3.bf16.msra.mxu1 %v7142_v6 }
0x177c   :  { %6077 = vpow2.f32 %v4578_v3  ;;  %5827 = vmatprep.subr.bf16.mxu1 %v6255_v12  ;;  %p6162_p8 = por %p6161_p7, %p6160_p6 }
0x177e   :  { %p6163_p9 = pnand %p6162_p8, %p6156_p5 }
0x177f   :  { %5829 = vmatpush3.bf16.msra.mxu1 %v7162_v33 }
0x1780   :  { %5836 = vmatprep.subr.bf16.mxu1 %v6255_v12 }
0x1782   :  { %5333 = vmatmul.mubr.msk.f32.vlgmr.msra.gmra.mrb[28].mxu1 %vm1325_vm7, %v2717_v36  ;;  %v1089_v36 = vld [vmem:[%s7642_s17 + $0x48] sm:$0xff] }
0x1783   :  { %5378 = vmatprep.mubr.msk.f32.mxu1 %vm6254_vm2, %v6253_v16 }
0x1784   :  { %v6076_v60 = vpop.eup %6075 }
0x1785   :  { %2702 = vrot.lane.b32.xlu1 %v6076_v60, %s6256_s27 }
0x1786   :  { %v6078_v23 = vpop.eup %6077 }
0x1787   :  { %v2696_v56 = vadd.f32 1.0, %v6078_v23 }
0x1789   :  { %6079 = vrcp.f32 %v2696_v56 }
0x1793   :  { %v6080_v15 = vpop.eup %6079 }
0x1794   :  { %v2700_v9 = vmul.f32 %v6080_v15, %v2537_v13 }
0x17f7   :  { %v2703_v20 = vpop.permute.xlu1 %2702 }
0x17f8   :  { %v2705_v63 = vmul.f32 %v6080_v15, %v2703_v20  ;;  %v1080_v20 = vld [vmem:[%s7642_s17] sm:$0xff] }
0x17fa   :  { %2707 = vrot.lane.b32.xlu0 %v2705_v63, %s6257_s3  ;;  %v1081_v63 = vld [vmem:[%s7642_s17 + $0x8] sm:$0xff] }
0x1855   :  { %v2862_v14 = vpop.f32.mrb[28].mxu1 }
0x1856   :  { %v5334_v25 = vpop.f32.mrb[29].mxu1 }
0x1857   :  { %v1092_v25 = vld [vmem:[%s7642_s17 + $0x60] sm:$0xff] }
0x186c   :  { %v2708_v22 = vpop.permute.xlu0 %2707 }
0x186d   :  { %v2710_v19 = vadd.f32 %v2708_v22, %v2700_v9  ;;  %v1082_v9 = vld [vmem:[%s7642_s17 + $0x10] sm:$0xff]  ;;  %v7258_v22 = vpack.c.bf16 %v1081_v63, %v1080_v20 }
0x186f   :  { %6081 = vtanh.f32 %v2710_v19  ;;  %5838 = vmatpush3.bf16.msra.mxu1 %v7258_v22 }
0x1870   :  { %5839 = vmatprep.subr.bf16.mxu1 %v6255_v12 }
0x1879   :  { %v6082_v38 = vpop.eup %6081 }
0x187a   :  { %2713 = vrot.lane.b32.xlu1 %v6082_v38, %s6256_s27  ;;  %v7294_v38 = vpack.c.bf16 %v1089_v36, %v1088_v17 }
0x18ec   :  { %v2714_v40 = vpop.permute.xlu1 %2713 }
0x18ed   :  { %v2716_v41 = vmul.f32 %v6080_v15, %v2714_v40  ;;  %v1090_v40 = vld [vmem:[%s7642_s17 + $0x50] sm:$0xff] }
0x18ef   :  { %2719 = vrot.lane.b32.xlu0 %v2716_v41, %s6257_s3  ;;  %v1091_v41 = vld [vmem:[%s7642_s17 + $0x58] sm:$0xff] }
0x1961   :  { %v2720_v43 = vpop.permute.xlu0 %2719 }
0x1962   :  { %5322 = vmatmul.mubr.msk.f32.vlgmr.msra.gmra.mrb[76].mxu0 %vm1325_vm7, %v2720_v43  ;;  %v1093_v43 = vld [vmem:[%s7642_s17 + $0x68] sm:$0xff] }
0x1963   :  { %5343 = vmatprep.mubr.msk.f32.mxu0 %vm6254_vm2, %v6253_v16  ;;  %5832 = vmatpush3.bf16.msra.mxu0 %v7204_v59 }
0x1964   :  { %5833 = vmatprep.subr.bf16.mxu0 %v6255_v12 }
0x1967   :  { %5835 = vmatpush3.bf16.msra.mxu0 %v7210_v21 }
0x1968   :  { %5860 = vmatprep.subr.bf16.mxu0 %v6255_v12 }
0x1a35   :  { %v2789_v45 = vpop.f32.mrb[76].mxu0 }
0x1a36   :  { %v2863_v29 = vadd.f32 %v2862_v14, %v2789_v45  ;;  %v5323_v47 = vpop.f32.mrb[77].mxu0  ;;  %v7304_v14 = vpack.c.bf16 %v1091_v41, %v1090_v40  ;;  %v7314_v45 = vpack.c.bf16 %v1093_v43, %v1092_v25 }
0x1a38   :  { %v2872_v11 = vadd.f32 %v7187_v44, %v2863_v29 }
0x1a3a   :  { %6083 = vtanh.f32 %v2872_v11  ;;  %v4582_v48 = vmul.f32 -1.442695, %v2872_v11 }
0x1a3c   :  { %6085 = vpow2.f32 %v4582_v48  ;;  %v1094_v48 = vld [vmem:[%s7642_s17 + $0x70] sm:$0xff] }
0x1a44   :  { %v6084_v8 = vpop.eup %6083 }
0x1a45   :  { %2882 = vrot.lane.b32.xlu1 %v6084_v8, %s6256_s27 }
0x1a46   :  { %v6086_v32 = vpop.eup %6085 }
0x1a47   :  { %v2876_v50 = vadd.f32 1.0, %v6086_v32  ;;  %v1095_v32 = vld [vmem:[%s7642_s17 + $0x78] sm:$0xff] }
0x1a49   :  { %6087 = vrcp.f32 %v2876_v50  ;;  %v7325_v50 = vpack.c.bf16 %v1095_v32, %v1094_v48 }
0x1a53   :  { %v6088_v51 = vpop.eup %6087 }
0x1a54   :  { %v2880_v54 = vmul.f32 %v6088_v51, %v2710_v19  ;;  %v1083_v19 = vld [vmem:[%s7642_s17 + $0x18] sm:$0xff]  ;;  %s6259_s17 = smov 96  }
0x1a55   :  { %v7264_v37 = vpack.c.bf16 %v1083_v19, %v1082_v9 }
0x1a57   :  { %5841 = vmatpush3.bf16.msra.mxu1 %v7264_v37 }
0x1a58   :  { %5842 = vmatprep.subr.bf16.mxu1 %v6255_v12 }
0x1a5b   :  { %5844 = vmatpush3.bf16.msra.mxu1 %v7274_v27 }
0x1a5c   :  { %5845 = vmatprep.subr.bf16.mxu1 %v6255_v12 }
0x1a5f   :  { %5847 = vmatpush3.bf16.msra.mxu1 %v7284_v31 }
0x1a60   :  { %5848 = vmatprep.subr.bf16.mxu1 %v6255_v12 }
0x1a63   :  { %5850 = vmatpush3.bf16.msra.mxu1 %v7294_v38 }
0x1a64   :  { %5851 = vmatprep.subr.bf16.mxu1 %v6255_v12 }
0x1a67   :  { %5853 = vmatpush3.bf16.msra.mxu1 %v7304_v14 }
0x1a68   :  { %5854 = vmatprep.subr.bf16.mxu1 %v6255_v12 }
0x1a6b   :  { %5856 = vmatpush3.bf16.msra.mxu1 %v7314_v45 }
0x1a6c   :  { %5857 = vmatprep.subr.bf16.mxu1 %v6255_v12 }
0x1a6f   :  { %5859 = vmatpush3.bf16.msra.mxu1 %v7325_v50 }
0x1a70   :  { %5902 = vmatprep.subr.bf16.mxu1 %v6255_v12 }
0x1ab7   :  { %v2883_v52 = vpop.permute.xlu1 %2882 }
0x1ab8   :  { %v2885_v35 = vmul.f32 %v6088_v51, %v2883_v52 }
0x1aba   :  { %2887 = vrot.lane.b32.xlu0 %v2885_v35, %s6257_s3 }
0x1b2c   :  { %v2888_v55 = vpop.permute.xlu0 %2887 }
0x1b2d   :  { %v7192_v39 = vadd.f32 %v2888_v55, %v2880_v54 }
0x1b2f   :  { %6089 = vtanh.f32 %v7192_v39 }
0x1b39   :  { %v6090_v61 = vpop.eup %6089 }
0x1b3a   :  { %2893 = vrot.lane.b32.xlu1 %v6090_v61, %s6256_s27 }
0x1bac   :  { %v2894_v62 = vpop.permute.xlu1 %2893 }
0x1bad   :  { %v2896_v13 = vmul.f32 %v6088_v51, %v2894_v62 }
0x1baf   :  { %2904 = vrot.lane.b32.xlu0 %v2896_v13, %s6257_s3 }
0x1c21   :  { %v2905_v46 = vpop.permute.xlu0 %2904 }
0x1c22   :  { %5344 = vmatmul.mubr.msk.f32.vlgmr.msra.gmra.mrb[78].mxu0 %vm1325_vm7, %v2905_v46 }
0x1c23   :  { %5862 = vmatpush3.bf16.msra.mxu0 %v7153_v30  ;;  %5389 = vmatprep.mubr.msk.f32.mxu0 %vm6254_vm2, %v6253_v16 }
0x1c24   :  { %5863 = vmatprep.subr.bf16.mxu0 %v6255_v12 }
0x1c27   :  { %5865 = vmatpush3.bf16.msra.mxu0 %v7166_v34 }
0x1c28   :  { %5866 = vmatprep.subr.bf16.mxu0 %v6255_v12 }
0x1c2a   :  { %5390 = vmatmul.mubr.msk.f32.vlgmr.msra.gmra.mrb[80].mxu0 %vm1325_vm7, %v2905_v46 }
0x1c2b   :  { %5868 = vmatpush3.bf16.msra.mxu0 %v7142_v6  ;;  %5400 = vmatprep.mubr.msk.f32.mxu0 %vm6254_vm2, %v6253_v16 }
0x1c2c   :  { %5869 = vmatprep.subr.bf16.mxu0 %v6255_v12 }
0x1c2f   :  { %5871 = vmatpush3.bf16.msra.mxu0 %v7162_v33 }
0x1c30   :  { %5872 = vmatprep.subr.bf16.mxu0 %v6255_v12 }
0x1cf5   :  { %v2974_v1 = vpop.f32.mrb[78].mxu0 }
0x1cf6   :  { %v7237_v2 = vadd.f32 %v7234_v0, %v2974_v1  ;;  %v5345_v49 = vpop.f32.mrb[79].mxu0 }
0x1cf8   :  { %v2979_v4 = vsel %vm2978_vm8, %v7237_v2, -inf }
0x1cf9   :  { %2980 = vmax.xlane.f32.xlu1 %v2979_v4 }
0x1cfd   :  { %v7241_v53 = vpop.f32.mrb[80].mxu0 }
0x1cfe   :  { %v5391_v5 = vpop.f32.mrb[81].mxu0 }
0x1d86   :  { %v7243_v60 = vpop.xlane.xlu1 %2980 }
0x1d87   :  { %vm2991_vm9 = vcmp.eq.f32.partialorder %v7237_v2, %v7243_v60 }
0x1d88   :  { %v2992_v3 = vsel %vm2991_vm9, %v6809_v18, 128 }
0x1d89   :  { %v2993_v23 = vsel %vm2978_vm8, %v2992_v3, 2147483647 }
0x1d8a   :  { %v2995_v56 = vshra.s32 %v2993_v23, 16  ;;  %v2994_v29 = vand.u32 65535, %v2993_v23 }
0x1d8c   :  { %v2997_v15 = vcvt.s32.f32 %v2995_v56  ;;  %v2996_v11 = vcvt.s32.f32 %v2994_v29 }
0x1d8e   :  { %2998 = vmin.xlane.f32.xlu0 %v2997_v15 }
0x1e1b   :  { %v2999_v47 = vpop.xlane.xlu0 %2998 }
0x1e1c   :  { %vm3000_vm10 = vcmp.eq.f32.partialorder %v2997_v15, %v2999_v47  ;;  %v3005_v51 = vcvt.f32.s32 %v2999_v47 }
0x1e1d   :  { %v3001_v8 = vsel %vm3000_vm10, %v2996_v11, inf  ;;  %vm4049_vm10 = vcmp.eq.s32.totalorder %v6809_v18, 3 }
0x1e1e   :  { %3002 = vmin.xlane.f32.xlu0 %v3001_v8  ;;  %v3006_v35 = vshll.u32 %v3005_v51, 16 }
0x1eab   :  { %v3003_v52 = vpop.xlane.xlu0 %3002 }
0x1eac   :  { %v3004_v54 = vcvt.f32.s32 %v3003_v52 }
0x1eae   :  { %v7329_v55 = vadd.s32 %v3006_v35, %v3004_v54 }
0x1eb0   :  { %vm3010_vm11 = vcmp.eq.s32.totalorder %v6809_v18, %v7329_v55  ;;  %v3009_v54 = vsel %vm3008_vm14, %v7329_v55, 0 }
0x1eb1   :  { %5379 = vmatmul.mubr.msk.f32.vlgmr.msra.gmra.mrb[30].mxu1 %vm3010_vm11, %v6258_v10 }
0x1eb2   :  { %5904 = vmatpush3.bf16.msra.mxu1 %v7153_v30  ;;  %5457 = vmatprep.mubr.msk.f32.mxu1 %vm6254_vm2, %v6253_v16 }
0x1eb3   :  { %5905 = vmatprep.subr.bf16.mxu1 %v6255_v12 }
0x1eb6   :  { %5907 = vmatpush3.bf16.msra.mxu1 %v7166_v34 }
0x1eb7   :  { %5908 = vmatprep.subr.bf16.mxu1 %v6255_v12 }
0x1f84   :  { %v3079_v57 = vpop.f32.mrb[30].mxu1 }
0x1f85   :  { %v5380_v58 = vpop.f32.mrb[31].mxu1  ;;  %5401 = vmatmul.mubr.msk.f32.vlgmr.msra.gmra.mrb[82].mxu0 %vm1325_vm7, %v3079_v57 }
0x1f86   :  { %5874 = vmatpush3.bf16.msra.mxu0 %v7204_v59  ;;  %5411 = vmatprep.mubr.msk.f32.mxu0 %vm6254_vm2, %v6253_v16 }
0x1f87   :  { %5875 = vmatprep.subr.bf16.mxu0 %v6255_v12 }
0x1f8a   :  { %5877 = vmatpush3.bf16.msra.mxu0 %v7210_v21 }
0x1f8b   :  { %5878 = vmatprep.subr.bf16.mxu0 %v6255_v12 }
0x2058   :  { %v3222_v42 = vpop.f32.mrb[82].mxu0 }
0x2059   :  { %v3223_v61 = vadd.f32 %v3222_v42, %v7241_v53  ;;  %v5402_v62 = vpop.f32.mrb[83].mxu0 }
0x205b   :  { %v3226_v13 = vadd.f32 %v7187_v44, %v3223_v61 }
0x205d   :  { %6091 = vtanh.f32 %v3226_v13  ;;  %v4589_v1 = vmul.f32 -1.442695, %v3226_v13 }
0x205f   :  { %6093 = vpow2.f32 %v4589_v1 }
0x2067   :  { %v6092_v46 = vpop.eup %6091 }
0x2068   :  { %3236 = vrot.lane.b32.xlu1 %v6092_v46, %s6256_s27 }
0x2069   :  { %v6094_v49 = vpop.eup %6093 }
0x206a   :  { %v3230_v4 = vadd.f32 1.0, %v6094_v49 }
0x206c   :  { %6095 = vrcp.f32 %v3230_v4 }
0x2076   :  { %v6096_v5 = vpop.eup %6095 }
0x2077   :  { %v3234_v56 = vmul.f32 %v6096_v5, %v7192_v39 }
0x20da   :  { %v3237_v3 = vpop.permute.xlu1 %3236 }
0x20db   :  { %v3239_v23 = vmul.f32 %v6096_v5, %v3237_v3 }
0x20dd   :  { %3241 = vrot.lane.b32.xlu0 %v3239_v23, %s6257_s3 }
0x214f   :  { %v3242_v53 = vpop.permute.xlu0 %3241 }
0x2150   :  { %v7352_v15 = vadd.f32 %v3242_v53, %v3234_v56 }
0x2152   :  { %6097 = vtanh.f32 %v7352_v15 }
0x215c   :  { %v6098_v20 = vpop.eup %6097 }
0x215d   :  { %3247 = vrot.lane.b32.xlu1 %v6098_v20, %s6256_s27 }
0x21cf   :  { %v3248_v63 = vpop.permute.xlu1 %3247 }
0x21d0   :  { %v3250_v9 = vmul.f32 %v6096_v5, %v3248_v63 }
0x21d2   :  { %3252 = vrot.lane.b32.xlu1 %v3250_v9, %s6257_s3 }
0x2244   :  { %v3253_v19 = vpop.permute.xlu1 %3252 }
0x2245   :  { %5412 = vmatmul.mubr.msk.f32.vlgmr.msra.gmra.mrb[84].mxu0 %vm1325_vm7, %v3253_v19  ;;  %5458 = vmatmul.mubr.msk.f32.vlgmr.msra.gmra.mrb[32].mxu1 %vm1325_vm7, %v3253_v19 }
0x2246   :  { %5880 = vmatpush3.bf16.msra.mxu0 %v7258_v22  ;;  %5446 = vmatprep.mubr.msk.f32.mxu0 %vm6254_vm2, %v6253_v16 }
0x2247   :  { %5881 = vmatprep.subr.bf16.mxu0 %v6255_v12  ;;  %5910 = vmatpush3.bf16.msra.mxu1 %v7142_v6 }
0x2248   :  { %5911 = vmatprep.subr.bf16.mxu1 %v6255_v12  ;;  %5468 = vmatprep.mubr.msk.f32.mxu1 %vm6254_vm2, %v6253_v16 }
0x224a   :  { %5883 = vmatpush3.bf16.msra.mxu0 %v7264_v37 }
0x224b   :  { %5884 = vmatprep.subr.bf16.mxu0 %v6255_v12  ;;  %5913 = vmatpush3.bf16.msra.mxu1 %v7162_v33 }
0x224c   :  { %5914 = vmatprep.subr.bf16.mxu1 %v6255_v12 }
0x224e   :  { %5886 = vmatpush3.bf16.msra.mxu0 %v7274_v27 }
0x224f   :  { %5887 = vmatprep.subr.bf16.mxu0 %v6255_v12 }
0x2252   :  { %5889 = vmatpush3.bf16.msra.mxu0 %v7284_v31 }
0x2253   :  { %5890 = vmatprep.subr.bf16.mxu0 %v6255_v12 }
0x2256   :  { %5892 = vmatpush3.bf16.msra.mxu0 %v7294_v38 }
0x2257   :  { %5893 = vmatprep.subr.bf16.mxu0 %v6255_v12 }
0x225a   :  { %5895 = vmatpush3.bf16.msra.mxu0 %v7304_v14 }
0x225b   :  { %5896 = vmatprep.subr.bf16.mxu0 %v6255_v12 }
0x225e   :  { %5898 = vmatpush3.bf16.msra.mxu0 %v7314_v45 }
0x225f   :  { %5899 = vmatprep.subr.bf16.mxu0 %v6255_v12 }
0x2262   :  { %5901 = vmatpush3.bf16.msra.mxu0 %v7325_v50 }
0x2263   :  { %5944 = vmatprep.subr.bf16.mxu0 %v6255_v12 }
0x2318   :  { %v3322_v39 = vpop.f32.mrb[84].mxu0  ;;  %v3496_v24 = vpop.f32.mrb[32].mxu1 }
0x2319   :  { %v7384_v26 = vadd.f32 %v7234_v0, %v3322_v39  ;;  %v5413_v28 = vpop.f32.mrb[85].mxu0  ;;  %v5459_v7 = vpop.f32.mrb[33].mxu1 }
0x231b   :  { %v3326_v17 = vsel %vm2978_vm8, %v7384_v26, -inf }
0x231c   :  { %3327 = vmax.xlane.f32.xlu0 %v3326_v17 }
0x23a9   :  { %v7388_v36 = vpop.xlane.xlu0 %3327 }
0x23aa   :  { %vm3338_vm12 = vcmp.eq.f32.partialorder %v7384_v26, %v7388_v36 }
0x23ab   :  { %v3339_v40 = vsel %vm3338_vm12, %v6809_v18, 128 }
0x23ac   :  { %v3340_v41 = vsel %vm2978_vm8, %v3339_v40, 2147483647 }
0x23ad   :  { %v3342_v25 = vshra.s32 %v3340_v41, 16  ;;  %v3341_v29 = vand.u32 65535, %v3340_v41 }
0x23af   :  { %v3344_v43 = vcvt.s32.f32 %v3342_v25  ;;  %v3343_v11 = vcvt.s32.f32 %v3341_v29 }
0x23b1   :  { %3345 = vmin.xlane.f32.xlu1 %v3344_v43 }
0x243e   :  { %v3346_v47 = vpop.xlane.xlu1 %3345 }
0x243f   :  { %vm3347_vm13 = vcmp.eq.f32.partialorder %v3344_v43, %v3346_v47  ;;  %v3352_v48 = vcvt.f32.s32 %v3346_v47 }
0x2440   :  { %v3348_v8 = vsel %vm3347_vm13, %v3343_v11, inf }
0x2441   :  { %3349 = vmin.xlane.f32.xlu0 %v3348_v8  ;;  %v3353_v51 = vshll.u32 %v3352_v48, 16 }
0x24ce   :  { %v3350_v32 = vpop.xlane.xlu0 %3349 }
0x24cf   :  { %v3351_v52 = vcvt.f32.s32 %v3350_v32 }
0x24d1   :  { %v3354_v35 = vadd.s32 %v3353_v51, %v3351_v52 }
0x24d3   :  { %v7397_v57 = vsel %vm3355_vm15, %v3354_v35, %v3009_v54  ;;  %vm3357_vm0 = vcmp.eq.s32.totalorder %v6809_v18, %v3354_v35 }
0x24d4   :  { %5447 = vmatmul.mubr.msk.f32.vlgmr.msra.gmra.mrb[86].mxu0 %vm3357_vm0, %v6258_v10 }
0x24d5   :  { %5946 = vmatpush3.bf16.msra.mxu0 %v7153_v30  ;;  %5525 = vmatprep.mubr.msk.f32.mxu0 %vm6254_vm2, %v6253_v16 }
0x24d6   :  { %5947 = vmatprep.subr.bf16.mxu0 %v6255_v12 }
0x24d9   :  { %5949 = vmatpush3.bf16.msra.mxu0 %v7166_v34 }
0x24da   :  { %5950 = vmatprep.subr.bf16.mxu0 %v6255_v12 }
0x25a7   :  { %v3426_v58 = vpop.f32.mrb[86].mxu0 }
0x25a8   :  { %v5448_v42 = vpop.f32.mrb[87].mxu0  ;;  %5469 = vmatmul.mubr.msk.f32.vlgmr.msra.gmra.mrb[34].mxu1 %vm1325_vm7, %v3426_v58 }
0x25a9   :  { %5916 = vmatpush3.bf16.msra.mxu1 %v7204_v59  ;;  %5479 = vmatprep.mubr.msk.f32.mxu1 %vm6254_vm2, %v6253_v16 }
0x25aa   :  { %5917 = vmatprep.subr.bf16.mxu1 %v6255_v12 }
0x25ad   :  { %5919 = vmatpush3.bf16.msra.mxu1 %v7210_v21 }
0x25ae   :  { %5920 = vmatprep.subr.bf16.mxu1 %v6255_v12 }
0x267b   :  { %v3569_v55 = vpop.f32.mrb[34].mxu1 }
0x267c   :  { %v3570_v61 = vadd.f32 %v3569_v55, %v3496_v24  ;;  %v5470_v62 = vpop.f32.mrb[35].mxu1 }
0x267e   :  { %v3573_v13 = vadd.f32 %v7187_v44, %v3570_v61 }
0x2680   :  { %6099 = vtanh.f32 %v3573_v13  ;;  %v4595_v1 = vmul.f32 -1.442695, %v3573_v13 }
0x2682   :  { %6101 = vpow2.f32 %v4595_v1 }
0x268a   :  { %v6100_v46 = vpop.eup %6099 }
0x268b   :  { %3583 = vrot.lane.b32.xlu0 %v6100_v46, %s6256_s27 }
0x268c   :  { %v6102_v49 = vpop.eup %6101 }
0x268d   :  { %v3577_v4 = vadd.f32 1.0, %v6102_v49 }
0x268f   :  { %6103 = vrcp.f32 %v3577_v4 }
0x2699   :  { %v6104_v5 = vpop.eup %6103 }
0x269a   :  { %v3581_v56 = vmul.f32 %v6104_v5, %v7352_v15 }
0x26fd   :  { %v3584_v3 = vpop.permute.xlu0 %3583 }
0x26fe   :  { %v3586_v23 = vmul.f32 %v6104_v5, %v3584_v3 }
0x2700   :  { %3588 = vrot.lane.b32.xlu1 %v3586_v23, %s6257_s3 }
0x2772   :  { %v3589_v53 = vpop.permute.xlu1 %3588 }
0x2773   :  { %v7418_v20 = vadd.f32 %v3589_v53, %v3581_v56 }
0x2775   :  { %6105 = vtanh.f32 %v7418_v20 }
0x277f   :  { %v6106_v63 = vpop.eup %6105 }
0x2780   :  { %3594 = vrot.lane.b32.xlu1 %v6106_v63, %s6256_s27 }
0x27f2   :  { %v3595_v9 = vpop.permute.xlu1 %3594 }
0x27f3   :  { %v3597_v19 = vmul.f32 %v6104_v5, %v3595_v9 }
0x27f5   :  { %3599 = vrot.lane.b32.xlu0 %v3597_v19, %s6257_s3 }
0x2867   :  { %v3600_v39 = vpop.permute.xlu0 %3599 }
0x2868   :  { %5480 = vmatmul.mubr.msk.f32.vlgmr.msra.gmra.mrb[36].mxu1 %vm1325_vm7, %v3600_v39  ;;  %5526 = vmatmul.mubr.msk.f32.vlgmr.msra.gmra.mrb[88].mxu0 %vm1325_vm7, %v3600_v39 }
0x2869   :  { %5922 = vmatpush3.bf16.msra.mxu1 %v7258_v22  ;;  %5514 = vmatprep.mubr.msk.f32.mxu1 %vm6254_vm2, %v6253_v16 }
0x286a   :  { %5923 = vmatprep.subr.bf16.mxu1 %v6255_v12  ;;  %5952 = vmatpush3.bf16.msra.mxu0 %v7142_v6 }
0x286b   :  { %5953 = vmatprep.subr.bf16.mxu0 %v6255_v12  ;;  %5536 = vmatprep.mubr.msk.f32.mxu0 %vm6254_vm2, %v6253_v16 }
0x286d   :  { %5925 = vmatpush3.bf16.msra.mxu1 %v7264_v37 }
0x286e   :  { %5926 = vmatprep.subr.bf16.mxu1 %v6255_v12  ;;  %5955 = vmatpush3.bf16.msra.mxu0 %v7162_v33 }
0x286f   :  { %5956 = vmatprep.subr.bf16.mxu0 %v6255_v12 }
0x2871   :  { %5928 = vmatpush3.bf16.msra.mxu1 %v7274_v27 }
0x2872   :  { %5929 = vmatprep.subr.bf16.mxu1 %v6255_v12 }
0x2875   :  { %5931 = vmatpush3.bf16.msra.mxu1 %v7284_v31 }
0x2876   :  { %5932 = vmatprep.subr.bf16.mxu1 %v6255_v12 }
0x2879   :  { %5934 = vmatpush3.bf16.msra.mxu1 %v7294_v38 }
0x287a   :  { %5935 = vmatprep.subr.bf16.mxu1 %v6255_v12 }
0x287d   :  { %5937 = vmatpush3.bf16.msra.mxu1 %v7304_v14 }
0x287e   :  { %5938 = vmatprep.subr.bf16.mxu1 %v6255_v12 }
0x2881   :  { %5940 = vmatpush3.bf16.msra.mxu1 %v7314_v45 }
0x2882   :  { %5941 = vmatprep.subr.bf16.mxu1 %v6255_v12 }
0x2885   :  { %5943 = vmatpush3.bf16.msra.mxu1 %v7325_v50 }
0x2886   :  { %5986 = vmatprep.subr.bf16.mxu1 %v6255_v12 }
0x293b   :  { %v3669_v15 = vpop.f32.mrb[36].mxu1  ;;  %v3843_v24 = vpop.f32.mrb[88].mxu0 }
0x293c   :  { %v7450_v28 = vadd.f32 %v7234_v0, %v3669_v15  ;;  %v5481_v7 = vpop.f32.mrb[37].mxu1  ;;  %v5527_v17 = vpop.f32.mrb[89].mxu0 }
0x293e   :  { %v3673_v40 = vsel %vm2978_vm8, %v7450_v28, -inf }
0x293f   :  { %3674 = vmax.xlane.f32.xlu1 %v3673_v40 }
0x29cc   :  { %v7454_v41 = vpop.xlane.xlu1 %3674 }
0x29cd   :  { %vm3685_vm1 = vcmp.eq.f32.partialorder %v7450_v28, %v7454_v41 }
0x29ce   :  { %v3686_v25 = vsel %vm3685_vm1, %v6809_v18, 128 }
0x29cf   :  { %v3687_v43 = vsel %vm2978_vm8, %v3686_v25, 2147483647 }
0x29d0   :  { %v3689_v29 = vshra.s32 %v3687_v43, 16  ;;  %v3688_v11 = vand.u32 65535, %v3687_v43 }
0x29d2   :  { %v3691_v47 = vcvt.s32.f32 %v3689_v29  ;;  %v3690_v48 = vcvt.s32.f32 %v3688_v11 }
0x29d4   :  { %3692 = vmin.xlane.f32.xlu0 %v3691_v47 }
0x2a61   :  { %v3693_v8 = vpop.xlane.xlu0 %3692 }
0x2a62   :  { %vm3694_vm3 = vcmp.eq.f32.partialorder %v3691_v47, %v3693_v8  ;;  %v3699_v51 = vcvt.f32.s32 %v3693_v8 }
0x2a63   :  { %v3695_v32 = vsel %vm3694_vm3, %v3690_v48, inf }
0x2a64   :  { %3696 = vmin.xlane.f32.xlu0 %v3695_v32  ;;  %v3700_v35 = vshll.u32 %v3699_v51, 16 }
0x2af1   :  { %v3697_v52 = vpop.xlane.xlu0 %3696 }
0x2af2   :  { %v3698_v54 = vcvt.f32.s32 %v3697_v52 }
0x2af4   :  { %v3701_v58 = vadd.s32 %v3700_v35, %v3698_v54 }
0x2af6   :  { %vm3704_vm5 = vcmp.eq.s32.totalorder %v6809_v18, %v3701_v58  ;;  %v7463_v42 = vsel %vm3702_vm4, %v3701_v58, %v7397_v57 }
0x2af7   :  { %5515 = vmatmul.mubr.msk.f32.vlgmr.msra.gmra.mrb[38].mxu1 %vm3704_vm5, %v6258_v10 }
0x2af8   :  { %5988 = vmatpush3.bf16.msra.mxu1 %v7153_v30  ;;  %5593 = vmatprep.mubr.msk.f32.mxu1 %vm6254_vm2, %v6253_v16 }
0x2af9   :  { %5989 = vmatprep.subr.bf16.mxu1 %v6255_v12 }
0x2afc   :  { %5991 = vmatpush3.bf16.msra.mxu1 %v7166_v34 }
0x2afd   :  { %5992 = vmatprep.subr.bf16.mxu1 %v6255_v12 }
0x2bca   :  { %v3773_v55 = vpop.f32.mrb[38].mxu1 }
0x2bcb   :  { %v5516_v61 = vpop.f32.mrb[39].mxu1  ;;  %5537 = vmatmul.mubr.msk.f32.vlgmr.msra.gmra.mrb[90].mxu0 %vm1325_vm7, %v3773_v55 }
0x2bcc   :  { %5958 = vmatpush3.bf16.msra.mxu0 %v7204_v59  ;;  %5547 = vmatprep.mubr.msk.f32.mxu0 %vm6254_vm2, %v6253_v16 }
0x2bcd   :  { %5959 = vmatprep.subr.bf16.mxu0 %v6255_v12 }
0x2bd0   :  { %5961 = vmatpush3.bf16.msra.mxu0 %v7210_v21 }
0x2bd1   :  { %5962 = vmatprep.subr.bf16.mxu0 %v6255_v12 }
0x2c9e   :  { %v3916_v30 = vpop.f32.mrb[90].mxu0 }
0x2c9f   :  { %v3917_v57 = vadd.f32 %v3916_v30, %v3843_v24  ;;  %v5538_v34 = vpop.f32.mrb[91].mxu0 }
0x2ca1   :  { %v3920_v62 = vadd.f32 %v7187_v44, %v3917_v57 }
0x2ca3   :  { %6107 = vtanh.f32 %v3920_v62  ;;  %v4601_v46 = vmul.f32 -1.442695, %v3920_v62  ;;  %v3329_v62 = vsub.f32 %v7384_v26, %v7388_v36  ;;  %v2982_v36 = vsub.f32 %v7237_v2, %v7243_v60 }
0x2ca5   :  { %6109 = vpow2.f32 %v4601_v46 }
0x2cad   :  { %v6108_v13 = vpop.eup %6107 }
0x2cae   :  { %3930 = vrot.lane.b32.xlu1 %v6108_v13, %s6256_s27  ;;  %v3330_v13 = vmul.f32 1.442695, %v3329_v62 }
0x2caf   :  { %v6110_v1 = vpop.eup %6109 }
0x2cb0   :  { %v3924_v49 = vadd.f32 1.0, %v6110_v1 }
0x2cb2   :  { %6111 = vrcp.f32 %v3924_v49 }
0x2cbc   :  { %v6112_v4 = vpop.eup %6111 }
0x2cbd   :  { %v3928_v23 = vmul.f32 %v6112_v4, %v7418_v20 }
0x2d20   :  { %v3931_v5 = vpop.permute.xlu1 %3930 }
0x2d21   :  { %v3933_v3 = vmul.f32 %v6112_v4, %v3931_v5 }
0x2d23   :  { %3935 = vrot.lane.b32.xlu0 %v3933_v3, %s6257_s3 }
0x2d95   :  { %v3936_v56 = vpop.permute.xlu0 %3935 }
0x2d96   :  { %v7483_v53 = vadd.f32 %v3936_v56, %v3928_v23 }
0x2d98   :  { %6113 = vtanh.f32 %v7483_v53 }
0x2da2   :  { %v6114_v63 = vpop.eup %6113 }
0x2da3   :  { %3941 = vrot.lane.b32.xlu1 %v6114_v63, %s6256_s27  ;;  %v2983_v63 = vmul.f32 1.442695, %v2982_v36 }
0x2e15   :  { %v3942_v9 = vpop.permute.xlu1 %3941 }
0x2e16   :  { %v3944_v19 = vmul.f32 %v6112_v4, %v3942_v9  ;;  %v3676_v9 = vsub.f32 %v7450_v28, %v7454_v41 }
0x2e18   :  { %3946 = vrot.lane.b32.xlu1 %v3944_v19, %s6257_s3 }
0x2e8a   :  { %v3947_v39 = vpop.permute.xlu1 %3946 }
0x2e8b   :  { %5548 = vmatmul.mubr.msk.f32.vlgmr.msra.gmra.mrb[92].mxu0 %vm1325_vm7, %v3947_v39  ;;  %5594 = vmatmul.mubr.msk.f32.vlgmr.msra.gmra.mrb[40].mxu1 %vm1325_vm7, %v3947_v39 }
0x2e8c   :  { %5964 = vmatpush3.bf16.msra.mxu0 %v7258_v22  ;;  %5582 = vmatprep.mubr.msk.f32.mxu0 %vm6254_vm2, %v6253_v16 }
0x2e8d   :  { %5965 = vmatprep.subr.bf16.mxu0 %v6255_v12  ;;  %5994 = vmatpush3.bf16.msra.mxu1 %v7142_v6 }
0x2e8e   :  { %5995 = vmatprep.subr.bf16.mxu1 %v6255_v12  ;;  %5604 = vmatprep.mubr.msk.f32.mxu1 %vm6254_vm2, %v6253_v16 }
0x2e90   :  { %5967 = vmatpush3.bf16.msra.mxu0 %v7264_v37 }
0x2e91   :  { %5968 = vmatprep.subr.bf16.mxu0 %v6255_v12  ;;  %5997 = vmatpush3.bf16.msra.mxu1 %v7162_v33 }
0x2e92   :  { %5998 = vmatprep.subr.bf16.mxu1 %v6255_v12 }
0x2e94   :  { %5970 = vmatpush3.bf16.msra.mxu0 %v7274_v27 }
0x2e95   :  { %5971 = vmatprep.subr.bf16.mxu0 %v6255_v12 }
0x2e98   :  { %5973 = vmatpush3.bf16.msra.mxu0 %v7284_v31 }
0x2e99   :  { %5974 = vmatprep.subr.bf16.mxu0 %v6255_v12 }
0x2e9c   :  { %5976 = vmatpush3.bf16.msra.mxu0 %v7294_v38 }
0x2e9d   :  { %5977 = vmatprep.subr.bf16.mxu0 %v6255_v12 }
0x2ea0   :  { %5979 = vmatpush3.bf16.msra.mxu0 %v7304_v14 }
0x2ea1   :  { %5980 = vmatprep.subr.bf16.mxu0 %v6255_v12 }
0x2ea4   :  { %5982 = vmatpush3.bf16.msra.mxu0 %v7314_v45 }
0x2ea5   :  { %5983 = vmatprep.subr.bf16.mxu0 %v6255_v12 }
0x2ea8   :  { %5985 = vmatpush3.bf16.msra.mxu0 %v7325_v50 }
0x2f5e   :  { %v4016_v6 = vpop.f32.mrb[92].mxu0  ;;  %v4190_v33 = vpop.f32.mrb[40].mxu1 }
0x2f5f   :  { %v7514_v22 = vadd.f32 %v7234_v0, %v4016_v6  ;;  %v5549_v37 = vpop.f32.mrb[93].mxu0  ;;  %v5595_v27 = vpop.f32.mrb[41].mxu1 }
0x2f61   :  { %v4020_v31 = vsel %vm2978_vm8, %v7514_v22, -inf }
0x2f62   :  { %4021 = vmax.xlane.f32.xlu0 %v4020_v31 }
0x2fef   :  { %v4022_v38 = vpop.xlane.xlu0 %4021 }
0x2ff0   :  { %vm4032_vm6 = vcmp.eq.f32.partialorder %v7514_v22, %v4022_v38  ;;  %v4023_v46 = vsub.f32 %v7514_v22, %v4022_v38 }
0x2ff1   :  { %v4033_v14 = vsel %vm4032_vm6, %v6809_v18, 128 }
0x2ff2   :  { %v4034_v45 = vsel %vm2978_vm8, %v4033_v14, 2147483647  ;;  %v4024_v1 = vmul.f32 1.442695, %v4023_v46 }
0x2ff3   :  { %v4036_v20 = vshra.s32 %v4034_v45, 16  ;;  %v4035_v15 = vand.u32 65535, %v4034_v45 }
0x2ff5   :  { %v4038_v50 = vcvt.s32.f32 %v4036_v20  ;;  %v4037_v7 = vcvt.s32.f32 %v4035_v15 }
0x2ff7   :  { %4039 = vmin.xlane.f32.xlu1 %v4038_v50 }
0x3084   :  { %v4040_v24 = vpop.xlane.xlu1 %4039 }
0x3085   :  { %vm4041_vm9 = vcmp.eq.f32.partialorder %v4038_v50, %v4040_v24  ;;  %v4046_v40 = vcvt.f32.s32 %v4040_v24 }
0x3086   :  { %v4042_v17 = vsel %vm4041_vm9, %v4037_v7, inf }
0x3087   :  { %4043 = vmin.xlane.f32.xlu0 %v4042_v17  ;;  %v4047_v43 = vshll.u32 %v4046_v40, 16 }
0x3114   :  { %v4044_v25 = vpop.xlane.xlu0 %4043 }
0x3115   :  { %v4045_v29 = vcvt.f32.s32 %v4044_v25 }
0x3117   :  { %v4048_v47 = vadd.s32 %v4047_v43, %v4045_v29 }
0x3119   :  { %vm4051_vm11 = vcmp.eq.s32.totalorder %v6809_v18, %v4048_v47  ;;  %v7524_v11 = vsel %vm4049_vm10, %v4048_v47, %v7463_v42 }
0x311a   :  { %5583 = vmatmul.mubr.msk.f32.vlgmr.msra.gmra.mrb[94].mxu0 %vm4051_vm11, %v6258_v10 }
0x31ed   :  { %v4120_v8 = vpop.f32.mrb[94].mxu0 }
0x31ee   :  { %v5584_v48 = vpop.f32.mrb[95].mxu0  ;;  %5605 = vmatmul.mubr.msk.f32.vlgmr.msra.gmra.mrb[42].mxu1 %vm1325_vm7, %v4120_v8 }
0x31ef   :  { %6000 = vmatpush3.bf16.msra.mxu1 %v7204_v59  ;;  %5615 = vmatprep.mubr.msk.f32.mxu1 %vm6254_vm2, %v6253_v16  ;;  %vm4406_vm2 = vcmask 254976  }
0x31f0   :  { %6001 = vmatprep.subr.bf16.mxu1 %v6255_v12 }
0x31f3   :  { %6003 = vmatpush3.bf16.msra.mxu1 %v7210_v21 }
0x32c1   :  { %v4263_v32 = vpop.f32.mrb[42].mxu1 }
0x32c2   :  { %v4264_v51 = vadd.f32 %v4263_v32, %v4190_v33  ;;  %v5606_v52 = vpop.f32.mrb[43].mxu1 }
0x32c4   :  { %v4267_v35 = vadd.f32 %v7187_v44, %v4264_v51 }
0x32c6   :  { %6115 = vtanh.f32 %v4267_v35  ;;  %v4607_v54 = vmul.f32 -1.442695, %v4267_v35 }
0x32c8   :  { %6117 = vpow2.f32 %v4607_v54 }
0x32d0   :  { %v6116_v10 = vpop.eup %6115 }
0x32d1   :  { %4277 = vrot.lane.b32.xlu0 %v6116_v10, %s6256_s27 }
0x32d2   :  { %v6118_v58 = vpop.eup %6117 }
0x32d3   :  { %v4271_v59 = vadd.f32 1.0, %v6118_v58 }
0x32d5   :  { %6119 = vrcp.f32 %v4271_v59 }
0x32df   :  { %v6120_v42 = vpop.eup %6119 }
0x32e0   :  { %v4275_v12 = vmul.f32 %v6120_v42, %v7483_v53 }
0x3343   :  { %v4278_v16 = vpop.permute.xlu0 %4277 }
0x3344   :  { %v4280_v55 = vmul.f32 %v6120_v42, %v4278_v16 }
0x3346   :  { %4282 = vrot.lane.b32.xlu1 %v4280_v55, %s6257_s3 }
0x33b8   :  { %v4283_v21 = vpop.permute.xlu1 %4282 }
0x33b9   :  { %v7537_v61 = vadd.f32 %v4283_v21, %v4275_v12 }
0x33bb   :  { %6121 = vtanh.f32 %v7537_v61 }
0x33bc   :  { %6123 = vpow2.f32 %v3330_v13 }
0x33bd   :  { %6125 = vpow2.f32 %v4024_v1 }
0x33be   :  { %6127 = vpow2.f32 %v2983_v63 }
0x33c5   :  { %v6122_v44 = vpop.eup %6121 }
0x33c6   :  { %4288 = vrot.lane.b32.xlu1 %v6122_v44, %s6256_s27  ;;  %v6124_v23 = vpop.eup %6123  ;;  %s6260_s27 = smov [#allocation5]  }
0x33c7   :  { %v3332_v56 = vsel %vm2978_vm8, %v6124_v23, 0.0  ;;  %v6126_v53 = vpop.eup %6125  ;;  %s4418_s25 = sshll.u32 %s6260_s27, 4  ;;  %s7565_s25 = int_to_ptr.vmem [resolvable:$true] %s4418_s25 }
0x33c8   :  { %v4026_v26 = vsel %vm2978_vm8, %v6126_v53, 0.0  ;;  %v6128_v60 = vpop.eup %6127 }
0x33c9   :  { %v2985_v41 = vsel %vm2978_vm8, %v6128_v60, 0.0 }
0x3438   :  { %v4289_v30 = vpop.permute.xlu1 %4288 }
0x3439   :  { %v4291_v57 = vmul.f32 %v6120_v42, %v4289_v30 }
0x343b   :  { %4293 = vrot.lane.b32.xlu0 %v4291_v57, %s6257_s3 }
0x34ad   :  { %v4294_v34 = vpop.permute.xlu0 %4293 }
0x34ae   :  { %5616 = vmatmul.mubr.msk.f32.vlgmr.msra.gmra.mrb[44].mxu1 %vm1325_vm7, %v4294_v34  ;;  %4407 = vst.msk [vmem:[#allocation8] sm:$0x3] %vm4406_vm2, %v4294_v34 }
0x3581   :  { %v4363_v49 = vpop.f32.mrb[44].mxu1 }
0x3582   :  { %v4364_v4 = vadd.f32 %v7234_v0, %v4363_v49  ;;  %v5617_v5 = vpop.f32.mrb[45].mxu1  ;;  %v3677_v0 = vmul.f32 1.442695, %v3676_v9 }
0x3584   :  { %v4367_v3 = vsel %vm2978_vm8, %v4364_v4, -inf  ;;  %6129 = vpow2.f32 %v3677_v0 }
0x3585   :  { %4368 = vmax.xlane.f32.xlu1 %v4367_v3 }
0x3589   :  { %3333 = vadd.xlane.f32.xlu1 %v3332_v56 }
0x358d   :  { %4027 = vadd.xlane.f32.xlu1 %v4026_v26 }
0x358e   :  { %v6130_v31 = vpop.eup %6129 }
0x358f   :  { %v3679_v14 = vsel %vm2978_vm8, %v6130_v31, 0.0 }
0x3612   :  { %v4369_v19 = vpop.xlane.xlu1 %4368 }
0x3613   :  { %v7555_v39 = vsub.f32 %v4364_v4, %v4369_v19  ;;  %vm4379_vm7 = vcmp.eq.f32.partialorder %v4364_v4, %v4369_v19 }
0x3614   :  { %v4380_v6 = vsel %vm4379_vm7, %v6809_v18, 128 }
0x3615   :  { %v4371_v33 = vmul.f32 1.442695, %v7555_v39  ;;  %v4381_v22 = vsel %vm2978_vm8, %v4380_v6, 2147483647 }
0x3616   :  { %v3334_v37 = vpop.xlane.xlu1 %3333  ;;  %v4383_v27 = vshra.s32 %v4381_v22, 16  ;;  %v4382_v40 = vand.u32 65535, %v4381_v22 }
0x3617   :  { %6131 = vpow2.f32 %v4371_v33 }
0x3618   :  { %6133 = vlog2.f32 %v3334_v37  ;;  %v4385_v2 = vcvt.s32.f32 %v4383_v27  ;;  %v4384_v43 = vcvt.s32.f32 %v4382_v40 }
0x361a   :  { %4386 = vmin.xlane.f32.xlu0 %v4385_v2  ;;  %v4028_v28 = vpop.xlane.xlu1 %4027 }
0x361b   :  { %6135 = vlog2.f32 %v4028_v28 }
0x361e   :  { %2986 = vadd.xlane.f32.xlu0 %v2985_v41 }
0x3621   :  { %v6132_v38 = vpop.eup %6131 }
0x3622   :  { %v6134_v45 = vpop.eup %6133  ;;  %3680 = vadd.xlane.f32.xlu0 %v3679_v14  ;;  %v4373_v24 = vsel %vm2978_vm8, %v6132_v38, 0.0 }
0x3623   :  { %v3336_v20 = vmul.f32 0.6931472, %v6134_v45 }
0x3625   :  { %v6136_v50 = vpop.eup %6135  ;;  %v3337_v15 = vsub.f32 %v3329_v62, %v3336_v20 }
0x3626   :  { %v4030_v7 = vmul.f32 0.6931472, %v6136_v50  ;;  %4374 = vadd.xlane.f32.xlu0 %v4373_v24 }
0x3627   :  { %4399 = vst [vmem:[#allocation5 + $0x2] sm:$0x3] %v3337_v15 }
0x3628   :  { %v4031_v17 = vsub.f32 %v4023_v46, %v4030_v7 }
0x362a   :  { %4401 = vst [vmem:[#allocation5 + $0x6] sm:$0x3] %v4031_v17 }
0x363c   :  { %4409 = vrot.lane.b32.xlu0 %v7537_v61, %s6259_s17 }
0x36a7   :  { %v4387_v25 = vpop.xlane.xlu0 %4386 }
0x36a8   :  { %vm4388_vm12 = vcmp.eq.f32.partialorder %v4385_v2, %v4387_v25 }
0x36a9   :  { %v4389_v29 = vsel %vm4388_vm12, %v4384_v43, inf }
0x36aa   :  { %4390 = vmin.xlane.f32.xlu1 %v4389_v29 }
0x36ab   :  { %v2987_v47 = vpop.xlane.xlu0 %2986 }
0x36ac   :  { %6137 = vlog2.f32 %v2987_v47 }
0x36af   :  { %v3681_v8 = vpop.xlane.xlu0 %3680 }
0x36b0   :  { %6139 = vlog2.f32 %v3681_v8 }
0x36b3   :  { %v4375_v48 = vpop.xlane.xlu0 %4374 }
0x36b4   :  { %6141 = vlog2.f32 %v4375_v48 }
0x36b6   :  { %v6138_v32 = vpop.eup %6137 }
0x36b7   :  { %v2989_v51 = vmul.f32 0.6931472, %v6138_v32  ;;  %v4410_v52 = vpop.permute.xlu0 %4409 }
0x36b8   :  { %4412 = vst.msk [vmem:[#allocation9] sm:$0x3] %vm4406_vm2, %v4410_v52 }
0x36b9   :  { %v2990_v35 = vsub.f32 %v2982_v36, %v2989_v51 }
0x36ba   :  { %v6140_v10 = vpop.eup %6139 }
0x36bb   :  { %4398 = vst [vmem:[#allocation5] sm:$0x3] %v2990_v35  ;;  %v3683_v54 = vmul.f32 0.6931472, %v6140_v10 }
0x36bd   :  { %v3684_v58 = vsub.f32 %v3676_v9, %v3683_v54 }
0x36be   :  { %v6142_v59 = vpop.eup %6141 }
0x36bf   :  { %4400 = vst [vmem:[#allocation5 + $0x4] sm:$0x3] %v3684_v58  ;;  %v4377_v42 = vmul.f32 0.6931472, %v6142_v59 }
0x36c1   :  { %v4378_v16 = vsub.f32 %v7555_v39, %v4377_v42 }
0x36c3   :  { %4402 = vst [vmem:[#allocation5 + $0x8] sm:$0x3] %v4378_v16 }
0x36c4   :  { %6166 = shalt.err (!%p6163_p9)
}
0x36c5   :  { %s6167_s14 = scalar_lea.hbm %s7646_s21, 32 }
0x36c6   :  { %p6168_p10 = scmp.ne.s32.totalorder %s7646_s21, %s6167_s14  ;;  %p6171_p11 = scmp.lt.u32.totalorder %s6167_s14, %s7646_s21 }
0x36c8   :  { %p6173_p12 = pnand %p6171_p11, %p6168_p10 }
0x36ca   :  { %6176 = shalt.err (!%p6173_p12)
}
0x36cb   :  { %4454 = dma.vmem_to_hbm [thread:$0]  %s4452_s12, 32, %s7646_s21, [#allocation10]  }
0x36cc   :  { %s6177_s26 = scalar_lea.vmem %s7565_s25, 160  ;;  %p6182_p0 = scmp.lt.s32.totalorder %s7565_s25, %s7565_s25 }
0x36cd   :  { %p6178_p13 = scmp.ne.s32.totalorder %s7565_s25, %s6177_s26  ;;  %p6183_p1 = scmp.lt.s32.totalorder %s6177_s26, %s6177_s26 }
0x36cf   :  { %p6184_p2 = por %p6183_p1, %p6182_p0 }
0x36d1   :  { %p6185_p3 = pnand %p6184_p2, %p6178_p13 }
0x36d3   :  { %6188 = shalt.err (!%p6185_p3)
}
0x36d4   :  { %s6189_s16 = scalar_lea.hbm %s7643_s18, 160 }
0x36d5   :  { %p6190_p4 = scmp.ne.s32.totalorder %s7643_s18, %s6189_s16  ;;  %p6193_p5 = scmp.lt.u32.totalorder %s6189_s16, %s7643_s18 }
0x36d7   :  { %p6195_p6 = pnand %p6193_p5, %p6190_p4 }
0x36d9   :  { %6198 = shalt.err (!%p6195_p6)
}
0x36da   :  { %s6262_s21 = smov 2   ;;  %v4393_v55 = vcvt.f32.s32 %v4387_v25  ;;  %s6263_s24 = smov [#allocation6]   ;;  %vm4396_vm8 = vcmp.eq.s32.totalorder %v6809_v18, 4  ;;  %vm4403_vm13 = vcmask 33792  }
0x36db   :  { %4424 = dma.vmem_to_hbm [thread:$0]  %s7565_s25, 160, %s7643_s18, [#allocation3], %s6257_s3, %s6257_s3, %s6262_s21  }
0x36dc   :  { %v4394_v21 = vshll.u32 %v4393_v55, 16  ;;  %s4431_s17 = sshll.u32 %s6263_s24, 4  ;;  %s6264_s27 = smov [#allocation8]   ;;  %s4432_s17 = int_to_ptr.vmem [resolvable:$true] %s4431_s17 }
0x36dd   :  { %s4441_s2 = sshll.u32 %s6264_s27, 4  ;;  %s6199_s12 = scalar_lea.vmem %s4432_s17, 32  ;;  %s4442_s2 = int_to_ptr.vmem [resolvable:$true] %s4441_s2 }
0x36de   :  { %p6200_p7 = scmp.ne.s32.totalorder %s4432_s17, %s6199_s12  ;;  %p6204_p8 = scmp.lt.s32.totalorder %s4432_s17, %s4432_s17 }
0x36df   :  { %p6205_p9 = scmp.lt.s32.totalorder %s6199_s12, %s6199_s12 }
0x36e1   :  { %p6206_p10 = por %p6205_p9, %p6204_p8 }
0x36e3   :  { %p6207_p11 = pnand %p6206_p10, %p6200_p7 }
0x3737   :  { %v4391_v12 = vpop.xlane.xlu1 %4390 }
0x3738   :  { %v4392_v61 = vcvt.f32.s32 %v4391_v12 }
0x373a   :  { %v4395_v44 = vadd.s32 %v4394_v21, %v4392_v61 }
0x373c   :  { %v4397_v30 = vsel %vm4396_vm8, %v4395_v44, %v7524_v11 }
0x373d   :  { %4404 = vst.msk [vmem:[#allocation6] sm:$0x3] %vm4403_vm13, %v4397_v30 }
0x373e   :  { %6210 = shalt.err (!%p6207_p11)
}
0x373f   :  { %s6211_s25 = scalar_lea.hbm %s7644_s19, 32 }
0x3740   :  { %p6212_p12 = scmp.ne.s32.totalorder %s7644_s19, %s6211_s25  ;;  %p6215_p13 = scmp.lt.u32.totalorder %s6211_s25, %s7644_s19 }
0x3742   :  { %p6217_p0 = pnand %p6215_p13, %p6212_p12 }
0x3744   :  { %6220 = shalt.err (!%p6217_p0)
}
0x3745   :  { %4434 = dma.vmem_to_hbm [thread:$0]  %s4432_s17, 32, %s7644_s19, [#allocation7]  }
0x3746   :  { %s6221_s28 = scalar_lea.vmem %s4442_s2, 32  ;;  %p6226_p2 = scmp.lt.s32.totalorder %s4442_s2, %s4442_s2 }
0x3747   :  { %p6222_p1 = scmp.ne.s32.totalorder %s4442_s2, %s6221_s28  ;;  %p6227_p3 = scmp.lt.s32.totalorder %s6221_s28, %s6221_s28 }
0x3749   :  { %p6228_p4 = por %p6227_p3, %p6226_p2 }
0x374b   :  { %p6229_p5 = pnand %p6228_p4, %p6222_p1 }
0x374d   :  { %6232 = shalt.err (!%p6229_p5)
}
0x374e   :  { %s6233_s29 = scalar_lea.hbm %s7645_s20, 32 }
0x374f   :  { %p6234_p6 = scmp.ne.s32.totalorder %s7645_s20, %s6233_s29  ;;  %p6237_p7 = scmp.lt.u32.totalorder %s6233_s29, %s7645_s20 }
0x3751   :  { %p6239_p8 = pnand %p6237_p7, %p6234_p6 }
0x3753   :  { %6242 = shalt.err (!%p6239_p8)
}
0x3754   :  { %4444 = dma.vmem_to_hbm [thread:$0]  %s4442_s2, 32, %s7645_s20, [#allocation7]  }
0x3755   :  { %6245 = dma.done.wait [#allocation3], 160  }
0x3756   :  { %6246 = vsyncadd [#allocation3], 4294967136 }
0x3757   :  { %6247 = dma.done.wait [#allocation7], 64  }
0x3758   :  { %6248 = vsyncadd [#allocation7], 4294967232 }
0x3759   :  { %6249 = dma.done.wait [#allocation10], 32  }
0x375a   :  { %6250 = vsyncadd [#allocation10], 4294967264 }
0x375b   :  { %4467 = vsyncpa [#allocation3], 1 }
0x375c   :  { %4468 = vsyncpa [#allocation7], 1 }
0x375d   :  { %4469 = vsyncpa [#allocation10], 1 }
0x375e   :  { %4470 = vsyncpa [#allocation4], 1 }

</bundles_post_ra>
